<compile_context>
chip_gen: v6e
topology: v6e:2x2x1
jax: 0.10.0
libtpu: 0.0.40
codegen_flags: <defaults>
</compile_context>

<pallas_src>
import functools

import jax
import jax.numpy as jnp
import numpy as np
from jax.experimental import pallas as pl
from jax.experimental.pallas import tpu as pltpu

EPS = 1e-5


def conformer_kernel(
    # per-batch data
    x_ref, attn_bias_ref, mpad_ref,
    # shared data / weights
    pproj_ref, ln_g_ref, ln_b_ref,
    w1m_ref, w2m_ref, bias_ff_ref, bias_d_ref,
    wqkv_ref, bqkv_ref, pos_uv_ref, wo_ref,
    pw1_w_ref, pw1_b_ref, dw_w_ref, pw2_w_ref,
    w1f_ref, w2f_ref,
    # outputs
    y_ref, kv_ref,
    # scratch
    lhs_s, rhs_s, v_s, gpad_s,
    *, num_heads,
):
    T = x_ref.shape[1]
    D = x_ref.shape[2]
    H = num_heads
    dk = v_s.shape[2]
    HDK = H * dk
    K = dw_w_ref.shape[0]
    pad = (K - 1) // 2
    padn = (gpad_s.shape[0] - T) // 2          # sublane-aligned pad rows in the scratch

    x = x_ref[0]                # (T, D)  f32 residual stream
    attn_bias = attn_bias_ref[0]  # (1, T)  additive key mask: 0 valid, -1e30 masked
    mpad = mpad_ref[0]          # (T, 1)  1.0 = valid frame (conv pad mask)

    bf16 = jnp.bfloat16

    def mm(a, w):
        # bf16 MXU matmul, f32 accumulate.
        return jnp.dot(a.astype(bf16), w.astype(bf16),
                       preferred_element_type=jnp.float32)

    def mmt(a, b):
        # a @ b.T (contract last dims), bf16 operands, f32 accumulate.
        return jax.lax.dot_general(
            a, b, (((1,), (1,)), ((), ())), preferred_element_type=jnp.float32)

    def swish(z):
        return z * jax.nn.sigmoid(z)

    def ln(z, idx):
        g = ln_g_ref[idx:idx + 1, :]
        b = ln_b_ref[idx:idx + 1, :]
        mu = jnp.mean(z, axis=-1, keepdims=True)
        var = jnp.mean((z - mu) ** 2, axis=-1, keepdims=True)
        return (z - mu) * jax.lax.rsqrt(var + EPS) * g + b

    # ---------------- macaron feed-forward: x = x + 0.5 * FFN(LN(x)) ----------------
    h1 = swish(mm(ln(x, 0), w1m_ref[...]) + bias_ff_ref[0:1, :])
    x = x + 0.5 * (mm(h1, w2m_ref[...]) + bias_d_ref[0:1, :])

    # ---------------- relative-position multi-head self-attention ----------------
    residual = x
    xn = ln(x, 1)

    # One wide fused projection. The q columns/bias are pre-scaled by 1/sqrt(dk).
    qkv = mm(xn, wqkv_ref[...]) + bqkv_ref[...]            # (T, 3*H*dk)
    q = qkv[:, :HDK]
    k = qkv[:, HDK:2 * HDK]
    v = qkv[:, 2 * HDK:]

    # Lane-dense KV cache: two direct bf16 ref stores, no concat temporary.
    kv_ref[0, :, :HDK] = k.astype(kv_ref.dtype)
    kv_ref[0, :, HDK:] = v.astype(kv_ref.dtype)

    q_u = q + pos_uv_ref[0:1, :]                           # pre-scaled pos_u
    q_v = q + pos_uv_ref[1:2, :]                           # pre-scaled pos_v
    pproj = pproj_ref[...]                                 # (T, H*dk) bf16, pos @ Wp

    # Stage per-head fused operands head-major so the fori_loop below only uses
    # leading-axis dynamic indexing (cheap, well-supported) — never dynamic lane slices.
    for hh in range(H):                                    # H tiny copies, static
        lo, hi = hh * dk, (hh + 1) * dk
        lhs_s[hh, :, :dk] = q_u[:, lo:hi].astype(bf16)
        lhs_s[hh, :, dk:] = q_v[:, lo:hi].astype(bf16)
        rhs_s[hh, :, :dk] = k[:, lo:hi].astype(bf16)
        rhs_s[hh, :, dk:] = pproj[:, lo:hi]
        v_s[hh] = v[:, lo:hi].astype(bf16)

    def head_body(hh, att_acc):
        # Fused score: [q_u_h | q_v_h] @ [k_h | pproj_h]^T  == matrix_ac + matrix_bd.
        s = mmt(lhs_s[hh], rhs_s[hh])                      # (T, T) f32
        s = s + attn_bias                                  # additive key mask
        smax = jnp.max(s, axis=-1, keepdims=True)
        e = jnp.exp(s - smax)                              # masked keys underflow to 0
        denom = jnp.sum(e, axis=-1, keepdims=True)
        p_attn = e * pl.reciprocal(denom, approx=True)     # EUP reciprocal
        ctx = mm(p_attn, v_s[hh])                          # (T, dk)
        return att_acc + mm(ctx, wo_ref[hh])               # fold output projection

    att = jax.lax.fori_loop(0, H, head_body, jnp.zeros((T, D), jnp.float32))
    x = residual + att + bias_d_ref[1:2, :]                # + output-projection bias

    # ---------------- convolution module ----------------
    residual = x
    xm = ln(x, 2) * mpad                                   # masked_fill(~mask_pad, 0)

    pw1 = mm(xm, pw1_w_ref[...]) + pw1_b_ref[...]          # fused pointwise_conv1 (T,2D)
    g = pw1[:, :D] * jax.nn.sigmoid(pw1[:, D:])            # GLU over channels

    # Depthwise conv along time via shifted reads of a padded VMEM scratch ref:
    # K VPU FMAs, no concat copy, no unaligned value slices.
    if padn > 0:
        gpad_s[:padn, :] = jnp.zeros((padn, D), jnp.float32)
        gpad_s[padn + T:, :] = jnp.zeros((padn, D), jnp.float32)
    gpad_s[padn:padn + T, :] = g
    acc = jnp.zeros((T, D), jnp.float32) + bias_d_ref[2:3, :]   # depthwise bias
    for kk in range(K):
        start = padn - pad + kk
        acc = acc + gpad_s[start:start + T, :] * dw_w_ref[kk:kk + 1, :]

    # conv-internal LayerNorm + Swish + pointwise_conv2
    conv_out = (mm(swish(ln(acc, 5)), pw2_w_ref[...]) + bias_d_ref[3:4, :]) * mpad
    x = residual + conv_out

    # ---------------- feed-forward: x = x + 0.5 * FFN(LN(x)) ----------------
    h2 = swish(mm(ln(x, 3), w1f_ref[...]) + bias_ff_ref[1:2, :])
    x = x + 0.5 * (mm(h2, w2f_ref[...]) + bias_d_ref[4:5, :])

    # ---------------- final layer norm ----------------
    y_ref[0] = ln(x, 4)


def conformer_layer_forward(x, mask, pos_emb, mask_pad, p):
    """x: (B,T,D) f32, mask: (B,T,T) bool, pos_emb: (1,T,D) f32, mask_pad: (B,1,T) bool."""
    B, T, D = x.shape
    H, _, dk = p["wq"].shape
    HDK = H * dk

    f32 = jnp.float32
    cdt = jnp.bfloat16
    scale = 1.0 / float(np.sqrt(dk))

    # The kernel consumes a key-validity mask only (broadcast over queries). Verify
    # when the mask is concrete; per-query (causal / chunked) masks are unsupported.
    try:
        m_np = np.asarray(mask)
    except Exception:
        m_np = None
    if m_np is not None:
        assert np.all(m_np == m_np[:, :1, :]), \
            "conformer kernel only supports pure key-validity masks"

    def head_major(w):   # (H, D, dk) -> (D, H*dk), head-major columns
        return jnp.transpose(w, (1, 0, 2)).reshape(D, HDK)

    # ---- fused / packed / pre-scaled parameters ----
    w_qkv = jnp.concatenate(
        [head_major(p["wq"]) * scale, head_major(p["wk"]), head_major(p["wv"])],
        axis=1).astype(cdt)                                               # (D, 3*H*dk)
    b_qkv = jnp.concatenate(
        [p["bq"].reshape(1, HDK) * scale, p["bk"].reshape(1, HDK),
         p["bv"].reshape(1, HDK)], axis=1).astype(f32)                    # (1, 3*H*dk)
    pos_uv = (jnp.stack([p["pos_u"].reshape(-1), p["pos_v"].reshape(-1)], axis=0)
              * scale).astype(f32)                                        # (2, H*dk)
    wo_h = p["wo"].astype(cdt)                                            # (H, dk, D)
    # pos_emb is batch-invariant: precompute pos @ Wp once.
    pproj = (pos_emb[0].astype(f32) @ head_major(p["wp"]).astype(f32)).astype(cdt)

    pw1_w = jnp.concatenate([p["pw1a_w"], p["pw1b_w"]], axis=1).astype(cdt)   # (D, 2D)
    pw1_b = jnp.concatenate([p["pw1a_b"], p["pw1b_b"]], axis=1).astype(f32)   # (1, 2D)

    # Packed LayerNorm params: rows 0..4 = module norms, row 5 = conv-internal norm.
    ln_g = jnp.concatenate([p["ln_g"], p["cn_g"]], axis=0).astype(f32)        # (6, D)
    ln_b = jnp.concatenate([p["ln_b"], p["cn_b"]], axis=0).astype(f32)        # (6, D)
    # Packed biases: ff rows 0=b1m 1=b1f ; d rows 0=b2m 1=bo 2=dw_b 3=pw2_b 4=b2f.
    bias_ff = jnp.concatenate([p["b1m"], p["b1f"]], axis=0).astype(f32)       # (2, Dff)
    bias_d = jnp.concatenate(
        [p["b2m"], p["bo"], p["dw_b"], p["pw2_b"], p["b2f"]], axis=0).astype(f32)

    # Per-batch data: additive key-mask bias (precomputed), conv pad mask.
    attn_bias = (mask[:, :1, :].astype(f32) - 1.0) * 1e30                 # (B, 1, T)
    mpad_f = jnp.transpose(mask_pad.astype(f32), (0, 2, 1))               # (B, T, 1)

    K = p["dw_w"].shape[0]
    pad = (K - 1) // 2
    padn = ((pad + 7) // 8) * 8 if pad > 0 else 0                         # sublane aligned

    per_batch = [x.astype(f32), attn_bias, mpad_f]
    shared_arrs = [pproj, ln_g, ln_b,
                   p["w1m"].astype(cdt), p["w2m"].astype(cdt), bias_ff, bias_d,
                   w_qkv, b_qkv, pos_uv, wo_h,
                   pw1_w, pw1_b, p["dw_w"].astype(f32), p["pw2_w"].astype(cdt),
                   p["w1f"].astype(cdt), p["w2f"].astype(cdt)]

    def batched_spec(arr):
        nd = arr.ndim
        return pl.BlockSpec((1,) + tuple(arr.shape[1:]),
                            lambda b, _nd=nd: (b,) + (0,) * (_nd - 1))

    out_shape = (
        jax.ShapeDtypeStruct((B, T, D), f32),
        jax.ShapeDtypeStruct((B, T, 2 * HDK), cdt),      # bf16 lane-dense [K | V] slab
    )
    out_specs = (
        pl.BlockSpec((1, T, D), lambda b: (b, 0, 0)),
        pl.BlockSpec((1, T, 2 * HDK), lambda b: (b, 0, 0)),
    )

    scratch = [
        pltpu.VMEM((H, T, 2 * dk), cdt),      # fused score LHS  [q_u | q_v]
        pltpu.VMEM((H, T, 2 * dk), cdt),      # fused score RHS  [k   | pproj]
        pltpu.VMEM((H, T, dk), cdt),          # per-head V
        pltpu.VMEM((T + 2 * padn, D), f32),   # padded depthwise-conv buffer
    ]

    # Explicit VMEM budget (review): derive from hardware, leave compiler headroom.
    try:
        vmem_cap = int(pltpu.get_tpu_info().vmem_capacity_bytes)
    except Exception:
        vmem_cap = 128 * 1024 * 1024
    vmem_limit = int(min(100 * 2 ** 20, vmem_cap * 7 // 8))

    def run(single_buffer_weights):
        def shared_spec(arr):
            nd = arr.ndim
            imap = lambda b, _nd=nd: (0,) * _nd
            if single_buffer_weights:
                # Constant index_map => no re-DMA; Buffered(1) also drops the 2nd buffer.
                return pl.BlockSpec(tuple(arr.shape), imap,
                                    pipeline_mode=pl.Buffered(1))
            return pl.BlockSpec(tuple(arr.shape), imap)

        in_specs = [batched_spec(a) for a in per_batch] + \
                   [shared_spec(a) for a in shared_arrs]
        fn = pl.pallas_call(
            functools.partial(conformer_kernel, num_heads=H),
            grid=(B,),
            in_specs=in_specs,
            out_specs=out_specs,
            out_shape=out_shape,
            scratch_shapes=scratch,
            compiler_params=pltpu.CompilerParams(
                dimension_semantics=("parallel",),
                vmem_limit_bytes=vmem_limit),
        )
        return fn(*per_batch, *shared_arrs)

    try:
        y, kv = run(True)
    except Exception:
        # pl.Buffered(1) not supported by this JAX version -> default double buffering.
        y, kv = run(False)

    # (B, T, 2*H*dk) -> (B, H, T, 2*dk) cache layout (layout plumbing outside the kernel).
    new_att_cache = (kv.reshape(B, T, 2, H, dk)
                       .transpose(0, 3, 1, 2, 4)
                       .reshape(B, H, T, 2 * dk))
    new_cnn_cache = jnp.zeros((0, 0, 0), dtype=x.dtype)  # non-causal conv -> empty cache
    return y, mask, new_att_cache, new_cnn_cache


# ---------------- pure-JAX reference (mirrors the PyTorch forward, f32) ----------------
def reference_forward(x, mask, pos_emb, mask_pad, p):
    def ln(z, g, b):
        mu = z.mean(-1, keepdims=True)
        var = ((z - mu) ** 2).mean(-1, keepdims=True)
        return (z - mu) / jnp.sqrt(var + EPS) * g + b

    swish = lambda z: z * jax.nn.sigmoid(z)
    B, T, D = x.shape
    H, _, dk = p["wq"].shape
    mf = mask.astype(jnp.float32)
    mp = jnp.transpose(mask_pad.astype(jnp.float32), (0, 2, 1))  # (B, T, 1)

    # macaron FFN
    xn = ln(x, p["ln_g"][0], p["ln_b"][0])
    x = x + 0.5 * (swish(xn @ p["w1m"] + p["b1m"]) @ p["w2m"] + p["b2m"])

    # MHA (rel-pos, WeNet style, no rel shift)
    res = x
    xn = ln(x, p["ln_g"][1], p["ln_b"][1])
    q = jnp.einsum("btd,hde->bhte", xn, p["wq"]) + p["bq"][None, :, None, :]
    k = jnp.einsum("btd,hde->bhte", xn, p["wk"]) + p["bk"][None, :, None, :]
    v = jnp.einsum("btd,hde->bhte", xn, p["wv"]) + p["bv"][None, :, None, :]
    pe = jnp.einsum("btd,hde->bhte", pos_emb, p["wp"])
    pe = jnp.broadcast_to(pe, (B, H, T, dk))
    ac = jnp.einsum("bhte,bhse->bhts", q + p["pos_u"][None, :, None, :], k)
    bd = jnp.einsum("bhte,bhse->bhts", q + p["pos_v"][None, :, None, :], pe)
    s = (ac + bd) / jnp.sqrt(dk)
    m4 = mf[:, None, :, :]
    s = jnp.where(m4 > 0, s, -1e30)
    pa = jax.nn.softmax(s, axis=-1)
    pa = jnp.where(m4 > 0, pa, 0.0)
    oh = jnp.einsum("bhts,bhse->bhte", pa, v)
    att = jnp.einsum("bhte,hed->btd", oh, p["wo"]) + p["bo"]
    x = res + att
    att_cache = jnp.concatenate([k, v], axis=-1)

    # conv module
    res = x
    xn = ln(x, p["ln_g"][2], p["ln_b"][2])
    xm = xn * mp
    a = xm @ p["pw1a_w"] + p["pw1a_b"]
    gate = xm @ p["pw1b_w"] + p["pw1b_b"]
    g = a * jax.nn.sigmoid(gate)
    K = p["dw_w"].shape[0]
    pad = (K - 1) // 2
    gp = jnp.pad(g, ((0, 0), (pad, pad), (0, 0)))
    acc = jnp.zeros_like(g) + p["dw_b"]
    for kk in range(K):
        acc = acc + gp[:, kk:kk + T, :] * p["dw_w"][kk]
    hn = ln(acc, p["cn_g"], p["cn_b"])
    conv_out = (swish(hn) @ p["pw2_w"] + p["pw2_b"]) * mp
    x = res + conv_out

    # FFN
    xn = ln(x, p["ln_g"][3], p["ln_b"][3])
    x = x + 0.5 * (swish(xn @ p["w1f"] + p["b1f"]) @ p["w2f"] + p["b2f"])

    x = ln(x, p["ln_g"][4], p["ln_b"][4])
    return x, att_cache


def init_params(key, D, H, dk, Dff, K):
    keys = iter(jax.random.split(key, 48))

    def nrm(shape, scale):
        return (scale * jax.random.normal(next(keys), shape)).astype(jnp.float32)

    p = {}
    p["ln_g"] = 1.0 + nrm((5, D), 0.1)
    p["ln_b"] = nrm((5, D), 0.1)
    p["w1m"] = nrm((D, Dff), 1.0 / np.sqrt(D))
    p["b1m"] = nrm((1, Dff), 0.02)
    p["w2m"] = nrm((Dff, D), 1.0 / np.sqrt(Dff))
    p["b2m"] = nrm((1, D), 0.02)
    for nm in ("wq", "wk", "wv", "wp"):           # per-head splits of (D, D) projections
        p[nm] = nrm((H, D, dk), 1.0 / np.sqrt(D))
    for nm in ("bq", "bk", "bv"):
        p[nm] = nrm((H, dk), 0.02)
    p["pos_u"] = nrm((H, dk), 0.1)
    p["pos_v"] = nrm((H, dk), 0.1)
    p["wo"] = nrm((H, dk, D), 1.0 / np.sqrt(D))   # per-head split of output projection
    p["bo"] = nrm((1, D), 0.02)
    p["pw1a_w"] = nrm((D, D), 1.0 / np.sqrt(D))   # pointwise_conv1, GLU "a" half
    p["pw1a_b"] = nrm((1, D), 0.02)
    p["pw1b_w"] = nrm((D, D), 1.0 / np.sqrt(D))   # pointwise_conv1, GLU gate half
    p["pw1b_b"] = nrm((1, D), 0.02)
    p["dw_w"] = nrm((K, D), 1.0 / np.sqrt(K))     # depthwise conv weight, (tap, channel)
    p["dw_b"] = nrm((1, D), 0.02)
    p["cn_g"] = 1.0 + nrm((1, D), 0.1)
    p["cn_b"] = nrm((1, D), 0.1)
    p["pw2_w"] = nrm((D, D), 1.0 / np.sqrt(D))
    p["pw2_b"] = nrm((1, D), 0.02)
    p["w1f"] = nrm((D, Dff), 1.0 / np.sqrt(D))
    p["b1f"] = nrm((1, Dff), 0.02)
    p["w2f"] = nrm((Dff, D), 1.0 / np.sqrt(Dff))
    p["b2f"] = nrm((1, D), 0.02)
    return p


if __name__ == "__main__":
    B, T, D = 2, 16, 32
    H, dk = 4, 8          # H * dk == D
    Dff = 64
    K = 7                 # depthwise conv kernel size (odd, non-causal)

    key = jax.random.PRNGKey(0)
    kx, kp, kw = jax.random.split(key, 3)
    x = jax.random.normal(kx, (B, T, D), jnp.float32)
    pos_emb = 0.1 * jax.random.normal(kp, (1, T, D), jnp.float32)

    lengths = jnp.array([T, T - 5], dtype=jnp.int32)
    key_mask = jnp.arange(T)[None, :] < lengths[:, None]       # (B, T)
    mask = jnp.broadcast_to(key_mask[:, None, :], (B, T, T))   # (B, T, T) bool
    mask_pad = key_mask[:, None, :]                            # (B, 1, T) bool

    params = init_params(kw, D, H, dk, Dff, K)

    y, mask_out, att_cache, cnn_cache = conformer_layer_forward(
        x, mask, pos_emb, mask_pad, params)
    jax.block_until_ready(y)

    y_ref, cache_ref = reference_forward(x, mask, pos_emb, mask_pad, params)
    assert jnp.allclose(y, y_ref, atol=5e-2, rtol=5e-2), \
        f"max abs diff {float(jnp.max(jnp.abs(y - y_ref)))}"
    assert jnp.allclose(att_cache.astype(jnp.float32), cache_ref, atol=5e-2, rtol=5e-2), \
        f"cache max abs diff {float(jnp.max(jnp.abs(att_cache.astype(jnp.float32) - cache_ref)))}"
    assert y.shape == (B, T, D)
    assert att_cache.shape == (B, H, T, 2 * dk)
    assert cnn_cache.shape == (0, 0, 0)

    print("KERNEL_OK")
</pallas_src>

<mosaic_0001>
module attributes {stable_mosaic.version = 11 : i64} {
  func.func @conformer_kernel(%arg0: i32, %arg1: memref<1x16x32xf32, #tpu.memory_space<vmem>>, %arg2: memref<1x1x16xf32, #tpu.memory_space<vmem>>, %arg3: memref<1x16x1xf32, #tpu.memory_space<vmem>>, %arg4: memref<16x32xbf16, #tpu.memory_space<vmem>>, %arg5: memref<6x32xf32, #tpu.memory_space<vmem>>, %arg6: memref<6x32xf32, #tpu.memory_space<vmem>>, %arg7: memref<32x64xbf16, #tpu.memory_space<vmem>>, %arg8: memref<64x32xbf16, #tpu.memory_space<vmem>>, %arg9: memref<2x64xf32, #tpu.memory_space<vmem>>, %arg10: memref<5x32xf32, #tpu.memory_space<vmem>>, %arg11: memref<32x96xbf16, #tpu.memory_space<vmem>>, %arg12: memref<1x96xf32, #tpu.memory_space<vmem>>, %arg13: memref<2x32xf32, #tpu.memory_space<vmem>>, %arg14: memref<4x8x32xbf16, #tpu.memory_space<vmem>>, %arg15: memref<32x64xbf16, #tpu.memory_space<vmem>>, %arg16: memref<1x64xf32, #tpu.memory_space<vmem>>, %arg17: memref<7x32xf32, #tpu.memory_space<vmem>>, %arg18: memref<32x32xbf16, #tpu.memory_space<vmem>>, %arg19: memref<32x64xbf16, #tpu.memory_space<vmem>>, %arg20: memref<64x32xbf16, #tpu.memory_space<vmem>>, %arg21: memref<1x16x32xf32, #tpu.memory_space<vmem>>, %arg22: memref<1x16x64xbf16, #tpu.memory_space<vmem>>, %arg23: memref<4x16x16xbf16, #tpu.memory_space<vmem>>, %arg24: memref<4x16x16xbf16, #tpu.memory_space<vmem>>, %arg25: memref<4x16x8xbf16, #tpu.memory_space<vmem>>, %arg26: memref<32x32xf32, #tpu.memory_space<vmem>>) attributes {dimension_semantics = [#tpu.dimension_semantics<parallel>], iteration_bounds = array<i64: 2>, scalar_prefetch = 0 : i64, scratch_operands = 4 : i64, tpu.core_type = #tpu.core_type<tc>, window_params = [{transform_indices = @transform_0, window_bounds = array<i64: 1, 16, 32>}, {transform_indices = @transform_1, window_bounds = array<i64: 1, 1, 16>}, {transform_indices = @transform_2, window_bounds = array<i64: 1, 16, 1>}, {pipeline_mode = #tpu.pipeline_mode<synchronous>, transform_indices = @transform_3, window_bounds = array<i64: 16, 32>}, {pipeline_mode = #tpu.pipeline_mode<synchronous>, transform_indices = @transform_4, window_bounds = array<i64: 6, 32>}, {pipeline_mode = #tpu.pipeline_mode<synchronous>, transform_indices = @transform_5, window_bounds = array<i64: 6, 32>}, {pipeline_mode = #tpu.pipeline_mode<synchronous>, transform_indices = @transform_6, window_bounds = array<i64: 32, 64>}, {pipeline_mode = #tpu.pipeline_mode<synchronous>, transform_indices = @transform_7, window_bounds = array<i64: 64, 32>}, {pipeline_mode = #tpu.pipeline_mode<synchronous>, transform_indices = @transform_8, window_bounds = array<i64: 2, 64>}, {pipeline_mode = #tpu.pipeline_mode<synchronous>, transform_indices = @transform_9, window_bounds = array<i64: 5, 32>}, {pipeline_mode = #tpu.pipeline_mode<synchronous>, transform_indices = @transform_10, window_bounds = array<i64: 32, 96>}, {pipeline_mode = #tpu.pipeline_mode<synchronous>, transform_indices = @transform_11, window_bounds = array<i64: 1, 96>}, {pipeline_mode = #tpu.pipeline_mode<synchronous>, transform_indices = @transform_12, window_bounds = array<i64: 2, 32>}, {pipeline_mode = #tpu.pipeline_mode<synchronous>, transform_indices = @transform_13, window_bounds = array<i64: 4, 8, 32>}, {pipeline_mode = #tpu.pipeline_mode<synchronous>, transform_indices = @transform_14, window_bounds = array<i64: 32, 64>}, {pipeline_mode = #tpu.pipeline_mode<synchronous>, transform_indices = @transform_15, window_bounds = array<i64: 1, 64>}, {pipeline_mode = #tpu.pipeline_mode<synchronous>, transform_indices = @transform_16, window_bounds = array<i64: 7, 32>}, {pipeline_mode = #tpu.pipeline_mode<synchronous>, transform_indices = @transform_17, window_bounds = array<i64: 32, 32>}, {pipeline_mode = #tpu.pipeline_mode<synchronous>, transform_indices = @transform_18, window_bounds = array<i64: 32, 64>}, {pipeline_mode = #tpu.pipeline_mode<synchronous>, transform_indices = @transform_19, window_bounds = array<i64: 64, 32>}, {transform_indices = @transform_20, window_bounds = array<i64: 1, 16, 32>}, {transform_indices = @transform_21, window_bounds = array<i64: 1, 16, 64>}]} {
    %c0 = arith.constant 0 : index
    %c0_0 = arith.constant 0 : index
    %c0_1 = arith.constant 0 : index
    %0 = vector.load %arg1[%c0, %c0_0, %c0_1] : memref<1x16x32xf32, #tpu.memory_space<vmem>>, vector<1x16x32xf32>
    %1 = vector.shape_cast %0 : vector<1x16x32xf32> to vector<16x32xf32>
    %c0_2 = arith.constant 0 : index
    %c0_3 = arith.constant 0 : index
    %c0_4 = arith.constant 0 : index
    %2 = vector.load %arg2[%c0_2, %c0_3, %c0_4] : memref<1x1x16xf32, #tpu.memory_space<vmem>>, vector<1x1x16xf32>
    %3 = vector.shape_cast %2 : vector<1x1x16xf32> to vector<1x16xf32>
    %c0_5 = arith.constant 0 : index
    %c0_6 = arith.constant 0 : index
    %c0_7 = arith.constant 0 : index
    %4 = vector.load %arg3[%c0_5, %c0_6, %c0_7] : memref<1x16x1xf32, #tpu.memory_space<vmem>>, vector<1x16x1xf32>
    %5 = vector.shape_cast %4 : vector<1x16x1xf32> to vector<16x1xf32>
    %c0_8 = arith.constant 0 : index
    %c0_9 = arith.constant 0 : index
    %6 = vector.load %arg5[%c0_8, %c0_9] : memref<6x32xf32, #tpu.memory_space<vmem>>, vector<1x32xf32>
    %c0_10 = arith.constant 0 : index
    %c0_11 = arith.constant 0 : index
    %7 = vector.load %arg6[%c0_10, %c0_11] : memref<6x32xf32, #tpu.memory_space<vmem>>, vector<1x32xf32>
    %cst = arith.constant dense<0.000000e+00> : vector<16xf32>
    %8 = vector.multi_reduction <add>, %1, %cst [1] : vector<16x32xf32> to vector<16xf32>
    %9 = vector.shape_cast %8 : vector<16xf32> to vector<16x1xf32>
    %cst_12 = arith.constant 3.200000e+01 : f32
    %10 = vector.broadcast %cst_12 : f32 to vector<16x1xf32>
    %11 = arith.divf %9, %10 : vector<16x1xf32>
    %12 = vector.broadcast %11 : vector<16x1xf32> to vector<16x32xf32>
    %13 = arith.subf %1, %12 : vector<16x32xf32>
    %14 = arith.mulf %13, %13 : vector<16x32xf32>
    %cst_13 = arith.constant dense<0.000000e+00> : vector<16xf32>
    %15 = vector.multi_reduction <add>, %14, %cst_13 [1] : vector<16x32xf32> to vector<16xf32>
    %16 = vector.shape_cast %15 : vector<16xf32> to vector<16x1xf32>
    %cst_14 = arith.constant 3.200000e+01 : f32
    %17 = vector.broadcast %cst_14 : f32 to vector<16x1xf32>
    %18 = arith.divf %16, %17 : vector<16x1xf32>
    %19 = vector.broadcast %11 : vector<16x1xf32> to vector<16x32xf32>
    %20 = arith.subf %1, %19 : vector<16x32xf32>
    %cst_15 = arith.constant 9.99999974E-6 : f32
    %21 = vector.broadcast %cst_15 : f32 to vector<16x1xf32>
    %22 = arith.addf %18, %21 : vector<16x1xf32>
    %23 = math.rsqrt %22 : vector<16x1xf32>
    %24 = vector.broadcast %23 : vector<16x1xf32> to vector<16x32xf32>
    %25 = arith.mulf %20, %24 : vector<16x32xf32>
    %26 = vector.broadcast %6 : vector<1x32xf32> to vector<16x32xf32>
    %27 = arith.mulf %25, %26 : vector<16x32xf32>
    %28 = vector.broadcast %7 : vector<1x32xf32> to vector<16x32xf32>
    %29 = arith.addf %27, %28 : vector<16x32xf32>
    %c0_16 = arith.constant 0 : index
    %c0_17 = arith.constant 0 : index
    %30 = vector.load %arg7[%c0_16, %c0_17] : memref<32x64xbf16, #tpu.memory_space<vmem>>, vector<32x64xbf16>
    %31 = arith.truncf %29 : vector<16x32xf32> to vector<16x32xbf16>
    %cst_18 = arith.constant dense<0.000000e+00> : vector<16x64xf32>
    %32 = tpu.matmul %31, %30, %cst_18 {dimension_numbers = #tpu.dot_dimension_numbers<[1], [0], [0], [1], [0, 0, 1, 1], [], []>} : vector<16x32xbf16>, vector<32x64xbf16>, vector<16x64xf32> -> vector<16x64xf32>
    %c0_19 = arith.constant 0 : index
    %c0_20 = arith.constant 0 : index
    %33 = vector.load %arg9[%c0_19, %c0_20] : memref<2x64xf32, #tpu.memory_space<vmem>>, vector<1x64xf32>
    %34 = vector.broadcast %33 : vector<1x64xf32> to vector<16x64xf32>
    %35 = arith.addf %32, %34 : vector<16x64xf32>
    %36 = arith.negf %35 : vector<16x64xf32>
    %37 = math.exp %36 : vector<16x64xf32>
    %cst_21 = arith.constant 1.000000e+00 : f32
    %38 = vector.broadcast %cst_21 : f32 to vector<16x64xf32>
    %39 = arith.addf %38, %37 : vector<16x64xf32>
    %40 = arith.divf %38, %39 : vector<16x64xf32>
    %41 = arith.mulf %35, %40 : vector<16x64xf32>
    %c0_22 = arith.constant 0 : index
    %c0_23 = arith.constant 0 : index
    %42 = vector.load %arg8[%c0_22, %c0_23] : memref<64x32xbf16, #tpu.memory_space<vmem>>, vector<64x32xbf16>
    %43 = arith.truncf %41 : vector<16x64xf32> to vector<16x64xbf16>
    %cst_24 = arith.constant dense<0.000000e+00> : vector<16x32xf32>
    %44 = tpu.matmul %43, %42, %cst_24 {dimension_numbers = #tpu.dot_dimension_numbers<[1], [0], [0], [1], [0, 0, 1, 1], [], []>} : vector<16x64xbf16>, vector<64x32xbf16>, vector<16x32xf32> -> vector<16x32xf32>
    %c0_25 = arith.constant 0 : index
    %c0_26 = arith.constant 0 : index
    %45 = vector.load %arg10[%c0_25, %c0_26] : memref<5x32xf32, #tpu.memory_space<vmem>>, vector<1x32xf32>
    %46 = vector.broadcast %45 : vector<1x32xf32> to vector<16x32xf32>
    %47 = arith.addf %44, %46 : vector<16x32xf32>
    %cst_27 = arith.constant 5.000000e-01 : f32
    %48 = vector.broadcast %cst_27 : f32 to vector<16x32xf32>
    %49 = arith.mulf %48, %47 : vector<16x32xf32>
    %50 = arith.addf %1, %49 : vector<16x32xf32>
    %c1 = arith.constant 1 : index
    %c0_28 = arith.constant 0 : index
    %51 = vector.load %arg5[%c1, %c0_28] : memref<6x32xf32, #tpu.memory_space<vmem>>, vector<1x32xf32>
    %c1_29 = arith.constant 1 : index
    %c0_30 = arith.constant 0 : index
    %52 = vector.load %arg6[%c1_29, %c0_30] : memref<6x32xf32, #tpu.memory_space<vmem>>, vector<1x32xf32>
    %cst_31 = arith.constant dense<0.000000e+00> : vector<16xf32>
    %53 = vector.multi_reduction <add>, %50, %cst_31 [1] : vector<16x32xf32> to vector<16xf32>
    %54 = vector.shape_cast %53 : vector<16xf32> to vector<16x1xf32>
    %cst_32 = arith.constant 3.200000e+01 : f32
    %55 = vector.broadcast %cst_32 : f32 to vector<16x1xf32>
    %56 = arith.divf %54, %55 : vector<16x1xf32>
    %57 = vector.broadcast %56 : vector<16x1xf32> to vector<16x32xf32>
    %58 = arith.subf %50, %57 : vector<16x32xf32>
    %59 = arith.mulf %58, %58 : vector<16x32xf32>
    %cst_33 = arith.constant dense<0.000000e+00> : vector<16xf32>
    %60 = vector.multi_reduction <add>, %59, %cst_33 [1] : vector<16x32xf32> to vector<16xf32>
    %61 = vector.shape_cast %60 : vector<16xf32> to vector<16x1xf32>
    %cst_34 = arith.constant 3.200000e+01 : f32
    %62 = vector.broadcast %cst_34 : f32 to vector<16x1xf32>
    %63 = arith.divf %61, %62 : vector<16x1xf32>
    %64 = vector.broadcast %56 : vector<16x1xf32> to vector<16x32xf32>
    %65 = arith.subf %50, %64 : vector<16x32xf32>
    %cst_35 = arith.constant 9.99999974E-6 : f32
    %66 = vector.broadcast %cst_35 : f32 to vector<16x1xf32>
    %67 = arith.addf %63, %66 : vector<16x1xf32>
    %68 = math.rsqrt %67 : vector<16x1xf32>
    %69 = vector.broadcast %68 : vector<16x1xf32> to vector<16x32xf32>
    %70 = arith.mulf %65, %69 : vector<16x32xf32>
    %71 = vector.broadcast %51 : vector<1x32xf32> to vector<16x32xf32>
    %72 = arith.mulf %70, %71 : vector<16x32xf32>
    %73 = vector.broadcast %52 : vector<1x32xf32> to vector<16x32xf32>
    %74 = arith.addf %72, %73 : vector<16x32xf32>
    %c0_36 = arith.constant 0 : index
    %c0_37 = arith.constant 0 : index
    %75 = vector.load %arg11[%c0_36, %c0_37] : memref<32x96xbf16, #tpu.memory_space<vmem>>, vector<32x96xbf16>
    %76 = arith.truncf %74 : vector<16x32xf32> to vector<16x32xbf16>
    %cst_38 = arith.constant dense<0.000000e+00> : vector<16x96xf32>
    %77 = tpu.matmul %76, %75, %cst_38 {dimension_numbers = #tpu.dot_dimension_numbers<[1], [0], [0], [1], [0, 0, 1, 1], [], []>} : vector<16x32xbf16>, vector<32x96xbf16>, vector<16x96xf32> -> vector<16x96xf32>
    %c0_39 = arith.constant 0 : index
    %c0_40 = arith.constant 0 : index
    %78 = vector.load %arg12[%c0_39, %c0_40] : memref<1x96xf32, #tpu.memory_space<vmem>>, vector<1x96xf32>
    %79 = vector.broadcast %78 : vector<1x96xf32> to vector<16x96xf32>
    %80 = arith.addf %77, %79 : vector<16x96xf32>
    %81 = vector.extract_strided_slice %80 {offsets = [0, 0], sizes = [16, 32], strides = [1, 1]} : vector<16x96xf32> to vector<16x32xf32>
    %82 = vector.extract_strided_slice %80 {offsets = [0, 32], sizes = [16, 32], strides = [1, 1]} : vector<16x96xf32> to vector<16x32xf32>
    %83 = vector.extract_strided_slice %80 {offsets = [0, 64], sizes = [16, 32], strides = [1, 1]} : vector<16x96xf32> to vector<16x32xf32>
    %84 = arith.truncf %82 : vector<16x32xf32> to vector<16x32xbf16>
    %c0_41 = arith.constant 0 : index
    %c0_42 = arith.constant 0 : index
    %c0_43 = arith.constant 0 : index
    %85 = vector.load %arg22[%c0_41, %c0_42, %c0_43] : memref<1x16x64xbf16, #tpu.memory_space<vmem>>, vector<1x16x32xbf16>
    %86 = vector.shape_cast %85 : vector<1x16x32xbf16> to vector<16x32xbf16>
    %87 = vector.shape_cast %84 : vector<16x32xbf16> to vector<1x16x32xbf16>
    tpu.vector_store %arg22[%c0_41, %c0_42, %c0_43], %87 {strides = array<i32>} : memref<1x16x64xbf16, #tpu.memory_space<vmem>>, vector<1x16x32xbf16>,
    %88 = arith.truncf %83 : vector<16x32xf32> to vector<16x32xbf16>
    %c0_44 = arith.constant 0 : index
    %c0_45 = arith.constant 0 : index
    %c32 = arith.constant 32 : index
    %89 = vector.load %arg22[%c0_44, %c0_45, %c32] : memref<1x16x64xbf16, #tpu.memory_space<vmem>>, vector<1x16x32xbf16>
    %90 = vector.shape_cast %89 : vector<1x16x32xbf16> to vector<16x32xbf16>
    %91 = vector.shape_cast %88 : vector<16x32xbf16> to vector<1x16x32xbf16>
    tpu.vector_store %arg22[%c0_44, %c0_45, %c32], %91 {strides = array<i32>} : memref<1x16x64xbf16, #tpu.memory_space<vmem>>, vector<1x16x32xbf16>,
    %c0_46 = arith.constant 0 : index
    %c0_47 = arith.constant 0 : index
    %92 = vector.load %arg13[%c0_46, %c0_47] : memref<2x32xf32, #tpu.memory_space<vmem>>, vector<1x32xf32>
    %93 = vector.broadcast %92 : vector<1x32xf32> to vector<16x32xf32>
    %94 = arith.addf %81, %93 : vector<16x32xf32>
    %c1_48 = arith.constant 1 : index
    %c0_49 = arith.constant 0 : index
    %95 = vector.load %arg13[%c1_48, %c0_49] : memref<2x32xf32, #tpu.memory_space<vmem>>, vector<1x32xf32>
    %96 = vector.broadcast %95 : vector<1x32xf32> to vector<16x32xf32>
    %97 = arith.addf %81, %96 : vector<16x32xf32>
    %c0_50 = arith.constant 0 : index
    %c0_51 = arith.constant 0 : index
    %98 = vector.load %arg4[%c0_50, %c0_51] : memref<16x32xbf16, #tpu.memory_space<vmem>>, vector<16x32xbf16>
    %99 = vector.extract_strided_slice %94 {offsets = [0, 0], sizes = [16, 8], strides = [1, 1]} : vector<16x32xf32> to vector<16x8xf32>
    %100 = arith.truncf %99 : vector<16x8xf32> to vector<16x8xbf16>
    %c0_52 = arith.constant 0 : index
    %c0_53 = arith.constant 0 : index
    %c0_54 = arith.constant 0 : index
    %101 = vector.load %arg23[%c0_52, %c0_53, %c0_54] : memref<4x16x16xbf16, #tpu.memory_space<vmem>>, vector<1x16x8xbf16>
    %102 = vector.shape_cast %101 : vector<1x16x8xbf16> to vector<16x8xbf16>
    %103 = vector.shape_cast %100 : vector<16x8xbf16> to vector<1x16x8xbf16>
    tpu.vector_store %arg23[%c0_52, %c0_53, %c0_54], %103 {strides = array<i32>} : memref<4x16x16xbf16, #tpu.memory_space<vmem>>, vector<1x16x8xbf16>,
    %104 = vector.extract_strided_slice %97 {offsets = [0, 0], sizes = [16, 8], strides = [1, 1]} : vector<16x32xf32> to vector<16x8xf32>
    %105 = arith.truncf %104 : vector<16x8xf32> to vector<16x8xbf16>
    %c0_55 = arith.constant 0 : index
    %c0_56 = arith.constant 0 : index
    %c8 = arith.constant 8 : index
    %106 = vector.load %arg23[%c0_55, %c0_56, %c8] : memref<4x16x16xbf16, #tpu.memory_space<vmem>>, vector<1x16x8xbf16>
    %107 = vector.shape_cast %106 : vector<1x16x8xbf16> to vector<16x8xbf16>
    %108 = vector.shape_cast %105 : vector<16x8xbf16> to vector<1x16x8xbf16>
    tpu.vector_store %arg23[%c0_55, %c0_56, %c8], %108 {strides = array<i32>} : memref<4x16x16xbf16, #tpu.memory_space<vmem>>, vector<1x16x8xbf16>,
    %109 = vector.extract_strided_slice %82 {offsets = [0, 0], sizes = [16, 8], strides = [1, 1]} : vector<16x32xf32> to vector<16x8xf32>
    %110 = arith.truncf %109 : vector<16x8xf32> to vector<16x8xbf16>
    %c0_57 = arith.constant 0 : index
    %c0_58 = arith.constant 0 : index
    %c0_59 = arith.constant 0 : index
    %111 = vector.load %arg24[%c0_57, %c0_58, %c0_59] : memref<4x16x16xbf16, #tpu.memory_space<vmem>>, vector<1x16x8xbf16>
    %112 = vector.shape_cast %111 : vector<1x16x8xbf16> to vector<16x8xbf16>
    %113 = vector.shape_cast %110 : vector<16x8xbf16> to vector<1x16x8xbf16>
    tpu.vector_store %arg24[%c0_57, %c0_58, %c0_59], %113 {strides = array<i32>} : memref<4x16x16xbf16, #tpu.memory_space<vmem>>, vector<1x16x8xbf16>,
    %114 = vector.extract_strided_slice %98 {offsets = [0, 0], sizes = [16, 8], strides = [1, 1]} : vector<16x32xbf16> to vector<16x8xbf16>
    %c0_60 = arith.constant 0 : index
    %c0_61 = arith.constant 0 : index
    %c8_62 = arith.constant 8 : index
    %115 = vector.load %arg24[%c0_60, %c0_61, %c8_62] : memref<4x16x16xbf16, #tpu.memory_space<vmem>>, vector<1x16x8xbf16>
    %116 = vector.shape_cast %115 : vector<1x16x8xbf16> to vector<16x8xbf16>
    %117 = vector.shape_cast %114 : vector<16x8xbf16> to vector<1x16x8xbf16>
    tpu.vector_store %arg24[%c0_60, %c0_61, %c8_62], %117 {strides = array<i32>} : memref<4x16x16xbf16, #tpu.memory_space<vmem>>, vector<1x16x8xbf16>,
    %118 = vector.extract_strided_slice %83 {offsets = [0, 0], sizes = [16, 8], strides = [1, 1]} : vector<16x32xf32> to vector<16x8xf32>
    %119 = arith.truncf %118 : vector<16x8xf32> to vector<16x8xbf16>
    %c0_63 = arith.constant 0 : index
    %c0_64 = arith.constant 0 : index
    %c0_65 = arith.constant 0 : index
    %120 = vector.load %arg25[%c0_63, %c0_64, %c0_65] : memref<4x16x8xbf16, #tpu.memory_space<vmem>>, vector<1x16x8xbf16>
    %121 = vector.shape_cast %120 : vector<1x16x8xbf16> to vector<16x8xbf16>
    %122 = vector.shape_cast %119 : vector<16x8xbf16> to vector<1x16x8xbf16>
    tpu.vector_store %arg25[%c0_63, %c0_64, %c0_65], %122 {strides = array<i32>} : memref<4x16x8xbf16, #tpu.memory_space<vmem>>, vector<1x16x8xbf16>,
    %123 = vector.extract_strided_slice %94 {offsets = [0, 8], sizes = [16, 8], strides = [1, 1]} : vector<16x32xf32> to vector<16x8xf32>
    %124 = arith.truncf %123 : vector<16x8xf32> to vector<16x8xbf16>
    %c1_66 = arith.constant 1 : index
    %c0_67 = arith.constant 0 : index
    %c0_68 = arith.constant 0 : index
    %125 = vector.load %arg23[%c1_66, %c0_67, %c0_68] : memref<4x16x16xbf16, #tpu.memory_space<vmem>>, vector<1x16x8xbf16>
    %126 = vector.shape_cast %125 : vector<1x16x8xbf16> to vector<16x8xbf16>
    %127 = vector.shape_cast %124 : vector<16x8xbf16> to vector<1x16x8xbf16>
    tpu.vector_store %arg23[%c1_66, %c0_67, %c0_68], %127 {strides = array<i32>} : memref<4x16x16xbf16, #tpu.memory_space<vmem>>, vector<1x16x8xbf16>,
    %128 = vector.extract_strided_slice %97 {offsets = [0, 8], sizes = [16, 8], strides = [1, 1]} : vector<16x32xf32> to vector<16x8xf32>
    %129 = arith.truncf %128 : vector<16x8xf32> to vector<16x8xbf16>
    %c1_69 = arith.constant 1 : index
    %c0_70 = arith.constant 0 : index
    %c8_71 = arith.constant 8 : index
    %130 = vector.load %arg23[%c1_69, %c0_70, %c8_71] : memref<4x16x16xbf16, #tpu.memory_space<vmem>>, vector<1x16x8xbf16>
    %131 = vector.shape_cast %130 : vector<1x16x8xbf16> to vector<16x8xbf16>
    %132 = vector.shape_cast %129 : vector<16x8xbf16> to vector<1x16x8xbf16>
    tpu.vector_store %arg23[%c1_69, %c0_70, %c8_71], %132 {strides = array<i32>} : memref<4x16x16xbf16, #tpu.memory_space<vmem>>, vector<1x16x8xbf16>,
    %133 = vector.extract_strided_slice %82 {offsets = [0, 8], sizes = [16, 8], strides = [1, 1]} : vector<16x32xf32> to vector<16x8xf32>
    %134 = arith.truncf %133 : vector<16x8xf32> to vector<16x8xbf16>
    %c1_72 = arith.constant 1 : index
    %c0_73 = arith.constant 0 : index
    %c0_74 = arith.constant 0 : index
    %135 = vector.load %arg24[%c1_72, %c0_73, %c0_74] : memref<4x16x16xbf16, #tpu.memory_space<vmem>>, vector<1x16x8xbf16>
    %136 = vector.shape_cast %135 : vector<1x16x8xbf16> to vector<16x8xbf16>
    %137 = vector.shape_cast %134 : vector<16x8xbf16> to vector<1x16x8xbf16>
    tpu.vector_store %arg24[%c1_72, %c0_73, %c0_74], %137 {strides = array<i32>} : memref<4x16x16xbf16, #tpu.memory_space<vmem>>, vector<1x16x8xbf16>,
    %138 = vector.extract_strided_slice %98 {offsets = [0, 8], sizes = [16, 8], strides = [1, 1]} : vector<16x32xbf16> to vector<16x8xbf16>
    %c1_75 = arith.constant 1 : index
    %c0_76 = arith.constant 0 : index
    %c8_77 = arith.constant 8 : index
    %139 = vector.load %arg24[%c1_75, %c0_76, %c8_77] : memref<4x16x16xbf16, #tpu.memory_space<vmem>>, vector<1x16x8xbf16>
    %140 = vector.shape_cast %139 : vector<1x16x8xbf16> to vector<16x8xbf16>
    %141 = vector.shape_cast %138 : vector<16x8xbf16> to vector<1x16x8xbf16>
    tpu.vector_store %arg24[%c1_75, %c0_76, %c8_77], %141 {strides = array<i32>} : memref<4x16x16xbf16, #tpu.memory_space<vmem>>, vector<1x16x8xbf16>,
    %142 = vector.extract_strided_slice %83 {offsets = [0, 8], sizes = [16, 8], strides = [1, 1]} : vector<16x32xf32> to vector<16x8xf32>
    %143 = arith.truncf %142 : vector<16x8xf32> to vector<16x8xbf16>
    %c1_78 = arith.constant 1 : index
    %c0_79 = arith.constant 0 : index
    %c0_80 = arith.constant 0 : index
    %144 = vector.load %arg25[%c1_78, %c0_79, %c0_80] : memref<4x16x8xbf16, #tpu.memory_space<vmem>>, vector<1x16x8xbf16>
    %145 = vector.shape_cast %144 : vector<1x16x8xbf16> to vector<16x8xbf16>
    %146 = vector.shape_cast %143 : vector<16x8xbf16> to vector<1x16x8xbf16>
    tpu.vector_store %arg25[%c1_78, %c0_79, %c0_80], %146 {strides = array<i32>} : memref<4x16x8xbf16, #tpu.memory_space<vmem>>, vector<1x16x8xbf16>,
    %147 = vector.extract_strided_slice %94 {offsets = [0, 16], sizes = [16, 8], strides = [1, 1]} : vector<16x32xf32> to vector<16x8xf32>
    %148 = arith.truncf %147 : vector<16x8xf32> to vector<16x8xbf16>
    %c2 = arith.constant 2 : index
    %c0_81 = arith.constant 0 : index
    %c0_82 = arith.constant 0 : index
    %149 = vector.load %arg23[%c2, %c0_81, %c0_82] : memref<4x16x16xbf16, #tpu.memory_space<vmem>>, vector<1x16x8xbf16>
    %150 = vector.shape_cast %149 : vector<1x16x8xbf16> to vector<16x8xbf16>
    %151 = vector.shape_cast %148 : vector<16x8xbf16> to vector<1x16x8xbf16>
    tpu.vector_store %arg23[%c2, %c0_81, %c0_82], %151 {strides = array<i32>} : memref<4x16x16xbf16, #tpu.memory_space<vmem>>, vector<1x16x8xbf16>,
    %152 = vector.extract_strided_slice %97 {offsets = [0, 16], sizes = [16, 8], strides = [1, 1]} : vector<16x32xf32> to vector<16x8xf32>
    %153 = arith.truncf %152 : vector<16x8xf32> to vector<16x8xbf16>
    %c2_83 = arith.constant 2 : index
    %c0_84 = arith.constant 0 : index
    %c8_85 = arith.constant 8 : index
    %154 = vector.load %arg23[%c2_83, %c0_84, %c8_85] : memref<4x16x16xbf16, #tpu.memory_space<vmem>>, vector<1x16x8xbf16>
    %155 = vector.shape_cast %154 : vector<1x16x8xbf16> to vector<16x8xbf16>
    %156 = vector.shape_cast %153 : vector<16x8xbf16> to vector<1x16x8xbf16>
    tpu.vector_store %arg23[%c2_83, %c0_84, %c8_85], %156 {strides = array<i32>} : memref<4x16x16xbf16, #tpu.memory_space<vmem>>, vector<1x16x8xbf16>,
    %157 = vector.extract_strided_slice %82 {offsets = [0, 16], sizes = [16, 8], strides = [1, 1]} : vector<16x32xf32> to vector<16x8xf32>
    %158 = arith.truncf %157 : vector<16x8xf32> to vector<16x8xbf16>
    %c2_86 = arith.constant 2 : index
    %c0_87 = arith.constant 0 : index
    %c0_88 = arith.constant 0 : index
    %159 = vector.load %arg24[%c2_86, %c0_87, %c0_88] : memref<4x16x16xbf16, #tpu.memory_space<vmem>>, vector<1x16x8xbf16>
    %160 = vector.shape_cast %159 : vector<1x16x8xbf16> to vector<16x8xbf16>
    %161 = vector.shape_cast %158 : vector<16x8xbf16> to vector<1x16x8xbf16>
    tpu.vector_store %arg24[%c2_86, %c0_87, %c0_88], %161 {strides = array<i32>} : memref<4x16x16xbf16, #tpu.memory_space<vmem>>, vector<1x16x8xbf16>,
    %162 = vector.extract_strided_slice %98 {offsets = [0, 16], sizes = [16, 8], strides = [1, 1]} : vector<16x32xbf16> to vector<16x8xbf16>
    %c2_89 = arith.constant 2 : index
    %c0_90 = arith.constant 0 : index
    %c8_91 = arith.constant 8 : index
    %163 = vector.load %arg24[%c2_89, %c0_90, %c8_91] : memref<4x16x16xbf16, #tpu.memory_space<vmem>>, vector<1x16x8xbf16>
    %164 = vector.shape_cast %163 : vector<1x16x8xbf16> to vector<16x8xbf16>
    %165 = vector.shape_cast %162 : vector<16x8xbf16> to vector<1x16x8xbf16>
    tpu.vector_store %arg24[%c2_89, %c0_90, %c8_91], %165 {strides = array<i32>} : memref<4x16x16xbf16, #tpu.memory_space<vmem>>, vector<1x16x8xbf16>,
    %166 = vector.extract_strided_slice %83 {offsets = [0, 16], sizes = [16, 8], strides = [1, 1]} : vector<16x32xf32> to vector<16x8xf32>
    %167 = arith.truncf %166 : vector<16x8xf32> to vector<16x8xbf16>
    %c2_92 = arith.constant 2 : index
    %c0_93 = arith.constant 0 : index
    %c0_94 = arith.constant 0 : index
    %168 = vector.load %arg25[%c2_92, %c0_93, %c0_94] : memref<4x16x8xbf16, #tpu.memory_space<vmem>>, vector<1x16x8xbf16>
    %169 = vector.shape_cast %168 : vector<1x16x8xbf16> to vector<16x8xbf16>
    %170 = vector.shape_cast %167 : vector<16x8xbf16> to vector<1x16x8xbf16>
    tpu.vector_store %arg25[%c2_92, %c0_93, %c0_94], %170 {strides = array<i32>} : memref<4x16x8xbf16, #tpu.memory_space<vmem>>, vector<1x16x8xbf16>,
    %171 = vector.extract_strided_slice %94 {offsets = [0, 24], sizes = [16, 8], strides = [1, 1]} : vector<16x32xf32> to vector<16x8xf32>
    %172 = arith.truncf %171 : vector<16x8xf32> to vector<16x8xbf16>
    %c3 = arith.constant 3 : index
    %c0_95 = arith.constant 0 : index
    %c0_96 = arith.constant 0 : index
    %173 = vector.load %arg23[%c3, %c0_95, %c0_96] : memref<4x16x16xbf16, #tpu.memory_space<vmem>>, vector<1x16x8xbf16>
    %174 = vector.shape_cast %173 : vector<1x16x8xbf16> to vector<16x8xbf16>
    %175 = vector.shape_cast %172 : vector<16x8xbf16> to vector<1x16x8xbf16>
    tpu.vector_store %arg23[%c3, %c0_95, %c0_96], %175 {strides = array<i32>} : memref<4x16x16xbf16, #tpu.memory_space<vmem>>, vector<1x16x8xbf16>,
    %176 = vector.extract_strided_slice %97 {offsets = [0, 24], sizes = [16, 8], strides = [1, 1]} : vector<16x32xf32> to vector<16x8xf32>
    %177 = arith.truncf %176 : vector<16x8xf32> to vector<16x8xbf16>
    %c3_97 = arith.constant 3 : index
    %c0_98 = arith.constant 0 : index
    %c8_99 = arith.constant 8 : index
    %178 = vector.load %arg23[%c3_97, %c0_98, %c8_99] : memref<4x16x16xbf16, #tpu.memory_space<vmem>>, vector<1x16x8xbf16>
    %179 = vector.shape_cast %178 : vector<1x16x8xbf16> to vector<16x8xbf16>
    %180 = vector.shape_cast %177 : vector<16x8xbf16> to vector<1x16x8xbf16>
    tpu.vector_store %arg23[%c3_97, %c0_98, %c8_99], %180 {strides = array<i32>} : memref<4x16x16xbf16, #tpu.memory_space<vmem>>, vector<1x16x8xbf16>,
    %181 = vector.extract_strided_slice %82 {offsets = [0, 24], sizes = [16, 8], strides = [1, 1]} : vector<16x32xf32> to vector<16x8xf32>
    %182 = arith.truncf %181 : vector<16x8xf32> to vector<16x8xbf16>
    %c3_100 = arith.constant 3 : index
    %c0_101 = arith.constant 0 : index
    %c0_102 = arith.constant 0 : index
    %183 = vector.load %arg24[%c3_100, %c0_101, %c0_102] : memref<4x16x16xbf16, #tpu.memory_space<vmem>>, vector<1x16x8xbf16>
    %184 = vector.shape_cast %183 : vector<1x16x8xbf16> to vector<16x8xbf16>
    %185 = vector.shape_cast %182 : vector<16x8xbf16> to vector<1x16x8xbf16>
    tpu.vector_store %arg24[%c3_100, %c0_101, %c0_102], %185 {strides = array<i32>} : memref<4x16x16xbf16, #tpu.memory_space<vmem>>, vector<1x16x8xbf16>,
    %186 = vector.extract_strided_slice %98 {offsets = [0, 24], sizes = [16, 8], strides = [1, 1]} : vector<16x32xbf16> to vector<16x8xbf16>
    %c3_103 = arith.constant 3 : index
    %c0_104 = arith.constant 0 : index
    %c8_105 = arith.constant 8 : index
    %187 = vector.load %arg24[%c3_103, %c0_104, %c8_105] : memref<4x16x16xbf16, #tpu.memory_space<vmem>>, vector<1x16x8xbf16>
    %188 = vector.shape_cast %187 : vector<1x16x8xbf16> to vector<16x8xbf16>
    %189 = vector.shape_cast %186 : vector<16x8xbf16> to vector<1x16x8xbf16>
    tpu.vector_store %arg24[%c3_103, %c0_104, %c8_105], %189 {strides = array<i32>} : memref<4x16x16xbf16, #tpu.memory_space<vmem>>, vector<1x16x8xbf16>,
    %190 = vector.extract_strided_slice %83 {offsets = [0, 24], sizes = [16, 8], strides = [1, 1]} : vector<16x32xf32> to vector<16x8xf32>
    %191 = arith.truncf %190 : vector<16x8xf32> to vector<16x8xbf16>
    %c3_106 = arith.constant 3 : index
    %c0_107 = arith.constant 0 : index
    %c0_108 = arith.constant 0 : index
    %192 = vector.load %arg25[%c3_106, %c0_107, %c0_108] : memref<4x16x8xbf16, #tpu.memory_space<vmem>>, vector<1x16x8xbf16>
    %193 = vector.shape_cast %192 : vector<1x16x8xbf16> to vector<16x8xbf16>
    %194 = vector.shape_cast %191 : vector<16x8xbf16> to vector<1x16x8xbf16>
    tpu.vector_store %arg25[%c3_106, %c0_107, %c0_108], %194 {strides = array<i32>} : memref<4x16x8xbf16, #tpu.memory_space<vmem>>, vector<1x16x8xbf16>,
    %cst_109 = arith.constant 0.000000e+00 : f32
    %195 = vector.broadcast %cst_109 : f32 to vector<16x32xf32>
    %c0_i32 = arith.constant 0 : i32
    %c4_i32 = arith.constant 4 : i32
    %196 = arith.addi %c0_i32, %c4_i32 : i32
    %c1_i32 = arith.constant 1 : i32
    %197 = scf.for %arg27 = %c0_i32 to %196 step %c1_i32 iter_args(%arg28 = %195) -> (vector<16x32xf32>)  : i32 {
      %397 = arith.index_cast %arg27 : i32 to index
      %c0_207 = arith.constant 0 : index
      %c0_208 = arith.constant 0 : index
      %398 = vector.load %arg23[%397, %c0_207, %c0_208] : memref<4x16x16xbf16, #tpu.memory_space<vmem>>, vector<1x16x16xbf16>
      %399 = vector.shape_cast %398 : vector<1x16x16xbf16> to vector<16x16xbf16>
      %400 = arith.index_cast %arg27 : i32 to index
      %c0_209 = arith.constant 0 : index
      %c0_210 = arith.constant 0 : index
      %401 = vector.load %arg24[%400, %c0_209, %c0_210] : memref<4x16x16xbf16, #tpu.memory_space<vmem>>, vector<1x16x16xbf16>
      %402 = vector.shape_cast %401 : vector<1x16x16xbf16> to vector<16x16xbf16>
      %cst_211 = arith.constant dense<0.000000e+00> : vector<16x16xf32>
      %403 = tpu.matmul %399, %402, %cst_211 {dimension_numbers = #tpu.dot_dimension_numbers<[1], [1], [0], [0], [0, 0, 1, 0], [], []>} : vector<16x16xbf16>, vector<16x16xbf16>, vector<16x16xf32> -> vector<16x16xf32>
      %404 = vector.broadcast %3 : vector<1x16xf32> to vector<16x16xf32>
      %405 = arith.addf %403, %404 : vector<16x16xf32>
      %cst_212 = arith.constant dense<0xFF800000> : vector<16xf32>
      %406 = vector.multi_reduction <maximumf>, %405, %cst_212 [1] : vector<16x16xf32> to vector<16xf32>
      %407 = vector.shape_cast %406 : vector<16xf32> to vector<16x1xf32>
      %408 = vector.broadcast %407 : vector<16x1xf32> to vector<16x16xf32>
      %409 = arith.subf %405, %408 : vector<16x16xf32>
      %410 = math.exp %409 : vector<16x16xf32>
      %cst_213 = arith.constant dense<0.000000e+00> : vector<16xf32>
      %411 = vector.multi_reduction <add>, %410, %cst_213 [1] : vector<16x16xf32> to vector<16xf32>
      %412 = vector.shape_cast %411 : vector<16xf32> to vector<16x1xf32>
      %413 = tpu.reciprocal %412 {approx = true} : vector<16x1xf32> -> vector<16x1xf32>
      %414 = vector.broadcast %413 : vector<16x1xf32> to vector<16x16xf32>
      %415 = arith.mulf %410, %414 : vector<16x16xf32>
      %416 = arith.index_cast %arg27 : i32 to index
      %c0_214 = arith.constant 0 : index
      %c0_215 = arith.constant 0 : index
      %417 = vector.load %arg25[%416, %c0_214, %c0_215] : memref<4x16x8xbf16, #tpu.memory_space<vmem>>, vector<1x16x8xbf16>
      %418 = vector.shape_cast %417 : vector<1x16x8xbf16> to vector<16x8xbf16>
      %419 = arith.truncf %415 : vector<16x16xf32> to vector<16x16xbf16>
      %cst_216 = arith.constant dense<0.000000e+00> : vector<16x8xf32>
      %420 = tpu.matmul %419, %418, %cst_216 {dimension_numbers = #tpu.dot_dimension_numbers<[1], [0], [0], [1], [0, 0, 1, 1], [], []>} : vector<16x16xbf16>, vector<16x8xbf16>, vector<16x8xf32> -> vector<16x8xf32>
      %421 = arith.index_cast %arg27 : i32 to index
      %c0_217 = arith.constant 0 : index
      %c0_218 = arith.constant 0 : index
      %422 = vector.load %arg14[%421, %c0_217, %c0_218] : memref<4x8x32xbf16, #tpu.memory_space<vmem>>, vector<1x8x32xbf16>
      %423 = vector.shape_cast %422 : vector<1x8x32xbf16> to vector<8x32xbf16>
      %424 = arith.truncf %420 : vector<16x8xf32> to vector<16x8xbf16>
      %cst_219 = arith.constant dense<0.000000e+00> : vector<16x32xf32>
      %425 = tpu.matmul %424, %423, %cst_219 {dimension_numbers = #tpu.dot_dimension_numbers<[1], [0], [0], [1], [0, 0, 1, 1], [], []>} : vector<16x8xbf16>, vector<8x32xbf16>, vector<16x32xf32> -> vector<16x32xf32>
      %426 = arith.addf %arg28, %425 : vector<16x32xf32>
      scf.yield %426 : vector<16x32xf32>
    }
    %c4_i32_110 = arith.constant 4 : i32
    %198 = arith.addf %50, %197 : vector<16x32xf32>
    %c1_111 = arith.constant 1 : index
    %c0_112 = arith.constant 0 : index
    %199 = vector.load %arg10[%c1_111, %c0_112] : memref<5x32xf32, #tpu.memory_space<vmem>>, vector<1x32xf32>
    %200 = vector.broadcast %199 : vector<1x32xf32> to vector<16x32xf32>
    %201 = arith.addf %198, %200 : vector<16x32xf32>
    %c2_113 = arith.constant 2 : index
    %c0_114 = arith.constant 0 : index
    %202 = vector.load %arg5[%c2_113, %c0_114] : memref<6x32xf32, #tpu.memory_space<vmem>>, vector<1x32xf32>
    %c2_115 = arith.constant 2 : index
    %c0_116 = arith.constant 0 : index
    %203 = vector.load %arg6[%c2_115, %c0_116] : memref<6x32xf32, #tpu.memory_space<vmem>>, vector<1x32xf32>
    %cst_117 = arith.constant dense<0.000000e+00> : vector<16xf32>
    %204 = vector.multi_reduction <add>, %201, %cst_117 [1] : vector<16x32xf32> to vector<16xf32>
    %205 = vector.shape_cast %204 : vector<16xf32> to vector<16x1xf32>
    %cst_118 = arith.constant 3.200000e+01 : f32
    %206 = vector.broadcast %cst_118 : f32 to vector<16x1xf32>
    %207 = arith.divf %205, %206 : vector<16x1xf32>
    %208 = vector.broadcast %207 : vector<16x1xf32> to vector<16x32xf32>
    %209 = arith.subf %201, %208 : vector<16x32xf32>
    %210 = arith.mulf %209, %209 : vector<16x32xf32>
    %cst_119 = arith.constant dense<0.000000e+00> : vector<16xf32>
    %211 = vector.multi_reduction <add>, %210, %cst_119 [1] : vector<16x32xf32> to vector<16xf32>
    %212 = vector.shape_cast %211 : vector<16xf32> to vector<16x1xf32>
    %cst_120 = arith.constant 3.200000e+01 : f32
    %213 = vector.broadcast %cst_120 : f32 to vector<16x1xf32>
    %214 = arith.divf %212, %213 : vector<16x1xf32>
    %215 = vector.broadcast %207 : vector<16x1xf32> to vector<16x32xf32>
    %216 = arith.subf %201, %215 : vector<16x32xf32>
    %cst_121 = arith.constant 9.99999974E-6 : f32
    %217 = vector.broadcast %cst_121 : f32 to vector<16x1xf32>
    %218 = arith.addf %214, %217 : vector<16x1xf32>
    %219 = math.rsqrt %218 : vector<16x1xf32>
    %220 = vector.broadcast %219 : vector<16x1xf32> to vector<16x32xf32>
    %221 = arith.mulf %216, %220 : vector<16x32xf32>
    %222 = vector.broadcast %202 : vector<1x32xf32> to vector<16x32xf32>
    %223 = arith.mulf %221, %222 : vector<16x32xf32>
    %224 = vector.broadcast %203 : vector<1x32xf32> to vector<16x32xf32>
    %225 = arith.addf %223, %224 : vector<16x32xf32>
    %226 = vector.broadcast %5 : vector<16x1xf32> to vector<16x32xf32>
    %227 = arith.mulf %225, %226 : vector<16x32xf32>
    %c0_122 = arith.constant 0 : index
    %c0_123 = arith.constant 0 : index
    %228 = vector.load %arg15[%c0_122, %c0_123] : memref<32x64xbf16, #tpu.memory_space<vmem>>, vector<32x64xbf16>
    %229 = arith.truncf %227 : vector<16x32xf32> to vector<16x32xbf16>
    %cst_124 = arith.constant dense<0.000000e+00> : vector<16x64xf32>
    %230 = tpu.matmul %229, %228, %cst_124 {dimension_numbers = #tpu.dot_dimension_numbers<[1], [0], [0], [1], [0, 0, 1, 1], [], []>} : vector<16x32xbf16>, vector<32x64xbf16>, vector<16x64xf32> -> vector<16x64xf32>
    %c0_125 = arith.constant 0 : index
    %c0_126 = arith.constant 0 : index
    %231 = vector.load %arg16[%c0_125, %c0_126] : memref<1x64xf32, #tpu.memory_space<vmem>>, vector<1x64xf32>
    %232 = vector.broadcast %231 : vector<1x64xf32> to vector<16x64xf32>
    %233 = arith.addf %230, %232 : vector<16x64xf32>
    %234 = vector.extract_strided_slice %233 {offsets = [0, 0], sizes = [16, 32], strides = [1, 1]} : vector<16x64xf32> to vector<16x32xf32>
    %235 = vector.extract_strided_slice %233 {offsets = [0, 32], sizes = [16, 32], strides = [1, 1]} : vector<16x64xf32> to vector<16x32xf32>
    %236 = arith.negf %235 : vector<16x32xf32>
    %237 = math.exp %236 : vector<16x32xf32>
    %cst_127 = arith.constant 1.000000e+00 : f32
    %238 = vector.broadcast %cst_127 : f32 to vector<16x32xf32>
    %239 = arith.addf %238, %237 : vector<16x32xf32>
    %240 = arith.divf %238, %239 : vector<16x32xf32>
    %241 = arith.mulf %234, %240 : vector<16x32xf32>
    %cst_128 = arith.constant 0.000000e+00 : f32
    %242 = vector.broadcast %cst_128 : f32 to vector<8x32xf32>
    %c0_129 = arith.constant 0 : index
    %c0_130 = arith.constant 0 : index
    %243 = vector.load %arg26[%c0_129, %c0_130] : memref<32x32xf32, #tpu.memory_space<vmem>>, vector<8x32xf32>
    tpu.vector_store %arg26[%c0_129, %c0_130], %242 {strides = array<i32>} : memref<32x32xf32, #tpu.memory_space<vmem>>, vector<8x32xf32>,
    %cst_131 = arith.constant 0.000000e+00 : f32
    %244 = vector.broadcast %cst_131 : f32 to vector<8x32xf32>
    %c24 = arith.constant 24 : index
    %c0_132 = arith.constant 0 : index
    %245 = vector.load %arg26[%c24, %c0_132] : memref<32x32xf32, #tpu.memory_space<vmem>>, vector<8x32xf32>
    tpu.vector_store %arg26[%c24, %c0_132], %244 {strides = array<i32>} : memref<32x32xf32, #tpu.memory_space<vmem>>, vector<8x32xf32>,
    %c8_133 = arith.constant 8 : index
    %c0_134 = arith.constant 0 : index
    %246 = vector.load %arg26[%c8_133, %c0_134] : memref<32x32xf32, #tpu.memory_space<vmem>>, vector<16x32xf32>
    tpu.vector_store %arg26[%c8_133, %c0_134], %241 {strides = array<i32>} : memref<32x32xf32, #tpu.memory_space<vmem>>, vector<16x32xf32>,
    %cst_135 = arith.constant 0.000000e+00 : f32
    %247 = vector.broadcast %cst_135 : f32 to vector<16x32xf32>
    %c2_136 = arith.constant 2 : index
    %c0_137 = arith.constant 0 : index
    %248 = vector.load %arg10[%c2_136, %c0_137] : memref<5x32xf32, #tpu.memory_space<vmem>>, vector<1x32xf32>
    %249 = vector.broadcast %248 : vector<1x32xf32> to vector<16x32xf32>
    %250 = arith.addf %247, %249 : vector<16x32xf32>
    %c5 = arith.constant 5 : index
    %c0_138 = arith.constant 0 : index
    %251 = vector.load %arg26[%c5, %c0_138] : memref<32x32xf32, #tpu.memory_space<vmem>>, vector<16x32xf32>
    %c0_139 = arith.constant 0 : index
    %c0_140 = arith.constant 0 : index
    %252 = vector.load %arg17[%c0_139, %c0_140] : memref<7x32xf32, #tpu.memory_space<vmem>>, vector<1x32xf32>
    %253 = vector.broadcast %252 : vector<1x32xf32> to vector<16x32xf32>
    %254 = arith.mulf %251, %253 : vector<16x32xf32>
    %255 = arith.addf %250, %254 : vector<16x32xf32>
    %c6 = arith.constant 6 : index
    %c0_141 = arith.constant 0 : index
    %256 = vector.load %arg26[%c6, %c0_141] : memref<32x32xf32, #tpu.memory_space<vmem>>, vector<16x32xf32>
    %c1_142 = arith.constant 1 : index
    %c0_143 = arith.constant 0 : index
    %257 = vector.load %arg17[%c1_142, %c0_143] : memref<7x32xf32, #tpu.memory_space<vmem>>, vector<1x32xf32>
    %258 = vector.broadcast %257 : vector<1x32xf32> to vector<16x32xf32>
    %259 = arith.mulf %256, %258 : vector<16x32xf32>
    %260 = arith.addf %255, %259 : vector<16x32xf32>
    %c7 = arith.constant 7 : index
    %c0_144 = arith.constant 0 : index
    %261 = vector.load %arg26[%c7, %c0_144] : memref<32x32xf32, #tpu.memory_space<vmem>>, vector<16x32xf32>
    %c2_145 = arith.constant 2 : index
    %c0_146 = arith.constant 0 : index
    %262 = vector.load %arg17[%c2_145, %c0_146] : memref<7x32xf32, #tpu.memory_space<vmem>>, vector<1x32xf32>
    %263 = vector.broadcast %262 : vector<1x32xf32> to vector<16x32xf32>
    %264 = arith.mulf %261, %263 : vector<16x32xf32>
    %265 = arith.addf %260, %264 : vector<16x32xf32>
    %c8_147 = arith.constant 8 : index
    %c0_148 = arith.constant 0 : index
    %266 = vector.load %arg26[%c8_147, %c0_148] : memref<32x32xf32, #tpu.memory_space<vmem>>, vector<16x32xf32>
    %c3_149 = arith.constant 3 : index
    %c0_150 = arith.constant 0 : index
    %267 = vector.load %arg17[%c3_149, %c0_150] : memref<7x32xf32, #tpu.memory_space<vmem>>, vector<1x32xf32>
    %268 = vector.broadcast %267 : vector<1x32xf32> to vector<16x32xf32>
    %269 = arith.mulf %266, %268 : vector<16x32xf32>
    %270 = arith.addf %265, %269 : vector<16x32xf32>
    %c9 = arith.constant 9 : index
    %c0_151 = arith.constant 0 : index
    %271 = vector.load %arg26[%c9, %c0_151] : memref<32x32xf32, #tpu.memory_space<vmem>>, vector<16x32xf32>
    %c4 = arith.constant 4 : index
    %c0_152 = arith.constant 0 : index
    %272 = vector.load %arg17[%c4, %c0_152] : memref<7x32xf32, #tpu.memory_space<vmem>>, vector<1x32xf32>
    %273 = vector.broadcast %272 : vector<1x32xf32> to vector<16x32xf32>
    %274 = arith.mulf %271, %273 : vector<16x32xf32>
    %275 = arith.addf %270, %274 : vector<16x32xf32>
    %c10 = arith.constant 10 : index
    %c0_153 = arith.constant 0 : index
    %276 = vector.load %arg26[%c10, %c0_153] : memref<32x32xf32, #tpu.memory_space<vmem>>, vector<16x32xf32>
    %c5_154 = arith.constant 5 : index
    %c0_155 = arith.constant 0 : index
    %277 = vector.load %arg17[%c5_154, %c0_155] : memref<7x32xf32, #tpu.memory_space<vmem>>, vector<1x32xf32>
    %278 = vector.broadcast %277 : vector<1x32xf32> to vector<16x32xf32>
    %279 = arith.mulf %276, %278 : vector<16x32xf32>
    %280 = arith.addf %275, %279 : vector<16x32xf32>
    %c11 = arith.constant 11 : index
    %c0_156 = arith.constant 0 : index
    %281 = vector.load %arg26[%c11, %c0_156] : memref<32x32xf32, #tpu.memory_space<vmem>>, vector<16x32xf32>
    %c6_157 = arith.constant 6 : index
    %c0_158 = arith.constant 0 : index
    %282 = vector.load %arg17[%c6_157, %c0_158] : memref<7x32xf32, #tpu.memory_space<vmem>>, vector<1x32xf32>
    %283 = vector.broadcast %282 : vector<1x32xf32> to vector<16x32xf32>
    %284 = arith.mulf %281, %283 : vector<16x32xf32>
    %285 = arith.addf %280, %284 : vector<16x32xf32>
    %c5_159 = arith.constant 5 : index
    %c0_160 = arith.constant 0 : index
    %286 = vector.load %arg5[%c5_159, %c0_160] : memref<6x32xf32, #tpu.memory_space<vmem>>, vector<1x32xf32>
    %c5_161 = arith.constant 5 : index
    %c0_162 = arith.constant 0 : index
    %287 = vector.load %arg6[%c5_161, %c0_162] : memref<6x32xf32, #tpu.memory_space<vmem>>, vector<1x32xf32>
    %cst_163 = arith.constant dense<0.000000e+00> : vector<16xf32>
    %288 = vector.multi_reduction <add>, %285, %cst_163 [1] : vector<16x32xf32> to vector<16xf32>
    %289 = vector.shape_cast %288 : vector<16xf32> to vector<16x1xf32>
    %cst_164 = arith.constant 3.200000e+01 : f32
    %290 = vector.broadcast %cst_164 : f32 to vector<16x1xf32>
    %291 = arith.divf %289, %290 : vector<16x1xf32>
    %292 = vector.broadcast %291 : vector<16x1xf32> to vector<16x32xf32>
    %293 = arith.subf %285, %292 : vector<16x32xf32>
    %294 = arith.mulf %293, %293 : vector<16x32xf32>
    %cst_165 = arith.constant dense<0.000000e+00> : vector<16xf32>
    %295 = vector.multi_reduction <add>, %294, %cst_165 [1] : vector<16x32xf32> to vector<16xf32>
    %296 = vector.shape_cast %295 : vector<16xf32> to vector<16x1xf32>
    %cst_166 = arith.constant 3.200000e+01 : f32
    %297 = vector.broadcast %cst_166 : f32 to vector<16x1xf32>
    %298 = arith.divf %296, %297 : vector<16x1xf32>
    %299 = vector.broadcast %291 : vector<16x1xf32> to vector<16x32xf32>
    %300 = arith.subf %285, %299 : vector<16x32xf32>
    %cst_167 = arith.constant 9.99999974E-6 : f32
    %301 = vector.broadcast %cst_167 : f32 to vector<16x1xf32>
    %302 = arith.addf %298, %301 : vector<16x1xf32>
    %303 = math.rsqrt %302 : vector<16x1xf32>
    %304 = vector.broadcast %303 : vector<16x1xf32> to vector<16x32xf32>
    %305 = arith.mulf %300, %304 : vector<16x32xf32>
    %306 = vector.broadcast %286 : vector<1x32xf32> to vector<16x32xf32>
    %307 = arith.mulf %305, %306 : vector<16x32xf32>
    %308 = vector.broadcast %287 : vector<1x32xf32> to vector<16x32xf32>
    %309 = arith.addf %307, %308 : vector<16x32xf32>
    %310 = arith.negf %309 : vector<16x32xf32>
    %311 = math.exp %310 : vector<16x32xf32>
    %cst_168 = arith.constant 1.000000e+00 : f32
    %312 = vector.broadcast %cst_168 : f32 to vector<16x32xf32>
    %313 = arith.addf %312, %311 : vector<16x32xf32>
    %314 = arith.divf %312, %313 : vector<16x32xf32>
    %315 = arith.mulf %309, %314 : vector<16x32xf32>
    %c0_169 = arith.constant 0 : index
    %c0_170 = arith.constant 0 : index
    %316 = vector.load %arg18[%c0_169, %c0_170] : memref<32x32xbf16, #tpu.memory_space<vmem>>, vector<32x32xbf16>
    %317 = arith.truncf %315 : vector<16x32xf32> to vector<16x32xbf16>
    %cst_171 = arith.constant dense<0.000000e+00> : vector<16x32xf32>
    %318 = tpu.matmul %317, %316, %cst_171 {dimension_numbers = #tpu.dot_dimension_numbers<[1], [0], [0], [1], [0, 0, 1, 1], [], []>} : vector<16x32xbf16>, vector<32x32xbf16>, vector<16x32xf32> -> vector<16x32xf32>
    %c3_172 = arith.constant 3 : index
    %c0_173 = arith.constant 0 : index
    %319 = vector.load %arg10[%c3_172, %c0_173] : memref<5x32xf32, #tpu.memory_space<vmem>>, vector<1x32xf32>
    %320 = vector.broadcast %319 : vector<1x32xf32> to vector<16x32xf32>
    %321 = arith.addf %318, %320 : vector<16x32xf32>
    %322 = vector.broadcast %5 : vector<16x1xf32> to vector<16x32xf32>
    %323 = arith.mulf %321, %322 : vector<16x32xf32>
    %324 = arith.addf %201, %323 : vector<16x32xf32>
    %c3_174 = arith.constant 3 : index
    %c0_175 = arith.constant 0 : index
    %325 = vector.load %arg5[%c3_174, %c0_175] : memref<6x32xf32, #tpu.memory_space<vmem>>, vector<1x32xf32>
    %c3_176 = arith.constant 3 : index
    %c0_177 = arith.constant 0 : index
    %326 = vector.load %arg6[%c3_176, %c0_177] : memref<6x32xf32, #tpu.memory_space<vmem>>, vector<1x32xf32>
    %cst_178 = arith.constant dense<0.000000e+00> : vector<16xf32>
    %327 = vector.multi_reduction <add>, %324, %cst_178 [1] : vector<16x32xf32> to vector<16xf32>
    %328 = vector.shape_cast %327 : vector<16xf32> to vector<16x1xf32>
    %cst_179 = arith.constant 3.200000e+01 : f32
    %329 = vector.broadcast %cst_179 : f32 to vector<16x1xf32>
    %330 = arith.divf %328, %329 : vector<16x1xf32>
    %331 = vector.broadcast %330 : vector<16x1xf32> to vector<16x32xf32>
    %332 = arith.subf %324, %331 : vector<16x32xf32>
    %333 = arith.mulf %332, %332 : vector<16x32xf32>
    %cst_180 = arith.constant dense<0.000000e+00> : vector<16xf32>
    %334 = vector.multi_reduction <add>, %333, %cst_180 [1] : vector<16x32xf32> to vector<16xf32>
    %335 = vector.shape_cast %334 : vector<16xf32> to vector<16x1xf32>
    %cst_181 = arith.constant 3.200000e+01 : f32
    %336 = vector.broadcast %cst_181 : f32 to vector<16x1xf32>
    %337 = arith.divf %335, %336 : vector<16x1xf32>
    %338 = vector.broadcast %330 : vector<16x1xf32> to vector<16x32xf32>
    %339 = arith.subf %324, %338 : vector<16x32xf32>
    %cst_182 = arith.constant 9.99999974E-6 : f32
    %340 = vector.broadcast %cst_182 : f32 to vector<16x1xf32>
    %341 = arith.addf %337, %340 : vector<16x1xf32>
    %342 = math.rsqrt %341 : vector<16x1xf32>
    %343 = vector.broadcast %342 : vector<16x1xf32> to vector<16x32xf32>
    %344 = arith.mulf %339, %343 : vector<16x32xf32>
    %345 = vector.broadcast %325 : vector<1x32xf32> to vector<16x32xf32>
    %346 = arith.mulf %344, %345 : vector<16x32xf32>
    %347 = vector.broadcast %326 : vector<1x32xf32> to vector<16x32xf32>
    %348 = arith.addf %346, %347 : vector<16x32xf32>
    %c0_183 = arith.constant 0 : index
    %c0_184 = arith.constant 0 : index
    %349 = vector.load %arg19[%c0_183, %c0_184] : memref<32x64xbf16, #tpu.memory_space<vmem>>, vector<32x64xbf16>
    %350 = arith.truncf %348 : vector<16x32xf32> to vector<16x32xbf16>
    %cst_185 = arith.constant dense<0.000000e+00> : vector<16x64xf32>
    %351 = tpu.matmul %350, %349, %cst_185 {dimension_numbers = #tpu.dot_dimension_numbers<[1], [0], [0], [1], [0, 0, 1, 1], [], []>} : vector<16x32xbf16>, vector<32x64xbf16>, vector<16x64xf32> -> vector<16x64xf32>
    %c1_186 = arith.constant 1 : index
    %c0_187 = arith.constant 0 : index
    %352 = vector.load %arg9[%c1_186, %c0_187] : memref<2x64xf32, #tpu.memory_space<vmem>>, vector<1x64xf32>
    %353 = vector.broadcast %352 : vector<1x64xf32> to vector<16x64xf32>
    %354 = arith.addf %351, %353 : vector<16x64xf32>
    %355 = arith.negf %354 : vector<16x64xf32>
    %356 = math.exp %355 : vector<16x64xf32>
    %cst_188 = arith.constant 1.000000e+00 : f32
    %357 = vector.broadcast %cst_188 : f32 to vector<16x64xf32>
    %358 = arith.addf %357, %356 : vector<16x64xf32>
    %359 = arith.divf %357, %358 : vector<16x64xf32>
    %360 = arith.mulf %354, %359 : vector<16x64xf32>
    %c0_189 = arith.constant 0 : index
    %c0_190 = arith.constant 0 : index
    %361 = vector.load %arg20[%c0_189, %c0_190] : memref<64x32xbf16, #tpu.memory_space<vmem>>, vector<64x32xbf16>
    %362 = arith.truncf %360 : vector<16x64xf32> to vector<16x64xbf16>
    %cst_191 = arith.constant dense<0.000000e+00> : vector<16x32xf32>
    %363 = tpu.matmul %362, %361, %cst_191 {dimension_numbers = #tpu.dot_dimension_numbers<[1], [0], [0], [1], [0, 0, 1, 1], [], []>} : vector<16x64xbf16>, vector<64x32xbf16>, vector<16x32xf32> -> vector<16x32xf32>
    %c4_192 = arith.constant 4 : index
    %c0_193 = arith.constant 0 : index
    %364 = vector.load %arg10[%c4_192, %c0_193] : memref<5x32xf32, #tpu.memory_space<vmem>>, vector<1x32xf32>
    %365 = vector.broadcast %364 : vector<1x32xf32> to vector<16x32xf32>
    %366 = arith.addf %363, %365 : vector<16x32xf32>
    %cst_194 = arith.constant 5.000000e-01 : f32
    %367 = vector.broadcast %cst_194 : f32 to vector<16x32xf32>
    %368 = arith.mulf %367, %366 : vector<16x32xf32>
    %369 = arith.addf %324, %368 : vector<16x32xf32>
    %c4_195 = arith.constant 4 : index
    %c0_196 = arith.constant 0 : index
    %370 = vector.load %arg5[%c4_195, %c0_196] : memref<6x32xf32, #tpu.memory_space<vmem>>, vector<1x32xf32>
    %c4_197 = arith.constant 4 : index
    %c0_198 = arith.constant 0 : index
    %371 = vector.load %arg6[%c4_197, %c0_198] : memref<6x32xf32, #tpu.memory_space<vmem>>, vector<1x32xf32>
    %cst_199 = arith.constant dense<0.000000e+00> : vector<16xf32>
    %372 = vector.multi_reduction <add>, %369, %cst_199 [1] : vector<16x32xf32> to vector<16xf32>
    %373 = vector.shape_cast %372 : vector<16xf32> to vector<16x1xf32>
    %cst_200 = arith.constant 3.200000e+01 : f32
    %374 = vector.broadcast %cst_200 : f32 to vector<16x1xf32>
    %375 = arith.divf %373, %374 : vector<16x1xf32>
    %376 = vector.broadcast %375 : vector<16x1xf32> to vector<16x32xf32>
    %377 = arith.subf %369, %376 : vector<16x32xf32>
    %378 = arith.mulf %377, %377 : vector<16x32xf32>
    %cst_201 = arith.constant dense<0.000000e+00> : vector<16xf32>
    %379 = vector.multi_reduction <add>, %378, %cst_201 [1] : vector<16x32xf32> to vector<16xf32>
    %380 = vector.shape_cast %379 : vector<16xf32> to vector<16x1xf32>
    %cst_202 = arith.constant 3.200000e+01 : f32
    %381 = vector.broadcast %cst_202 : f32 to vector<16x1xf32>
    %382 = arith.divf %380, %381 : vector<16x1xf32>
    %383 = vector.broadcast %375 : vector<16x1xf32> to vector<16x32xf32>
    %384 = arith.subf %369, %383 : vector<16x32xf32>
    %cst_203 = arith.constant 9.99999974E-6 : f32
    %385 = vector.broadcast %cst_203 : f32 to vector<16x1xf32>
    %386 = arith.addf %382, %385 : vector<16x1xf32>
    %387 = math.rsqrt %386 : vector<16x1xf32>
    %388 = vector.broadcast %387 : vector<16x1xf32> to vector<16x32xf32>
    %389 = arith.mulf %384, %388 : vector<16x32xf32>
    %390 = vector.broadcast %370 : vector<1x32xf32> to vector<16x32xf32>
    %391 = arith.mulf %389, %390 : vector<16x32xf32>
    %392 = vector.broadcast %371 : vector<1x32xf32> to vector<16x32xf32>
    %393 = arith.addf %391, %392 : vector<16x32xf32>
    %c0_204 = arith.constant 0 : index
    %c0_205 = arith.constant 0 : index
    %c0_206 = arith.constant 0 : index
    %394 = vector.load %arg21[%c0_204, %c0_205, %c0_206] : memref<1x16x32xf32, #tpu.memory_space<vmem>>, vector<1x16x32xf32>
    %395 = vector.shape_cast %394 : vector<1x16x32xf32> to vector<16x32xf32>
    %396 = vector.shape_cast %393 : vector<16x32xf32> to vector<1x16x32xf32>
    tpu.vector_store %arg21[%c0_204, %c0_205, %c0_206], %396 {strides = array<i32>} : memref<1x16x32xf32, #tpu.memory_space<vmem>>, vector<1x16x32xf32>,
    return
  }
  func.func @transform_0(%arg0: i32) -> (i32, i32, i32) {
    %c0_i32 = arith.constant 0 : i32
    %c0_i32_0 = arith.constant 0 : i32
    %c0_i32_1 = arith.constant 0 : i32
    return %arg0, %c0_i32, %c0_i32_0 : i32, i32, i32
  }
  func.func @transform_1(%arg0: i32) -> (i32, i32, i32) {
    %c0_i32 = arith.constant 0 : i32
    %c0_i32_0 = arith.constant 0 : i32
    %c0_i32_1 = arith.constant 0 : i32
    return %arg0, %c0_i32, %c0_i32_0 : i32, i32, i32
  }
  func.func @transform_2(%arg0: i32) -> (i32, i32, i32) {
    %c0_i32 = arith.constant 0 : i32
    %c0_i32_0 = arith.constant 0 : i32
    %c0_i32_1 = arith.constant 0 : i32
    return %arg0, %c0_i32, %c0_i32_0 : i32, i32, i32
  }
  func.func @transform_3(%arg0: i32) -> (i32, i32) {
    %c0_i32 = arith.constant 0 : i32
    %c0_i32_0 = arith.constant 0 : i32
    %c0_i32_1 = arith.constant 0 : i32
    return %c0_i32, %c0_i32_0 : i32, i32
  }
  func.func @transform_4(%arg0: i32) -> (i32, i32) {
    %c0_i32 = arith.constant 0 : i32
    %c0_i32_0 = arith.constant 0 : i32
    %c0_i32_1 = arith.constant 0 : i32
    return %c0_i32, %c0_i32_0 : i32, i32
  }
  func.func @transform_5(%arg0: i32) -> (i32, i32) {
    %c0_i32 = arith.constant 0 : i32
    %c0_i32_0 = arith.constant 0 : i32
    %c0_i32_1 = arith.constant 0 : i32
    return %c0_i32, %c0_i32_0 : i32, i32
  }
  func.func @transform_6(%arg0: i32) -> (i32, i32) {
    %c0_i32 = arith.constant 0 : i32
    %c0_i32_0 = arith.constant 0 : i32
    %c0_i32_1 = arith.constant 0 : i32
    return %c0_i32, %c0_i32_0 : i32, i32
  }
  func.func @transform_7(%arg0: i32) -> (i32, i32) {
    %c0_i32 = arith.constant 0 : i32
    %c0_i32_0 = arith.constant 0 : i32
    %c0_i32_1 = arith.constant 0 : i32
    return %c0_i32, %c0_i32_0 : i32, i32
  }
  func.func @transform_8(%arg0: i32) -> (i32, i32) {
    %c0_i32 = arith.constant 0 : i32
    %c0_i32_0 = arith.constant 0 : i32
    %c0_i32_1 = arith.constant 0 : i32
    return %c0_i32, %c0_i32_0 : i32, i32
  }
  func.func @transform_9(%arg0: i32) -> (i32, i32) {
    %c0_i32 = arith.constant 0 : i32
    %c0_i32_0 = arith.constant 0 : i32
    %c0_i32_1 = arith.constant 0 : i32
    return %c0_i32, %c0_i32_0 : i32, i32
  }
  func.func @transform_10(%arg0: i32) -> (i32, i32) {
    %c0_i32 = arith.constant 0 : i32
    %c0_i32_0 = arith.constant 0 : i32
    %c0_i32_1 = arith.constant 0 : i32
    return %c0_i32, %c0_i32_0 : i32, i32
  }
  func.func @transform_11(%arg0: i32) -> (i32, i32) {
    %c0_i32 = arith.constant 0 : i32
    %c0_i32_0 = arith.constant 0 : i32
    %c0_i32_1 = arith.constant 0 : i32
    return %c0_i32, %c0_i32_0 : i32, i32
  }
  func.func @transform_12(%arg0: i32) -> (i32, i32) {
    %c0_i32 = arith.constant 0 : i32
    %c0_i32_0 = arith.constant 0 : i32
    %c0_i32_1 = arith.constant 0 : i32
    return %c0_i32, %c0_i32_0 : i32, i32
  }
  func.func @transform_13(%arg0: i32) -> (i32, i32, i32) {
    %c0_i32 = arith.constant 0 : i32
    %c0_i32_0 = arith.constant 0 : i32
    %c0_i32_1 = arith.constant 0 : i32
    %c0_i32_2 = arith.constant 0 : i32
    return %c0_i32, %c0_i32_0, %c0_i32_1 : i32, i32, i32
  }
  func.func @transform_14(%arg0: i32) -> (i32, i32) {
    %c0_i32 = arith.constant 0 : i32
    %c0_i32_0 = arith.constant 0 : i32
    %c0_i32_1 = arith.constant 0 : i32
    return %c0_i32, %c0_i32_0 : i32, i32
  }
  func.func @transform_15(%arg0: i32) -> (i32, i32) {
    %c0_i32 = arith.constant 0 : i32
    %c0_i32_0 = arith.constant 0 : i32
    %c0_i32_1 = arith.constant 0 : i32
    return %c0_i32, %c0_i32_0 : i32, i32
  }
  func.func @transform_16(%arg0: i32) -> (i32, i32) {
    %c0_i32 = arith.constant 0 : i32
    %c0_i32_0 = arith.constant 0 : i32
    %c0_i32_1 = arith.constant 0 : i32
    return %c0_i32, %c0_i32_0 : i32, i32
  }
  func.func @transform_17(%arg0: i32) -> (i32, i32) {
    %c0_i32 = arith.constant 0 : i32
    %c0_i32_0 = arith.constant 0 : i32
    %c0_i32_1 = arith.constant 0 : i32
    return %c0_i32, %c0_i32_0 : i32, i32
  }
  func.func @transform_18(%arg0: i32) -> (i32, i32) {
    %c0_i32 = arith.constant 0 : i32
    %c0_i32_0 = arith.constant 0 : i32
    %c0_i32_1 = arith.constant 0 : i32
    return %c0_i32, %c0_i32_0 : i32, i32
  }
  func.func @transform_19(%arg0: i32) -> (i32, i32) {
    %c0_i32 = arith.constant 0 : i32
    %c0_i32_0 = arith.constant 0 : i32
    %c0_i32_1 = arith.constant 0 : i32
    return %c0_i32, %c0_i32_0 : i32, i32
  }
  func.func @transform_20(%arg0: i32) -> (i32, i32, i32) {
    %c0_i32 = arith.constant 0 : i32
    %c0_i32_0 = arith.constant 0 : i32
    %c0_i32_1 = arith.constant 0 : i32
    return %arg0, %c0_i32, %c0_i32_0 : i32, i32, i32
  }
  func.func @transform_21(%arg0: i32) -> (i32, i32, i32) {
    %c0_i32 = arith.constant 0 : i32
    %c0_i32_0 = arith.constant 0 : i32
    %c0_i32_1 = arith.constant 0 : i32
    return %arg0, %c0_i32, %c0_i32_0 : i32, i32, i32
  }
}

module attributes {stable_mosaic.version = 11 : i64} {
  func.func @conformer_kernel(%arg0: i32, %arg1: memref<1x16x32xf32, #tpu.memory_space<vmem>>, %arg2: memref<1x1x16xf32, #tpu.memory_space<vmem>>, %arg3: memref<1x16x1xf32, #tpu.memory_space<vmem>>, %arg4: memref<16x32xbf16, #tpu.memory_space<vmem>>, %arg5: memref<6x32xf32, #tpu.memory_space<vmem>>, %arg6: memref<6x32xf32, #tpu.memory_space<vmem>>, %arg7: memref<32x64xbf16, #tpu.memory_space<vmem>>, %arg8: memref<64x32xbf16, #tpu.memory_space<vmem>>, %arg9: memref<2x64xf32, #tpu.memory_space<vmem>>, %arg10: memref<5x32xf32, #tpu.memory_space<vmem>>, %arg11: memref<32x96xbf16, #tpu.memory_space<vmem>>, %arg12: memref<1x96xf32, #tpu.memory_space<vmem>>, %arg13: memref<2x32xf32, #tpu.memory_space<vmem>>, %arg14: memref<4x8x32xbf16, #tpu.memory_space<vmem>>, %arg15: memref<32x64xbf16, #tpu.memory_space<vmem>>, %arg16: memref<1x64xf32, #tpu.memory_space<vmem>>, %arg17: memref<7x32xf32, #tpu.memory_space<vmem>>, %arg18: memref<32x32xbf16, #tpu.memory_space<vmem>>, %arg19: memref<32x64xbf16, #tpu.memory_space<vmem>>, %arg20: memref<64x32xbf16, #tpu.memory_space<vmem>>, %arg21: memref<1x16x32xf32, #tpu.memory_space<vmem>>, %arg22: memref<1x16x64xbf16, #tpu.memory_space<vmem>>, %arg23: memref<4x16x16xbf16, #tpu.memory_space<vmem>>, %arg24: memref<4x16x16xbf16, #tpu.memory_space<vmem>>, %arg25: memref<4x16x8xbf16, #tpu.memory_space<vmem>>, %arg26: memref<32x32xf32, #tpu.memory_space<vmem>>) attributes {dimension_semantics = [#tpu.dimension_semantics<parallel>], iteration_bounds = array<i64: 2>, scalar_prefetch = 0 : i64, scratch_operands = 4 : i64, tpu.core_type = #tpu.core_type<tc>, window_params = [{transform_indices = @transform_0, window_bounds = array<i64: 1, 16, 32>}, {transform_indices = @transform_1, window_bounds = array<i64: 1, 1, 16>}, {transform_indices = @transform_2, window_bounds = array<i64: 1, 16, 1>}, {pipeline_mode = #tpu.pipeline_mode<synchronous>, transform_indices = @transform_3, window_bounds = array<i64: 16, 32>}, {pipeline_mode = #tpu.pipeline_mode<synchronous>, transform_indices = @transform_4, window_bounds = array<i64: 6, 32>}, {pipeline_mode = #tpu.pipeline_mode<synchronous>, transform_indices = @transform_5, window_bounds = array<i64: 6, 32>}, {pipeline_mode = #tpu.pipeline_mode<synchronous>, transform_indices = @transform_6, window_bounds = array<i64: 32, 64>}, {pipeline_mode = #tpu.pipeline_mode<synchronous>, transform_indices = @transform_7, window_bounds = array<i64: 64, 32>}, {pipeline_mode = #tpu.pipeline_mode<synchronous>, transform_indices = @transform_8, window_bounds = array<i64: 2, 64>}, {pipeline_mode = #tpu.pipeline_mode<synchronous>, transform_indices = @transform_9, window_bounds = array<i64: 5, 32>}, {pipeline_mode = #tpu.pipeline_mode<synchronous>, transform_indices = @transform_10, window_bounds = array<i64: 32, 96>}, {pipeline_mode = #tpu.pipeline_mode<synchronous>, transform_indices = @transform_11, window_bounds = array<i64: 1, 96>}, {pipeline_mode = #tpu.pipeline_mode<synchronous>, transform_indices = @transform_12, window_bounds = array<i64: 2, 32>}, {pipeline_mode = #tpu.pipeline_mode<synchronous>, transform_indices = @transform_13, window_bounds = array<i64: 4, 8, 32>}, {pipeline_mode = #tpu.pipeline_mode<synchronous>, transform_indices = @transform_14, window_bounds = array<i64: 32, 64>}, {pipeline_mode = #tpu.pipeline_mode<synchronous>, transform_indices = @transform_15, window_bounds = array<i64: 1, 64>}, {pipeline_mode = #tpu.pipeline_mode<synchronous>, transform_indices = @transform_16, window_bounds = array<i64: 7, 32>}, {pipeline_mode = #tpu.pipeline_mode<synchronous>, transform_indices = @transform_17, window_bounds = array<i64: 32, 32>}, {pipeline_mode = #tpu.pipeline_mode<synchronous>, transform_indices = @transform_18, window_bounds = array<i64: 32, 64>}, {pipeline_mode = #tpu.pipeline_mode<synchronous>, transform_indices = @transform_19, window_bounds = array<i64: 64, 32>}, {transform_indices = @transform_20, window_bounds = array<i64: 1, 16, 32>}, {transform_indices = @transform_21, window_bounds = array<i64: 1, 16, 64>}]} {
    %c0 = arith.constant 0 : index
    %c0_0 = arith.constant 0 : index
    %c0_1 = arith.constant 0 : index
    %0 = vector.load %arg1[%c0, %c0_0, %c0_1] : memref<1x16x32xf32, #tpu.memory_space<vmem>>, vector<1x16x32xf32>
    %1 = vector.shape_cast %0 : vector<1x16x32xf32> to vector<16x32xf32>
    %c0_2 = arith.constant 0 : index
    %c0_3 = arith.constant 0 : index
    %c0_4 = arith.constant 0 : index
    %2 = vector.load %arg2[%c0_2, %c0_3, %c0_4] : memref<1x1x16xf32, #tpu.memory_space<vmem>>, vector<1x1x16xf32>
    %3 = vector.shape_cast %2 : vector<1x1x16xf32> to vector<1x16xf32>
    %c0_5 = arith.constant 0 : index
    %c0_6 = arith.constant 0 : index
    %c0_7 = arith.constant 0 : index
    %4 = vector.load %arg3[%c0_5, %c0_6, %c0_7] : memref<1x16x1xf32, #tpu.memory_space<vmem>>, vector<1x16x1xf32>
    %5 = vector.shape_cast %4 : vector<1x16x1xf32> to vector<16x1xf32>
    %c0_8 = arith.constant 0 : index
    %c0_9 = arith.constant 0 : index
    %6 = vector.load %arg5[%c0_8, %c0_9] : memref<6x32xf32, #tpu.memory_space<vmem>>, vector<1x32xf32>
    %c0_10 = arith.constant 0 : index
    %c0_11 = arith.constant 0 : index
    %7 = vector.load %arg6[%c0_10, %c0_11] : memref<6x32xf32, #tpu.memory_space<vmem>>, vector<1x32xf32>
    %cst = arith.constant dense<0.000000e+00> : vector<16xf32>
    %8 = vector.multi_reduction <add>, %1, %cst [1] : vector<16x32xf32> to vector<16xf32>
    %9 = vector.shape_cast %8 : vector<16xf32> to vector<16x1xf32>
    %cst_12 = arith.constant 3.200000e+01 : f32
    %10 = vector.broadcast %cst_12 : f32 to vector<16x1xf32>
    %11 = arith.divf %9, %10 : vector<16x1xf32>
    %12 = vector.broadcast %11 : vector<16x1xf32> to vector<16x32xf32>
    %13 = arith.subf %1, %12 : vector<16x32xf32>
    %14 = arith.mulf %13, %13 : vector<16x32xf32>
    %cst_13 = arith.constant dense<0.000000e+00> : vector<16xf32>
    %15 = vector.multi_reduction <add>, %14, %cst_13 [1] : vector<16x32xf32> to vector<16xf32>
    %16 = vector.shape_cast %15 : vector<16xf32> to vector<16x1xf32>
    %cst_14 = arith.constant 3.200000e+01 : f32
    %17 = vector.broadcast %cst_14 : f32 to vector<16x1xf32>
    %18 = arith.divf %16, %17 : vector<16x1xf32>
    %19 = vector.broadcast %11 : vector<16x1xf32> to vector<16x32xf32>
    %20 = arith.subf %1, %19 : vector<16x32xf32>
    %cst_15 = arith.constant 9.99999974E-6 : f32
    %21 = vector.broadcast %cst_15 : f32 to vector<16x1xf32>
    %22 = arith.addf %18, %21 : vector<16x1xf32>
    %23 = math.rsqrt %22 : vector<16x1xf32>
    %24 = vector.broadcast %23 : vector<16x1xf32> to vector<16x32xf32>
    %25 = arith.mulf %20, %24 : vector<16x32xf32>
    %26 = vector.broadcast %6 : vector<1x32xf32> to vector<16x32xf32>
    %27 = arith.mulf %25, %26 : vector<16x32xf32>
    %28 = vector.broadcast %7 : vector<1x32xf32> to vector<16x32xf32>
    %29 = arith.addf %27, %28 : vector<16x32xf32>
    %c0_16 = arith.constant 0 : index
    %c0_17 = arith.constant 0 : index
    %30 = vector.load %arg7[%c0_16, %c0_17] : memref<32x64xbf16, #tpu.memory_space<vmem>>, vector<32x64xbf16>
    %31 = arith.truncf %29 : vector<16x32xf32> to vector<16x32xbf16>
    %cst_18 = arith.constant dense<0.000000e+00> : vector<16x64xf32>
    %32 = tpu.matmul %31, %30, %cst_18 {dimension_numbers = #tpu.dot_dimension_numbers<[1], [0], [0], [1], [0, 0, 1, 1], [], []>} : vector<16x32xbf16>, vector<32x64xbf16>, vector<16x64xf32> -> vector<16x64xf32>
    %c0_19 = arith.constant 0 : index
    %c0_20 = arith.constant 0 : index
    %33 = vector.load %arg9[%c0_19, %c0_20] : memref<2x64xf32, #tpu.memory_space<vmem>>, vector<1x64xf32>
    %34 = vector.broadcast %33 : vector<1x64xf32> to vector<16x64xf32>
    %35 = arith.addf %32, %34 : vector<16x64xf32>
    %36 = arith.negf %35 : vector<16x64xf32>
    %37 = math.exp %36 : vector<16x64xf32>
    %cst_21 = arith.constant 1.000000e+00 : f32
    %38 = vector.broadcast %cst_21 : f32 to vector<16x64xf32>
    %39 = arith.addf %38, %37 : vector<16x64xf32>
    %40 = arith.divf %38, %39 : vector<16x64xf32>
    %41 = arith.mulf %35, %40 : vector<16x64xf32>
    %c0_22 = arith.constant 0 : index
    %c0_23 = arith.constant 0 : index
    %42 = vector.load %arg8[%c0_22, %c0_23] : memref<64x32xbf16, #tpu.memory_space<vmem>>, vector<64x32xbf16>
    %43 = arith.truncf %41 : vector<16x64xf32> to vector<16x64xbf16>
    %cst_24 = arith.constant dense<0.000000e+00> : vector<16x32xf32>
    %44 = tpu.matmul %43, %42, %cst_24 {dimension_numbers = #tpu.dot_dimension_numbers<[1], [0], [0], [1], [0, 0, 1, 1], [], []>} : vector<16x64xbf16>, vector<64x32xbf16>, vector<16x32xf32> -> vector<16x32xf32>
    %c0_25 = arith.constant 0 : index
    %c0_26 = arith.constant 0 : index
    %45 = vector.load %arg10[%c0_25, %c0_26] : memref<5x32xf32, #tpu.memory_space<vmem>>, vector<1x32xf32>
    %46 = vector.broadcast %45 : vector<1x32xf32> to vector<16x32xf32>
    %47 = arith.addf %44, %46 : vector<16x32xf32>
    %cst_27 = arith.constant 5.000000e-01 : f32
    %48 = vector.broadcast %cst_27 : f32 to vector<16x32xf32>
    %49 = arith.mulf %48, %47 : vector<16x32xf32>
    %50 = arith.addf %1, %49 : vector<16x32xf32>
    %c1 = arith.constant 1 : index
    %c0_28 = arith.constant 0 : index
    %51 = vector.load %arg5[%c1, %c0_28] : memref<6x32xf32, #tpu.memory_space<vmem>>, vector<1x32xf32>
    %c1_29 = arith.constant 1 : index
    %c0_30 = arith.constant 0 : index
    %52 = vector.load %arg6[%c1_29, %c0_30] : memref<6x32xf32, #tpu.memory_space<vmem>>, vector<1x32xf32>
    %cst_31 = arith.constant dense<0.000000e+00> : vector<16xf32>
    %53 = vector.multi_reduction <add>, %50, %cst_31 [1] : vector<16x32xf32> to vector<16xf32>
    %54 = vector.shape_cast %53 : vector<16xf32> to vector<16x1xf32>
    %cst_32 = arith.constant 3.200000e+01 : f32
    %55 = vector.broadcast %cst_32 : f32 to vector<16x1xf32>
    %56 = arith.divf %54, %55 : vector<16x1xf32>
    %57 = vector.broadcast %56 : vector<16x1xf32> to vector<16x32xf32>
    %58 = arith.subf %50, %57 : vector<16x32xf32>
    %59 = arith.mulf %58, %58 : vector<16x32xf32>
    %cst_33 = arith.constant dense<0.000000e+00> : vector<16xf32>
    %60 = vector.multi_reduction <add>, %59, %cst_33 [1] : vector<16x32xf32> to vector<16xf32>
    %61 = vector.shape_cast %60 : vector<16xf32> to vector<16x1xf32>
    %cst_34 = arith.constant 3.200000e+01 : f32
    %62 = vector.broadcast %cst_34 : f32 to vector<16x1xf32>
    %63 = arith.divf %61, %62 : vector<16x1xf32>
    %64 = vector.broadcast %56 : vector<16x1xf32> to vector<16x32xf32>
    %65 = arith.subf %50, %64 : vector<16x32xf32>
    %cst_35 = arith.constant 9.99999974E-6 : f32
    %66 = vector.broadcast %cst_35 : f32 to vector<16x1xf32>
    %67 = arith.addf %63, %66 : vector<16x1xf32>
    %68 = math.rsqrt %67 : vector<16x1xf32>
    %69 = vector.broadcast %68 : vector<16x1xf32> to vector<16x32xf32>
    %70 = arith.mulf %65, %69 : vector<16x32xf32>
    %71 = vector.broadcast %51 : vector<1x32xf32> to vector<16x32xf32>
    %72 = arith.mulf %70, %71 : vector<16x32xf32>
    %73 = vector.broadcast %52 : vector<1x32xf32> to vector<16x32xf32>
    %74 = arith.addf %72, %73 : vector<16x32xf32>
    %c0_36 = arith.constant 0 : index
    %c0_37 = arith.constant 0 : index
    %75 = vector.load %arg11[%c0_36, %c0_37] : memref<32x96xbf16, #tpu.memory_space<vmem>>, vector<32x96xbf16>
    %76 = arith.truncf %74 : vector<16x32xf32> to vector<16x32xbf16>
    %cst_38 = arith.constant dense<0.000000e+00> : vector<16x96xf32>
    %77 = tpu.matmul %76, %75, %cst_38 {dimension_numbers = #tpu.dot_dimension_numbers<[1], [0], [0], [1], [0, 0, 1, 1], [], []>} : vector<16x32xbf16>, vector<32x96xbf16>, vector<16x96xf32> -> vector<16x96xf32>
    %c0_39 = arith.constant 0 : index
    %c0_40 = arith.constant 0 : index
    %78 = vector.load %arg12[%c0_39, %c0_40] : memref<1x96xf32, #tpu.memory_space<vmem>>, vector<1x96xf32>
    %79 = vector.broadcast %78 : vector<1x96xf32> to vector<16x96xf32>
    %80 = arith.addf %77, %79 : vector<16x96xf32>
    %81 = vector.extract_strided_slice %80 {offsets = [0, 0], sizes = [16, 32], strides = [1, 1]} : vector<16x96xf32> to vector<16x32xf32>
    %82 = vector.extract_strided_slice %80 {offsets = [0, 32], sizes = [16, 32], strides = [1, 1]} : vector<16x96xf32> to vector<16x32xf32>
    %83 = vector.extract_strided_slice %80 {offsets = [0, 64], sizes = [16, 32], strides = [1, 1]} : vector<16x96xf32> to vector<16x32xf32>
    %84 = arith.truncf %82 : vector<16x32xf32> to vector<16x32xbf16>
    %c0_41 = arith.constant 0 : index
    %c0_42 = arith.constant 0 : index
    %c0_43 = arith.constant 0 : index
    %85 = vector.load %arg22[%c0_41, %c0_42, %c0_43] : memref<1x16x64xbf16, #tpu.memory_space<vmem>>, vector<1x16x32xbf16>
    %86 = vector.shape_cast %85 : vector<1x16x32xbf16> to vector<16x32xbf16>
    %87 = vector.shape_cast %84 : vector<16x32xbf16> to vector<1x16x32xbf16>
    tpu.vector_store %arg22[%c0_41, %c0_42, %c0_43], %87 {strides = array<i32>} : memref<1x16x64xbf16, #tpu.memory_space<vmem>>, vector<1x16x32xbf16>,
    %88 = arith.truncf %83 : vector<16x32xf32> to vector<16x32xbf16>
    %c0_44 = arith.constant 0 : index
    %c0_45 = arith.constant 0 : index
    %c32 = arith.constant 32 : index
    %89 = vector.load %arg22[%c0_44, %c0_45, %c32] : memref<1x16x64xbf16, #tpu.memory_space<vmem>>, vector<1x16x32xbf16>
    %90 = vector.shape_cast %89 : vector<1x16x32xbf16> to vector<16x32xbf16>
    %91 = vector.shape_cast %88 : vector<16x32xbf16> to vector<1x16x32xbf16>
    tpu.vector_store %arg22[%c0_44, %c0_45, %c32], %91 {strides = array<i32>} : memref<1x16x64xbf16, #tpu.memory_space<vmem>>, vector<1x16x32xbf16>,
    %c0_46 = arith.constant 0 : index
    %c0_47 = arith.constant 0 : index
    %92 = vector.load %arg13[%c0_46, %c0_47] : memref<2x32xf32, #tpu.memory_space<vmem>>, vector<1x32xf32>
    %93 = vector.broadcast %92 : vector<1x32xf32> to vector<16x32xf32>
    %94 = arith.addf %81, %93 : vector<16x32xf32>
    %c1_48 = arith.constant 1 : index
    %c0_49 = arith.constant 0 : index
    %95 = vector.load %arg13[%c1_48, %c0_49] : memref<2x32xf32, #tpu.memory_space<vmem>>, vector<1x32xf32>
    %96 = vector.broadcast %95 : vector<1x32xf32> to vector<16x32xf32>
    %97 = arith.addf %81, %96 : vector<16x32xf32>
    %c0_50 = arith.constant 0 : index
    %c0_51 = arith.constant 0 : index
    %98 = vector.load %arg4[%c0_50, %c0_51] : memref<16x32xbf16, #tpu.memory_space<vmem>>, vector<16x32xbf16>
    %99 = vector.extract_strided_slice %94 {offsets = [0, 0], sizes = [16, 8], strides = [1, 1]} : vector<16x32xf32> to vector<16x8xf32>
    %100 = arith.truncf %99 : vector<16x8xf32> to vector<16x8xbf16>
    %c0_52 = arith.constant 0 : index
    %c0_53 = arith.constant 0 : index
    %c0_54 = arith.constant 0 : index
    %101 = vector.load %arg23[%c0_52, %c0_53, %c0_54] : memref<4x16x16xbf16, #tpu.memory_space<vmem>>, vector<1x16x8xbf16>
    %102 = vector.shape_cast %101 : vector<1x16x8xbf16> to vector<16x8xbf16>
    %103 = vector.shape_cast %100 : vector<16x8xbf16> to vector<1x16x8xbf16>
    tpu.vector_store %arg23[%c0_52, %c0_53, %c0_54], %103 {strides = array<i32>} : memref<4x16x16xbf16, #tpu.memory_space<vmem>>, vector<1x16x8xbf16>,
    %104 = vector.extract_strided_slice %97 {offsets = [0, 0], sizes = [16, 8], strides = [1, 1]} : vector<16x32xf32> to vector<16x8xf32>
    %105 = arith.truncf %104 : vector<16x8xf32> to vector<16x8xbf16>
    %c0_55 = arith.constant 0 : index
    %c0_56 = arith.constant 0 : index
    %c8 = arith.constant 8 : index
    %106 = vector.load %arg23[%c0_55, %c0_56, %c8] : memref<4x16x16xbf16, #tpu.memory_space<vmem>>, vector<1x16x8xbf16>
    %107 = vector.shape_cast %106 : vector<1x16x8xbf16> to vector<16x8xbf16>
    %108 = vector.shape_cast %105 : vector<16x8xbf16> to vector<1x16x8xbf16>
    tpu.vector_store %arg23[%c0_55, %c0_56, %c8], %108 {strides = array<i32>} : memref<4x16x16xbf16, #tpu.memory_space<vmem>>, vector<1x16x8xbf16>,
    %109 = vector.extract_strided_slice %82 {offsets = [0, 0], sizes = [16, 8], strides = [1, 1]} : vector<16x32xf32> to vector<16x8xf32>
    %110 = arith.truncf %109 : vector<16x8xf32> to vector<16x8xbf16>
    %c0_57 = arith.constant 0 : index
    %c0_58 = arith.constant 0 : index
    %c0_59 = arith.constant 0 : index
    %111 = vector.load %arg24[%c0_57, %c0_58, %c0_59] : memref<4x16x16xbf16, #tpu.memory_space<vmem>>, vector<1x16x8xbf16>
    %112 = vector.shape_cast %111 : vector<1x16x8xbf16> to vector<16x8xbf16>
    %113 = vector.shape_cast %110 : vector<16x8xbf16> to vector<1x16x8xbf16>
    tpu.vector_store %arg24[%c0_57, %c0_58, %c0_59], %113 {strides = array<i32>} : memref<4x16x16xbf16, #tpu.memory_space<vmem>>, vector<1x16x8xbf16>,
    %114 = vector.extract_strided_slice %98 {offsets = [0, 0], sizes = [16, 8], strides = [1, 1]} : vector<16x32xbf16> to vector<16x8xbf16>
    %c0_60 = arith.constant 0 : index
    %c0_61 = arith.constant 0 : index
    %c8_62 = arith.constant 8 : index
    %115 = vector.load %arg24[%c0_60, %c0_61, %c8_62] : memref<4x16x16xbf16, #tpu.memory_space<vmem>>, vector<1x16x8xbf16>
    %116 = vector.shape_cast %115 : vector<1x16x8xbf16> to vector<16x8xbf16>
    %117 = vector.shape_cast %114 : vector<16x8xbf16> to vector<1x16x8xbf16>
    tpu.vector_store %arg24[%c0_60, %c0_61, %c8_62], %117 {strides = array<i32>} : memref<4x16x16xbf16, #tpu.memory_space<vmem>>, vector<1x16x8xbf16>,
    %118 = vector.extract_strided_slice %83 {offsets = [0, 0], sizes = [16, 8], strides = [1, 1]} : vector<16x32xf32> to vector<16x8xf32>
    %119 = arith.truncf %118 : vector<16x8xf32> to vector<16x8xbf16>
    %c0_63 = arith.constant 0 : index
    %c0_64 = arith.constant 0 : index
    %c0_65 = arith.constant 0 : index
    %120 = vector.load %arg25[%c0_63, %c0_64, %c0_65] : memref<4x16x8xbf16, #tpu.memory_space<vmem>>, vector<1x16x8xbf16>
    %121 = vector.shape_cast %120 : vector<1x16x8xbf16> to vector<16x8xbf16>
    %122 = vector.shape_cast %119 : vector<16x8xbf16> to vector<1x16x8xbf16>
    tpu.vector_store %arg25[%c0_63, %c0_64, %c0_65], %122 {strides = array<i32>} : memref<4x16x8xbf16, #tpu.memory_space<vmem>>, vector<1x16x8xbf16>,
    %123 = vector.extract_strided_slice %94 {offsets = [0, 8], sizes = [16, 8], strides = [1, 1]} : vector<16x32xf32> to vector<16x8xf32>
    %124 = arith.truncf %123 : vector<16x8xf32> to vector<16x8xbf16>
    %c1_66 = arith.constant 1 : index
    %c0_67 = arith.constant 0 : index
    %c0_68 = arith.constant 0 : index
    %125 = vector.load %arg23[%c1_66, %c0_67, %c0_68] : memref<4x16x16xbf16, #tpu.memory_space<vmem>>, vector<1x16x8xbf16>
    %126 = vector.shape_cast %125 : vector<1x16x8xbf16> to vector<16x8xbf16>
    %127 = vector.shape_cast %124 : vector<16x8xbf16> to vector<1x16x8xbf16>
    tpu.vector_store %arg23[%c1_66, %c0_67, %c0_68], %127 {strides = array<i32>} : memref<4x16x16xbf16, #tpu.memory_space<vmem>>, vector<1x16x8xbf16>,
    %128 = vector.extract_strided_slice %97 {offsets = [0, 8], sizes = [16, 8], strides = [1, 1]} : vector<16x32xf32> to vector<16x8xf32>
    %129 = arith.truncf %128 : vector<16x8xf32> to vector<16x8xbf16>
    %c1_69 = arith.constant 1 : index
    %c0_70 = arith.constant 0 : index
    %c8_71 = arith.constant 8 : index
    %130 = vector.load %arg23[%c1_69, %c0_70, %c8_71] : memref<4x16x16xbf16, #tpu.memory_space<vmem>>, vector<1x16x8xbf16>
    %131 = vector.shape_cast %130 : vector<1x16x8xbf16> to vector<16x8xbf16>
    %132 = vector.shape_cast %129 : vector<16x8xbf16> to vector<1x16x8xbf16>
    tpu.vector_store %arg23[%c1_69, %c0_70, %c8_71], %132 {strides = array<i32>} : memref<4x16x16xbf16, #tpu.memory_space<vmem>>, vector<1x16x8xbf16>,
    %133 = vector.extract_strided_slice %82 {offsets = [0, 8], sizes = [16, 8], strides = [1, 1]} : vector<16x32xf32> to vector<16x8xf32>
    %134 = arith.truncf %133 : vector<16x8xf32> to vector<16x8xbf16>
    %c1_72 = arith.constant 1 : index
    %c0_73 = arith.constant 0 : index
    %c0_74 = arith.constant 0 : index
    %135 = vector.load %arg24[%c1_72, %c0_73, %c0_74] : memref<4x16x16xbf16, #tpu.memory_space<vmem>>, vector<1x16x8xbf16>
    %136 = vector.shape_cast %135 : vector<1x16x8xbf16> to vector<16x8xbf16>
    %137 = vector.shape_cast %134 : vector<16x8xbf16> to vector<1x16x8xbf16>
    tpu.vector_store %arg24[%c1_72, %c0_73, %c0_74], %137 {strides = array<i32>} : memref<4x16x16xbf16, #tpu.memory_space<vmem>>, vector<1x16x8xbf16>,
    %138 = vector.extract_strided_slice %98 {offsets = [0, 8], sizes = [16, 8], strides = [1, 1]} : vector<16x32xbf16> to vector<16x8xbf16>
    %c1_75 = arith.constant 1 : index
    %c0_76 = arith.constant 0 : index
    %c8_77 = arith.constant 8 : index
    %139 = vector.load %arg24[%c1_75, %c0_76, %c8_77] : memref<4x16x16xbf16, #tpu.memory_space<vmem>>, vector<1x16x8xbf16>
    %140 = vector.shape_cast %139 : vector<1x16x8xbf16> to vector<16x8xbf16>
    %141 = vector.shape_cast %138 : vector<16x8xbf16> to vector<1x16x8xbf16>
    tpu.vector_store %arg24[%c1_75, %c0_76, %c8_77], %141 {strides = array<i32>} : memref<4x16x16xbf16, #tpu.memory_space<vmem>>, vector<1x16x8xbf16>,
    %142 = vector.extract_strided_slice %83 {offsets = [0, 8], sizes = [16, 8], strides = [1, 1]} : vector<16x32xf32> to vector<16x8xf32>
    %143 = arith.truncf %142 : vector<16x8xf32> to vector<16x8xbf16>
    %c1_78 = arith.constant 1 : index
    %c0_79 = arith.constant 0 : index
    %c0_80 = arith.constant 0 : index
    %144 = vector.load %arg25[%c1_78, %c0_79, %c0_80] : memref<4x16x8xbf16, #tpu.memory_space<vmem>>, vector<1x16x8xbf16>
    %145 = vector.shape_cast %144 : vector<1x16x8xbf16> to vector<16x8xbf16>
    %146 = vector.shape_cast %143 : vector<16x8xbf16> to vector<1x16x8xbf16>
    tpu.vector_store %arg25[%c1_78, %c0_79, %c0_80], %146 {strides = array<i32>} : memref<4x16x8xbf16, #tpu.memory_space<vmem>>, vector<1x16x8xbf16>,
    %147 = vector.extract_strided_slice %94 {offsets = [0, 16], sizes = [16, 8], strides = [1, 1]} : vector<16x32xf32> to vector<16x8xf32>
    %148 = arith.truncf %147 : vector<16x8xf32> to vector<16x8xbf16>
    %c2 = arith.constant 2 : index
    %c0_81 = arith.constant 0 : index
    %c0_82 = arith.constant 0 : index
    %149 = vector.load %arg23[%c2, %c0_81, %c0_82] : memref<4x16x16xbf16, #tpu.memory_space<vmem>>, vector<1x16x8xbf16>
    %150 = vector.shape_cast %149 : vector<1x16x8xbf16> to vector<16x8xbf16>
    %151 = vector.shape_cast %148 : vector<16x8xbf16> to vector<1x16x8xbf16>
    tpu.vector_store %arg23[%c2, %c0_81, %c0_82], %151 {strides = array<i32>} : memref<4x16x16xbf16, #tpu.memory_space<vmem>>, vector<1x16x8xbf16>,
    %152 = vector.extract_strided_slice %97 {offsets = [0, 16], sizes = [16, 8], strides = [1, 1]} : vector<16x32xf32> to vector<16x8xf32>
    %153 = arith.truncf %152 : vector<16x8xf32> to vector<16x8xbf16>
    %c2_83 = arith.constant 2 : index
    %c0_84 = arith.constant 0 : index
    %c8_85 = arith.constant 8 : index
    %154 = vector.load %arg23[%c2_83, %c0_84, %c8_85] : memref<4x16x16xbf16, #tpu.memory_space<vmem>>, vector<1x16x8xbf16>
    %155 = vector.shape_cast %154 : vector<1x16x8xbf16> to vector<16x8xbf16>
    %156 = vector.shape_cast %153 : vector<16x8xbf16> to vector<1x16x8xbf16>
    tpu.vector_store %arg23[%c2_83, %c0_84, %c8_85], %156 {strides = array<i32>} : memref<4x16x16xbf16, #tpu.memory_space<vmem>>, vector<1x16x8xbf16>,
    %157 = vector.extract_strided_slice %82 {offsets = [0, 16], sizes = [16, 8], strides = [1, 1]} : vector<16x32xf32> to vector<16x8xf32>
    %158 = arith.truncf %157 : vector<16x8xf32> to vector<16x8xbf16>
    %c2_86 = arith.constant 2 : index
    %c0_87 = arith.constant 0 : index
    %c0_88 = arith.constant 0 : index
    %159 = vector.load %arg24[%c2_86, %c0_87, %c0_88] : memref<4x16x16xbf16, #tpu.memory_space<vmem>>, vector<1x16x8xbf16>
    %160 = vector.shape_cast %159 : vector<1x16x8xbf16> to vector<16x8xbf16>
    %161 = vector.shape_cast %158 : vector<16x8xbf16> to vector<1x16x8xbf16>
    tpu.vector_store %arg24[%c2_86, %c0_87, %c0_88], %161 {strides = array<i32>} : memref<4x16x16xbf16, #tpu.memory_space<vmem>>, vector<1x16x8xbf16>,
    %162 = vector.extract_strided_slice %98 {offsets = [0, 16], sizes = [16, 8], strides = [1, 1]} : vector<16x32xbf16> to vector<16x8xbf16>
    %c2_89 = arith.constant 2 : index
    %c0_90 = arith.constant 0 : index
    %c8_91 = arith.constant 8 : index
    %163 = vector.load %arg24[%c2_89, %c0_90, %c8_91] : memref<4x16x16xbf16, #tpu.memory_space<vmem>>, vector<1x16x8xbf16>
    %164 = vector.shape_cast %163 : vector<1x16x8xbf16> to vector<16x8xbf16>
    %165 = vector.shape_cast %162 : vector<16x8xbf16> to vector<1x16x8xbf16>
    tpu.vector_store %arg24[%c2_89, %c0_90, %c8_91], %165 {strides = array<i32>} : memref<4x16x16xbf16, #tpu.memory_space<vmem>>, vector<1x16x8xbf16>,
    %166 = vector.extract_strided_slice %83 {offsets = [0, 16], sizes = [16, 8], strides = [1, 1]} : vector<16x32xf32> to vector<16x8xf32>
    %167 = arith.truncf %166 : vector<16x8xf32> to vector<16x8xbf16>
    %c2_92 = arith.constant 2 : index
    %c0_93 = arith.constant 0 : index
    %c0_94 = arith.constant 0 : index
    %168 = vector.load %arg25[%c2_92, %c0_93, %c0_94] : memref<4x16x8xbf16, #tpu.memory_space<vmem>>, vector<1x16x8xbf16>
    %169 = vector.shape_cast %168 : vector<1x16x8xbf16> to vector<16x8xbf16>
    %170 = vector.shape_cast %167 : vector<16x8xbf16> to vector<1x16x8xbf16>
    tpu.vector_store %arg25[%c2_92, %c0_93, %c0_94], %170 {strides = array<i32>} : memref<4x16x8xbf16, #tpu.memory_space<vmem>>, vector<1x16x8xbf16>,
    %171 = vector.extract_strided_slice %94 {offsets = [0, 24], sizes = [16, 8], strides = [1, 1]} : vector<16x32xf32> to vector<16x8xf32>
    %172 = arith.truncf %171 : vector<16x8xf32> to vector<16x8xbf16>
    %c3 = arith.constant 3 : index
    %c0_95 = arith.constant 0 : index
    %c0_96 = arith.constant 0 : index
    %173 = vector.load %arg23[%c3, %c0_95, %c0_96] : memref<4x16x16xbf16, #tpu.memory_space<vmem>>, vector<1x16x8xbf16>
    %174 = vector.shape_cast %173 : vector<1x16x8xbf16> to vector<16x8xbf16>
    %175 = vector.shape_cast %172 : vector<16x8xbf16> to vector<1x16x8xbf16>
    tpu.vector_store %arg23[%c3, %c0_95, %c0_96], %175 {strides = array<i32>} : memref<4x16x16xbf16, #tpu.memory_space<vmem>>, vector<1x16x8xbf16>,
    %176 = vector.extract_strided_slice %97 {offsets = [0, 24], sizes = [16, 8], strides = [1, 1]} : vector<16x32xf32> to vector<16x8xf32>
    %177 = arith.truncf %176 : vector<16x8xf32> to vector<16x8xbf16>
    %c3_97 = arith.constant 3 : index
    %c0_98 = arith.constant 0 : index
    %c8_99 = arith.constant 8 : index
    %178 = vector.load %arg23[%c3_97, %c0_98, %c8_99] : memref<4x16x16xbf16, #tpu.memory_space<vmem>>, vector<1x16x8xbf16>
    %179 = vector.shape_cast %178 : vector<1x16x8xbf16> to vector<16x8xbf16>
    %180 = vector.shape_cast %177 : vector<16x8xbf16> to vector<1x16x8xbf16>
    tpu.vector_store %arg23[%c3_97, %c0_98, %c8_99], %180 {strides = array<i32>} : memref<4x16x16xbf16, #tpu.memory_space<vmem>>, vector<1x16x8xbf16>,
    %181 = vector.extract_strided_slice %82 {offsets = [0, 24], sizes = [16, 8], strides = [1, 1]} : vector<16x32xf32> to vector<16x8xf32>
    %182 = arith.truncf %181 : vector<16x8xf32> to vector<16x8xbf16>
    %c3_100 = arith.constant 3 : index
    %c0_101 = arith.constant 0 : index
    %c0_102 = arith.constant 0 : index
    %183 = vector.load %arg24[%c3_100, %c0_101, %c0_102] : memref<4x16x16xbf16, #tpu.memory_space<vmem>>, vector<1x16x8xbf16>
    %184 = vector.shape_cast %183 : vector<1x16x8xbf16> to vector<16x8xbf16>
    %185 = vector.shape_cast %182 : vector<16x8xbf16> to vector<1x16x8xbf16>
    tpu.vector_store %arg24[%c3_100, %c0_101, %c0_102], %185 {strides = array<i32>} : memref<4x16x16xbf16, #tpu.memory_space<vmem>>, vector<1x16x8xbf16>,
    %186 = vector.extract_strided_slice %98 {offsets = [0, 24], sizes = [16, 8], strides = [1, 1]} : vector<16x32xbf16> to vector<16x8xbf16>
    %c3_103 = arith.constant 3 : index
    %c0_104 = arith.constant 0 : index
    %c8_105 = arith.constant 8 : index
    %187 = vector.load %arg24[%c3_103, %c0_104, %c8_105] : memref<4x16x16xbf16, #tpu.memory_space<vmem>>, vector<1x16x8xbf16>
    %188 = vector.shape_cast %187 : vector<1x16x8xbf16> to vector<16x8xbf16>
    %189 = vector.shape_cast %186 : vector<16x8xbf16> to vector<1x16x8xbf16>
    tpu.vector_store %arg24[%c3_103, %c0_104, %c8_105], %189 {strides = array<i32>} : memref<4x16x16xbf16, #tpu.memory_space<vmem>>, vector<1x16x8xbf16>,
    %190 = vector.extract_strided_slice %83 {offsets = [0, 24], sizes = [16, 8], strides = [1, 1]} : vector<16x32xf32> to vector<16x8xf32>
    %191 = arith.truncf %190 : vector<16x8xf32> to vector<16x8xbf16>
    %c3_106 = arith.constant 3 : index
    %c0_107 = arith.constant 0 : index
    %c0_108 = arith.constant 0 : index
    %192 = vector.load %arg25[%c3_106, %c0_107, %c0_108] : memref<4x16x8xbf16, #tpu.memory_space<vmem>>, vector<1x16x8xbf16>
    %193 = vector.shape_cast %192 : vector<1x16x8xbf16> to vector<16x8xbf16>
    %194 = vector.shape_cast %191 : vector<16x8xbf16> to vector<1x16x8xbf16>
    tpu.vector_store %arg25[%c3_106, %c0_107, %c0_108], %194 {strides = array<i32>} : memref<4x16x8xbf16, #tpu.memory_space<vmem>>, vector<1x16x8xbf16>,
    %cst_109 = arith.constant 0.000000e+00 : f32
    %195 = vector.broadcast %cst_109 : f32 to vector<16x32xf32>
    %c0_i32 = arith.constant 0 : i32
    %c4_i32 = arith.constant 4 : i32
    %196 = arith.addi %c0_i32, %c4_i32 : i32
    %c1_i32 = arith.constant 1 : i32
    %197 = scf.for %arg27 = %c0_i32 to %196 step %c1_i32 iter_args(%arg28 = %195) -> (vector<16x32xf32>)  : i32 {
      %397 = arith.index_cast %arg27 : i32 to index
      %c0_207 = arith.constant 0 : index
      %c0_208 = arith.constant 0 : index
      %398 = vector.load %arg23[%397, %c0_207, %c0_208] : memref<4x16x16xbf16, #tpu.memory_space<vmem>>, vector<1x16x16xbf16>
      %399 = vector.shape_cast %398 : vector<1x16x16xbf16> to vector<16x16xbf16>
      %400 = arith.index_cast %arg27 : i32 to index
      %c0_209 = arith.constant 0 : index
      %c0_210 = arith.constant 0 : index
      %401 = vector.load %arg24[%400, %c0_209, %c0_210] : memref<4x16x16xbf16, #tpu.memory_space<vmem>>, vector<1x16x16xbf16>
      %402 = vector.shape_cast %401 : vector<1x16x16xbf16> to vector<16x16xbf16>
      %cst_211 = arith.constant dense<0.000000e+00> : vector<16x16xf32>
      %403 = tpu.matmul %399, %402, %cst_211 {dimension_numbers = #tpu.dot_dimension_numbers<[1], [1], [0], [0], [0, 0, 1, 0], [], []>} : vector<16x16xbf16>, vector<16x16xbf16>, vector<16x16xf32> -> vector<16x16xf32>
      %404 = vector.broadcast %3 : vector<1x16xf32> to vector<16x16xf32>
      %405 = arith.addf %403, %404 : vector<16x16xf32>
      %cst_212 = arith.constant dense<0xFF800000> : vector<16xf32>
      %406 = vector.multi_reduction <maximumf>, %405, %cst_212 [1] : vector<16x16xf32> to vector<16xf32>
      %407 = vector.shape_cast %406 : vector<16xf32> to vector<16x1xf32>
      %408 = vector.broadcast %407 : vector<16x1xf32> to vector<16x16xf32>
      %409 = arith.subf %405, %408 : vector<16x16xf32>
      %410 = math.exp %409 : vector<16x16xf32>
      %cst_213 = arith.constant dense<0.000000e+00> : vector<16xf32>
      %411 = vector.multi_reduction <add>, %410, %cst_213 [1] : vector<16x16xf32> to vector<16xf32>
      %412 = vector.shape_cast %411 : vector<16xf32> to vector<16x1xf32>
      %413 = tpu.reciprocal %412 {approx = true} : vector<16x1xf32> -> vector<16x1xf32>
      %414 = vector.broadcast %413 : vector<16x1xf32> to vector<16x16xf32>
      %415 = arith.mulf %410, %414 : vector<16x16xf32>
      %416 = arith.index_cast %arg27 : i32 to index
      %c0_214 = arith.constant 0 : index
      %c0_215 = arith.constant 0 : index
      %417 = vector.load %arg25[%416, %c0_214, %c0_215] : memref<4x16x8xbf16, #tpu.memory_space<vmem>>, vector<1x16x8xbf16>
      %418 = vector.shape_cast %417 : vector<1x16x8xbf16> to vector<16x8xbf16>
      %419 = arith.truncf %415 : vector<16x16xf32> to vector<16x16xbf16>
      %cst_216 = arith.constant dense<0.000000e+00> : vector<16x8xf32>
      %420 = tpu.matmul %419, %418, %cst_216 {dimension_numbers = #tpu.dot_dimension_numbers<[1], [0], [0], [1], [0, 0, 1, 1], [], []>} : vector<16x16xbf16>, vector<16x8xbf16>, vector<16x8xf32> -> vector<16x8xf32>
      %421 = arith.index_cast %arg27 : i32 to index
      %c0_217 = arith.constant 0 : index
      %c0_218 = arith.constant 0 : index
      %422 = vector.load %arg14[%421, %c0_217, %c0_218] : memref<4x8x32xbf16, #tpu.memory_space<vmem>>, vector<1x8x32xbf16>
      %423 = vector.shape_cast %422 : vector<1x8x32xbf16> to vector<8x32xbf16>
      %424 = arith.truncf %420 : vector<16x8xf32> to vector<16x8xbf16>
      %cst_219 = arith.constant dense<0.000000e+00> : vector<16x32xf32>
      %425 = tpu.matmul %424, %423, %cst_219 {dimension_numbers = #tpu.dot_dimension_numbers<[1], [0], [0], [1], [0, 0, 1, 1], [], []>} : vector<16x8xbf16>, vector<8x32xbf16>, vector<16x32xf32> -> vector<16x32xf32>
      %426 = arith.addf %arg28, %425 : vector<16x32xf32>
      scf.yield %426 : vector<16x32xf32>
    }
    %c4_i32_110 = arith.constant 4 : i32
    %198 = arith.addf %50, %197 : vector<16x32xf32>
    %c1_111 = arith.constant 1 : index
    %c0_112 = arith.constant 0 : index
    %199 = vector.load %arg10[%c1_111, %c0_112] : memref<5x32xf32, #tpu.memory_space<vmem>>, vector<1x32xf32>
    %200 = vector.broadcast %199 : vector<1x32xf32> to vector<16x32xf32>
    %201 = arith.addf %198, %200 : vector<16x32xf32>
    %c2_113 = arith.constant 2 : index
    %c0_114 = arith.constant 0 : index
    %202 = vector.load %arg5[%c2_113, %c0_114] : memref<6x32xf32, #tpu.memory_space<vmem>>, vector<1x32xf32>
    %c2_115 = arith.constant 2 : index
    %c0_116 = arith.constant 0 : index
    %203 = vector.load %arg6[%c2_115, %c0_116] : memref<6x32xf32, #tpu.memory_space<vmem>>, vector<1x32xf32>
    %cst_117 = arith.constant dense<0.000000e+00> : vector<16xf32>
    %204 = vector.multi_reduction <add>, %201, %cst_117 [1] : vector<16x32xf32> to vector<16xf32>
    %205 = vector.shape_cast %204 : vector<16xf32> to vector<16x1xf32>
    %cst_118 = arith.constant 3.200000e+01 : f32
    %206 = vector.broadcast %cst_118 : f32 to vector<16x1xf32>
    %207 = arith.divf %205, %206 : vector<16x1xf32>
    %208 = vector.broadcast %207 : vector<16x1xf32> to vector<16x32xf32>
    %209 = arith.subf %201, %208 : vector<16x32xf32>
    %210 = arith.mulf %209, %209 : vector<16x32xf32>
    %cst_119 = arith.constant dense<0.000000e+00> : vector<16xf32>
    %211 = vector.multi_reduction <add>, %210, %cst_119 [1] : vector<16x32xf32> to vector<16xf32>
    %212 = vector.shape_cast %211 : vector<16xf32> to vector<16x1xf32>
    %cst_120 = arith.constant 3.200000e+01 : f32
    %213 = vector.broadcast %cst_120 : f32 to vector<16x1xf32>
    %214 = arith.divf %212, %213 : vector<16x1xf32>
    %215 = vector.broadcast %207 : vector<16x1xf32> to vector<16x32xf32>
    %216 = arith.subf %201, %215 : vector<16x32xf32>
    %cst_121 = arith.constant 9.99999974E-6 : f32
    %217 = vector.broadcast %cst_121 : f32 to vector<16x1xf32>
    %218 = arith.addf %214, %217 : vector<16x1xf32>
    %219 = math.rsqrt %218 : vector<16x1xf32>
    %220 = vector.broadcast %219 : vector<16x1xf32> to vector<16x32xf32>
    %221 = arith.mulf %216, %220 : vector<16x32xf32>
    %222 = vector.broadcast %202 : vector<1x32xf32> to vector<16x32xf32>
    %223 = arith.mulf %221, %222 : vector<16x32xf32>
    %224 = vector.broadcast %203 : vector<1x32xf32> to vector<16x32xf32>
    %225 = arith.addf %223, %224 : vector<16x32xf32>
    %226 = vector.broadcast %5 : vector<16x1xf32> to vector<16x32xf32>
    %227 = arith.mulf %225, %226 : vector<16x32xf32>
    %c0_122 = arith.constant 0 : index
    %c0_123 = arith.constant 0 : index
    %228 = vector.load %arg15[%c0_122, %c0_123] : memref<32x64xbf16, #tpu.memory_space<vmem>>, vector<32x64xbf16>
    %229 = arith.truncf %227 : vector<16x32xf32> to vector<16x32xbf16>
    %cst_124 = arith.constant dense<0.000000e+00> : vector<16x64xf32>
    %230 = tpu.matmul %229, %228, %cst_124 {dimension_numbers = #tpu.dot_dimension_numbers<[1], [0], [0], [1], [0, 0, 1, 1], [], []>} : vector<16x32xbf16>, vector<32x64xbf16>, vector<16x64xf32> -> vector<16x64xf32>
    %c0_125 = arith.constant 0 : index
    %c0_126 = arith.constant 0 : index
    %231 = vector.load %arg16[%c0_125, %c0_126] : memref<1x64xf32, #tpu.memory_space<vmem>>, vector<1x64xf32>
    %232 = vector.broadcast %231 : vector<1x64xf32> to vector<16x64xf32>
    %233 = arith.addf %230, %232 : vector<16x64xf32>
    %234 = vector.extract_strided_slice %233 {offsets = [0, 0], sizes = [16, 32], strides = [1, 1]} : vector<16x64xf32> to vector<16x32xf32>
    %235 = vector.extract_strided_slice %233 {offsets = [0, 32], sizes = [16, 32], strides = [1, 1]} : vector<16x64xf32> to vector<16x32xf32>
    %236 = arith.negf %235 : vector<16x32xf32>
    %237 = math.exp %236 : vector<16x32xf32>
    %cst_127 = arith.constant 1.000000e+00 : f32
    %238 = vector.broadcast %cst_127 : f32 to vector<16x32xf32>
    %239 = arith.addf %238, %237 : vector<16x32xf32>
    %240 = arith.divf %238, %239 : vector<16x32xf32>
    %241 = arith.mulf %234, %240 : vector<16x32xf32>
    %cst_128 = arith.constant 0.000000e+00 : f32
    %242 = vector.broadcast %cst_128 : f32 to vector<8x32xf32>
    %c0_129 = arith.constant 0 : index
    %c0_130 = arith.constant 0 : index
    %243 = vector.load %arg26[%c0_129, %c0_130] : memref<32x32xf32, #tpu.memory_space<vmem>>, vector<8x32xf32>
    tpu.vector_store %arg26[%c0_129, %c0_130], %242 {strides = array<i32>} : memref<32x32xf32, #tpu.memory_space<vmem>>, vector<8x32xf32>,
    %cst_131 = arith.constant 0.000000e+00 : f32
    %244 = vector.broadcast %cst_131 : f32 to vector<8x32xf32>
    %c24 = arith.constant 24 : index
    %c0_132 = arith.constant 0 : index
    %245 = vector.load %arg26[%c24, %c0_132] : memref<32x32xf32, #tpu.memory_space<vmem>>, vector<8x32xf32>
    tpu.vector_store %arg26[%c24, %c0_132], %244 {strides = array<i32>} : memref<32x32xf32, #tpu.memory_space<vmem>>, vector<8x32xf32>,
    %c8_133 = arith.constant 8 : index
    %c0_134 = arith.constant 0 : index
    %246 = vector.load %arg26[%c8_133, %c0_134] : memref<32x32xf32, #tpu.memory_space<vmem>>, vector<16x32xf32>
    tpu.vector_store %arg26[%c8_133, %c0_134], %241 {strides = array<i32>} : memref<32x32xf32, #tpu.memory_space<vmem>>, vector<16x32xf32>,
    %cst_135 = arith.constant 0.000000e+00 : f32
    %247 = vector.broadcast %cst_135 : f32 to vector<16x32xf32>
    %c2_136 = arith.constant 2 : index
    %c0_137 = arith.constant 0 : index
    %248 = vector.load %arg10[%c2_136, %c0_137] : memref<5x32xf32, #tpu.memory_space<vmem>>, vector<1x32xf32>
    %249 = vector.broadcast %248 : vector<1x32xf32> to vector<16x32xf32>
    %250 = arith.addf %247, %249 : vector<16x32xf32>
    %c5 = arith.constant 5 : index
    %c0_138 = arith.constant 0 : index
    %251 = vector.load %arg26[%c5, %c0_138] : memref<32x32xf32, #tpu.memory_space<vmem>>, vector<16x32xf32>
    %c0_139 = arith.constant 0 : index
    %c0_140 = arith.constant 0 : index
    %252 = vector.load %arg17[%c0_139, %c0_140] : memref<7x32xf32, #tpu.memory_space<vmem>>, vector<1x32xf32>
    %253 = vector.broadcast %252 : vector<1x32xf32> to vector<16x32xf32>
    %254 = arith.mulf %251, %253 : vector<16x32xf32>
    %255 = arith.addf %250, %254 : vector<16x32xf32>
    %c6 = arith.constant 6 : index
    %c0_141 = arith.constant 0 : index
    %256 = vector.load %arg26[%c6, %c0_141] : memref<32x32xf32, #tpu.memory_space<vmem>>, vector<16x32xf32>
    %c1_142 = arith.constant 1 : index
    %c0_143 = arith.constant 0 : index
    %257 = vector.load %arg17[%c1_142, %c0_143] : memref<7x32xf32, #tpu.memory_space<vmem>>, vector<1x32xf32>
    %258 = vector.broadcast %257 : vector<1x32xf32> to vector<16x32xf32>
    %259 = arith.mulf %256, %258 : vector<16x32xf32>
    %260 = arith.addf %255, %259 : vector<16x32xf32>
    %c7 = arith.constant 7 : index
    %c0_144 = arith.constant 0 : index
    %261 = vector.load %arg26[%c7, %c0_144] : memref<32x32xf32, #tpu.memory_space<vmem>>, vector<16x32xf32>
    %c2_145 = arith.constant 2 : index
    %c0_146 = arith.constant 0 : index
    %262 = vector.load %arg17[%c2_145, %c0_146] : memref<7x32xf32, #tpu.memory_space<vmem>>, vector<1x32xf32>
    %263 = vector.broadcast %262 : vector<1x32xf32> to vector<16x32xf32>
    %264 = arith.mulf %261, %263 : vector<16x32xf32>
    %265 = arith.addf %260, %264 : vector<16x32xf32>
    %c8_147 = arith.constant 8 : index
    %c0_148 = arith.constant 0 : index
    %266 = vector.load %arg26[%c8_147, %c0_148] : memref<32x32xf32, #tpu.memory_space<vmem>>, vector<16x32xf32>
    %c3_149 = arith.constant 3 : index
    %c0_150 = arith.constant 0 : index
    %267 = vector.load %arg17[%c3_149, %c0_150] : memref<7x32xf32, #tpu.memory_space<vmem>>, vector<1x32xf32>
    %268 = vector.broadcast %267 : vector<1x32xf32> to vector<16x32xf32>
    %269 = arith.mulf %266, %268 : vector<16x32xf32>
    %270 = arith.addf %265, %269 : vector<16x32xf32>
    %c9 = arith.constant 9 : index
    %c0_151 = arith.constant 0 : index
    %271 = vector.load %arg26[%c9, %c0_151] : memref<32x32xf32, #tpu.memory_space<vmem>>, vector<16x32xf32>
    %c4 = arith.constant 4 : index
    %c0_152 = arith.constant 0 : index
    %272 = vector.load %arg17[%c4, %c0_152] : memref<7x32xf32, #tpu.memory_space<vmem>>, vector<1x32xf32>
    %273 = vector.broadcast %272 : vector<1x32xf32> to vector<16x32xf32>
    %274 = arith.mulf %271, %273 : vector<16x32xf32>
    %275 = arith.addf %270, %274 : vector<16x32xf32>
    %c10 = arith.constant 10 : index
    %c0_153 = arith.constant 0 : index
    %276 = vector.load %arg26[%c10, %c0_153] : memref<32x32xf32, #tpu.memory_space<vmem>>, vector<16x32xf32>
    %c5_154 = arith.constant 5 : index
    %c0_155 = arith.constant 0 : index
    %277 = vector.load %arg17[%c5_154, %c0_155] : memref<7x32xf32, #tpu.memory_space<vmem>>, vector<1x32xf32>
    %278 = vector.broadcast %277 : vector<1x32xf32> to vector<16x32xf32>
    %279 = arith.mulf %276, %278 : vector<16x32xf32>
    %280 = arith.addf %275, %279 : vector<16x32xf32>
    %c11 = arith.constant 11 : index
    %c0_156 = arith.constant 0 : index
    %281 = vector.load %arg26[%c11, %c0_156] : memref<32x32xf32, #tpu.memory_space<vmem>>, vector<16x32xf32>
    %c6_157 = arith.constant 6 : index
    %c0_158 = arith.constant 0 : index
    %282 = vector.load %arg17[%c6_157, %c0_158] : memref<7x32xf32, #tpu.memory_space<vmem>>, vector<1x32xf32>
    %283 = vector.broadcast %282 : vector<1x32xf32> to vector<16x32xf32>
    %284 = arith.mulf %281, %283 : vector<16x32xf32>
    %285 = arith.addf %280, %284 : vector<16x32xf32>
    %c5_159 = arith.constant 5 : index
    %c0_160 = arith.constant 0 : index
    %286 = vector.load %arg5[%c5_159, %c0_160] : memref<6x32xf32, #tpu.memory_space<vmem>>, vector<1x32xf32>
    %c5_161 = arith.constant 5 : index
    %c0_162 = arith.constant 0 : index
    %287 = vector.load %arg6[%c5_161, %c0_162] : memref<6x32xf32, #tpu.memory_space<vmem>>, vector<1x32xf32>
    %cst_163 = arith.constant dense<0.000000e+00> : vector<16xf32>
    %288 = vector.multi_reduction <add>, %285, %cst_163 [1] : vector<16x32xf32> to vector<16xf32>
    %289 = vector.shape_cast %288 : vector<16xf32> to vector<16x1xf32>
    %cst_164 = arith.constant 3.200000e+01 : f32
    %290 = vector.broadcast %cst_164 : f32 to vector<16x1xf32>
    %291 = arith.divf %289, %290 : vector<16x1xf32>
    %292 = vector.broadcast %291 : vector<16x1xf32> to vector<16x32xf32>
    %293 = arith.subf %285, %292 : vector<16x32xf32>
    %294 = arith.mulf %293, %293 : vector<16x32xf32>
    %cst_165 = arith.constant dense<0.000000e+00> : vector<16xf32>
    %295 = vector.multi_reduction <add>, %294, %cst_165 [1] : vector<16x32xf32> to vector<16xf32>
    %296 = vector.shape_cast %295 : vector<16xf32> to vector<16x1xf32>
    %cst_166 = arith.constant 3.200000e+01 : f32
    %297 = vector.broadcast %cst_166 : f32 to vector<16x1xf32>
    %298 = arith.divf %296, %297 : vector<16x1xf32>
    %299 = vector.broadcast %291 : vector<16x1xf32> to vector<16x32xf32>
    %300 = arith.subf %285, %299 : vector<16x32xf32>
    %cst_167 = arith.constant 9.99999974E-6 : f32
    %301 = vector.broadcast %cst_167 : f32 to vector<16x1xf32>
    %302 = arith.addf %298, %301 : vector<16x1xf32>
    %303 = math.rsqrt %302 : vector<16x1xf32>
    %304 = vector.broadcast %303 : vector<16x1xf32> to vector<16x32xf32>
    %305 = arith.mulf %300, %304 : vector<16x32xf32>
    %306 = vector.broadcast %286 : vector<1x32xf32> to vector<16x32xf32>
    %307 = arith.mulf %305, %306 : vector<16x32xf32>
    %308 = vector.broadcast %287 : vector<1x32xf32> to vector<16x32xf32>
    %309 = arith.addf %307, %308 : vector<16x32xf32>
    %310 = arith.negf %309 : vector<16x32xf32>
    %311 = math.exp %310 : vector<16x32xf32>
    %cst_168 = arith.constant 1.000000e+00 : f32
    %312 = vector.broadcast %cst_168 : f32 to vector<16x32xf32>
    %313 = arith.addf %312, %311 : vector<16x32xf32>
    %314 = arith.divf %312, %313 : vector<16x32xf32>
    %315 = arith.mulf %309, %314 : vector<16x32xf32>
    %c0_169 = arith.constant 0 : index
    %c0_170 = arith.constant 0 : index
    %316 = vector.load %arg18[%c0_169, %c0_170] : memref<32x32xbf16, #tpu.memory_space<vmem>>, vector<32x32xbf16>
    %317 = arith.truncf %315 : vector<16x32xf32> to vector<16x32xbf16>
    %cst_171 = arith.constant dense<0.000000e+00> : vector<16x32xf32>
    %318 = tpu.matmul %317, %316, %cst_171 {dimension_numbers = #tpu.dot_dimension_numbers<[1], [0], [0], [1], [0, 0, 1, 1], [], []>} : vector<16x32xbf16>, vector<32x32xbf16>, vector<16x32xf32> -> vector<16x32xf32>
    %c3_172 = arith.constant 3 : index
    %c0_173 = arith.constant 0 : index
    %319 = vector.load %arg10[%c3_172, %c0_173] : memref<5x32xf32, #tpu.memory_space<vmem>>, vector<1x32xf32>
    %320 = vector.broadcast %319 : vector<1x32xf32> to vector<16x32xf32>
    %321 = arith.addf %318, %320 : vector<16x32xf32>
    %322 = vector.broadcast %5 : vector<16x1xf32> to vector<16x32xf32>
    %323 = arith.mulf %321, %322 : vector<16x32xf32>
    %324 = arith.addf %201, %323 : vector<16x32xf32>
    %c3_174 = arith.constant 3 : index
    %c0_175 = arith.constant 0 : index
    %325 = vector.load %arg5[%c3_174, %c0_175] : memref<6x32xf32, #tpu.memory_space<vmem>>, vector<1x32xf32>
    %c3_176 = arith.constant 3 : index
    %c0_177 = arith.constant 0 : index
    %326 = vector.load %arg6[%c3_176, %c0_177] : memref<6x32xf32, #tpu.memory_space<vmem>>, vector<1x32xf32>
    %cst_178 = arith.constant dense<0.000000e+00> : vector<16xf32>
    %327 = vector.multi_reduction <add>, %324, %cst_178 [1] : vector<16x32xf32> to vector<16xf32>
    %328 = vector.shape_cast %327 : vector<16xf32> to vector<16x1xf32>
    %cst_179 = arith.constant 3.200000e+01 : f32
    %329 = vector.broadcast %cst_179 : f32 to vector<16x1xf32>
    %330 = arith.divf %328, %329 : vector<16x1xf32>
    %331 = vector.broadcast %330 : vector<16x1xf32> to vector<16x32xf32>
    %332 = arith.subf %324, %331 : vector<16x32xf32>
    %333 = arith.mulf %332, %332 : vector<16x32xf32>
    %cst_180 = arith.constant dense<0.000000e+00> : vector<16xf32>
    %334 = vector.multi_reduction <add>, %333, %cst_180 [1] : vector<16x32xf32> to vector<16xf32>
    %335 = vector.shape_cast %334 : vector<16xf32> to vector<16x1xf32>
    %cst_181 = arith.constant 3.200000e+01 : f32
    %336 = vector.broadcast %cst_181 : f32 to vector<16x1xf32>
    %337 = arith.divf %335, %336 : vector<16x1xf32>
    %338 = vector.broadcast %330 : vector<16x1xf32> to vector<16x32xf32>
    %339 = arith.subf %324, %338 : vector<16x32xf32>
    %cst_182 = arith.constant 9.99999974E-6 : f32
    %340 = vector.broadcast %cst_182 : f32 to vector<16x1xf32>
    %341 = arith.addf %337, %340 : vector<16x1xf32>
    %342 = math.rsqrt %341 : vector<16x1xf32>
    %343 = vector.broadcast %342 : vector<16x1xf32> to vector<16x32xf32>
    %344 = arith.mulf %339, %343 : vector<16x32xf32>
    %345 = vector.broadcast %325 : vector<1x32xf32> to vector<16x32xf32>
    %346 = arith.mulf %344, %345 : vector<16x32xf32>
    %347 = vector.broadcast %326 : vector<1x32xf32> to vector<16x32xf32>
    %348 = arith.addf %346, %347 : vector<16x32xf32>
    %c0_183 = arith.constant 0 : index
    %c0_184 = arith.constant 0 : index
    %349 = vector.load %arg19[%c0_183, %c0_184] : memref<32x64xbf16, #tpu.memory_space<vmem>>, vector<32x64xbf16>
    %350 = arith.truncf %348 : vector<16x32xf32> to vector<16x32xbf16>
    %cst_185 = arith.constant dense<0.000000e+00> : vector<16x64xf32>
    %351 = tpu.matmul %350, %349, %cst_185 {dimension_numbers = #tpu.dot_dimension_numbers<[1], [0], [0], [1], [0, 0, 1, 1], [], []>} : vector<16x32xbf16>, vector<32x64xbf16>, vector<16x64xf32> -> vector<16x64xf32>
    %c1_186 = arith.constant 1 : index
    %c0_187 = arith.constant 0 : index
    %352 = vector.load %arg9[%c1_186, %c0_187] : memref<2x64xf32, #tpu.memory_space<vmem>>, vector<1x64xf32>
    %353 = vector.broadcast %352 : vector<1x64xf32> to vector<16x64xf32>
    %354 = arith.addf %351, %353 : vector<16x64xf32>
    %355 = arith.negf %354 : vector<16x64xf32>
    %356 = math.exp %355 : vector<16x64xf32>
    %cst_188 = arith.constant 1.000000e+00 : f32
    %357 = vector.broadcast %cst_188 : f32 to vector<16x64xf32>
    %358 = arith.addf %357, %356 : vector<16x64xf32>
    %359 = arith.divf %357, %358 : vector<16x64xf32>
    %360 = arith.mulf %354, %359 : vector<16x64xf32>
    %c0_189 = arith.constant 0 : index
    %c0_190 = arith.constant 0 : index
    %361 = vector.load %arg20[%c0_189, %c0_190] : memref<64x32xbf16, #tpu.memory_space<vmem>>, vector<64x32xbf16>
    %362 = arith.truncf %360 : vector<16x64xf32> to vector<16x64xbf16>
    %cst_191 = arith.constant dense<0.000000e+00> : vector<16x32xf32>
    %363 = tpu.matmul %362, %361, %cst_191 {dimension_numbers = #tpu.dot_dimension_numbers<[1], [0], [0], [1], [0, 0, 1, 1], [], []>} : vector<16x64xbf16>, vector<64x32xbf16>, vector<16x32xf32> -> vector<16x32xf32>
    %c4_192 = arith.constant 4 : index
    %c0_193 = arith.constant 0 : index
    %364 = vector.load %arg10[%c4_192, %c0_193] : memref<5x32xf32, #tpu.memory_space<vmem>>, vector<1x32xf32>
    %365 = vector.broadcast %364 : vector<1x32xf32> to vector<16x32xf32>
    %366 = arith.addf %363, %365 : vector<16x32xf32>
    %cst_194 = arith.constant 5.000000e-01 : f32
    %367 = vector.broadcast %cst_194 : f32 to vector<16x32xf32>
    %368 = arith.mulf %367, %366 : vector<16x32xf32>
    %369 = arith.addf %324, %368 : vector<16x32xf32>
    %c4_195 = arith.constant 4 : index
    %c0_196 = arith.constant 0 : index
    %370 = vector.load %arg5[%c4_195, %c0_196] : memref<6x32xf32, #tpu.memory_space<vmem>>, vector<1x32xf32>
    %c4_197 = arith.constant 4 : index
    %c0_198 = arith.constant 0 : index
    %371 = vector.load %arg6[%c4_197, %c0_198] : memref<6x32xf32, #tpu.memory_space<vmem>>, vector<1x32xf32>
    %cst_199 = arith.constant dense<0.000000e+00> : vector<16xf32>
    %372 = vector.multi_reduction <add>, %369, %cst_199 [1] : vector<16x32xf32> to vector<16xf32>
    %373 = vector.shape_cast %372 : vector<16xf32> to vector<16x1xf32>
    %cst_200 = arith.constant 3.200000e+01 : f32
    %374 = vector.broadcast %cst_200 : f32 to vector<16x1xf32>
    %375 = arith.divf %373, %374 : vector<16x1xf32>
    %376 = vector.broadcast %375 : vector<16x1xf32> to vector<16x32xf32>
    %377 = arith.subf %369, %376 : vector<16x32xf32>
    %378 = arith.mulf %377, %377 : vector<16x32xf32>
    %cst_201 = arith.constant dense<0.000000e+00> : vector<16xf32>
    %379 = vector.multi_reduction <add>, %378, %cst_201 [1] : vector<16x32xf32> to vector<16xf32>
    %380 = vector.shape_cast %379 : vector<16xf32> to vector<16x1xf32>
    %cst_202 = arith.constant 3.200000e+01 : f32
    %381 = vector.broadcast %cst_202 : f32 to vector<16x1xf32>
    %382 = arith.divf %380, %381 : vector<16x1xf32>
    %383 = vector.broadcast %375 : vector<16x1xf32> to vector<16x32xf32>
    %384 = arith.subf %369, %383 : vector<16x32xf32>
    %cst_203 = arith.constant 9.99999974E-6 : f32
    %385 = vector.broadcast %cst_203 : f32 to vector<16x1xf32>
    %386 = arith.addf %382, %385 : vector<16x1xf32>
    %387 = math.rsqrt %386 : vector<16x1xf32>
    %388 = vector.broadcast %387 : vector<16x1xf32> to vector<16x32xf32>
    %389 = arith.mulf %384, %388 : vector<16x32xf32>
    %390 = vector.broadcast %370 : vector<1x32xf32> to vector<16x32xf32>
    %391 = arith.mulf %389, %390 : vector<16x32xf32>
    %392 = vector.broadcast %371 : vector<1x32xf32> to vector<16x32xf32>
    %393 = arith.addf %391, %392 : vector<16x32xf32>
    %c0_204 = arith.constant 0 : index
    %c0_205 = arith.constant 0 : index
    %c0_206 = arith.constant 0 : index
    %394 = vector.load %arg21[%c0_204, %c0_205, %c0_206] : memref<1x16x32xf32, #tpu.memory_space<vmem>>, vector<1x16x32xf32>
    %395 = vector.shape_cast %394 : vector<1x16x32xf32> to vector<16x32xf32>
    %396 = vector.shape_cast %393 : vector<16x32xf32> to vector<1x16x32xf32>
    tpu.vector_store %arg21[%c0_204, %c0_205, %c0_206], %396 {strides = array<i32>} : memref<1x16x32xf32, #tpu.memory_space<vmem>>, vector<1x16x32xf32>,
    return
  }
  func.func @transform_0(%arg0: i32) -> (i32, i32, i32) {
    %c0_i32 = arith.constant 0 : i32
    %c0_i32_0 = arith.constant 0 : i32
    %c0_i32_1 = arith.constant 0 : i32
    return %arg0, %c0_i32, %c0_i32_0 : i32, i32, i32
  }
  func.func @transform_1(%arg0: i32) -> (i32, i32, i32) {
    %c0_i32 = arith.constant 0 : i32
    %c0_i32_0 = arith.constant 0 : i32
    %c0_i32_1 = arith.constant 0 : i32
    return %arg0, %c0_i32, %c0_i32_0 : i32, i32, i32
  }
  func.func @transform_2(%arg0: i32) -> (i32, i32, i32) {
    %c0_i32 = arith.constant 0 : i32
    %c0_i32_0 = arith.constant 0 : i32
    %c0_i32_1 = arith.constant 0 : i32
    return %arg0, %c0_i32, %c0_i32_0 : i32, i32, i32
  }
  func.func @transform_3(%arg0: i32) -> (i32, i32) {
    %c0_i32 = arith.constant 0 : i32
    %c0_i32_0 = arith.constant 0 : i32
    %c0_i32_1 = arith.constant 0 : i32
    return %c0_i32, %c0_i32_0 : i32, i32
  }
  func.func @transform_4(%arg0: i32) -> (i32, i32) {
    %c0_i32 = arith.constant 0 : i32
    %c0_i32_0 = arith.constant 0 : i32
    %c0_i32_1 = arith.constant 0 : i32
    return %c0_i32, %c0_i32_0 : i32, i32
  }
  func.func @transform_5(%arg0: i32) -> (i32, i32) {
    %c0_i32 = arith.constant 0 : i32
    %c0_i32_0 = arith.constant 0 : i32
    %c0_i32_1 = arith.constant 0 : i32
    return %c0_i32, %c0_i32_0 : i32, i32
  }
  func.func @transform_6(%arg0: i32) -> (i32, i32) {
    %c0_i32 = arith.constant 0 : i32
    %c0_i32_0 = arith.constant 0 : i32
    %c0_i32_1 = arith.constant 0 : i32
    return %c0_i32, %c0_i32_0 : i32, i32
  }
  func.func @transform_7(%arg0: i32) -> (i32, i32) {
    %c0_i32 = arith.constant 0 : i32
    %c0_i32_0 = arith.constant 0 : i32
    %c0_i32_1 = arith.constant 0 : i32
    return %c0_i32, %c0_i32_0 : i32, i32
  }
  func.func @transform_8(%arg0: i32) -> (i32, i32) {
    %c0_i32 = arith.constant 0 : i32
    %c0_i32_0 = arith.constant 0 : i32
    %c0_i32_1 = arith.constant 0 : i32
    return %c0_i32, %c0_i32_0 : i32, i32
  }
  func.func @transform_9(%arg0: i32) -> (i32, i32) {
    %c0_i32 = arith.constant 0 : i32
    %c0_i32_0 = arith.constant 0 : i32
    %c0_i32_1 = arith.constant 0 : i32
    return %c0_i32, %c0_i32_0 : i32, i32
  }
  func.func @transform_10(%arg0: i32) -> (i32, i32) {
    %c0_i32 = arith.constant 0 : i32
    %c0_i32_0 = arith.constant 0 : i32
    %c0_i32_1 = arith.constant 0 : i32
    return %c0_i32, %c0_i32_0 : i32, i32
  }
  func.func @transform_11(%arg0: i32) -> (i32, i32) {
    %c0_i32 = arith.constant 0 : i32
    %c0_i32_0 = arith.constant 0 : i32
    %c0_i32_1 = arith.constant 0 : i32
    return %c0_i32, %c0_i32_0 : i32, i32
  }
  func.func @transform_12(%arg0: i32) -> (i32, i32) {
    %c0_i32 = arith.constant 0 : i32
    %c0_i32_0 = arith.constant 0 : i32
    %c0_i32_1 = arith.constant 0 : i32
    return %c0_i32, %c0_i32_0 : i32, i32
  }
  func.func @transform_13(%arg0: i32) -> (i32, i32, i32) {
    %c0_i32 = arith.constant 0 : i32
    %c0_i32_0 = arith.constant 0 : i32
    %c0_i32_1 = arith.constant 0 : i32
    %c0_i32_2 = arith.constant 0 : i32
    return %c0_i32, %c0_i32_0, %c0_i32_1 : i32, i32, i32
  }
  func.func @transform_14(%arg0: i32) -> (i32, i32) {
    %c0_i32 = arith.constant 0 : i32
    %c0_i32_0 = arith.constant 0 : i32
    %c0_i32_1 = arith.constant 0 : i32
    return %c0_i32, %c0_i32_0 : i32, i32
  }
  func.func @transform_15(%arg0: i32) -> (i32, i32) {
    %c0_i32 = arith.constant 0 : i32
    %c0_i32_0 = arith.constant 0 : i32
    %c0_i32_1 = arith.constant 0 : i32
    return %c0_i32, %c0_i32_0 : i32, i32
  }
  func.func @transform_16(%arg0: i32) -> (i32, i32) {
    %c0_i32 = arith.constant 0 : i32
    %c0_i32_0 = arith.constant 0 : i32
    %c0_i32_1 = arith.constant 0 : i32
    return %c0_i32, %c0_i32_0 : i32, i32
  }
  func.func @transform_17(%arg0: i32) -> (i32, i32) {
    %c0_i32 = arith.constant 0 : i32
    %c0_i32_0 = arith.constant 0 : i32
    %c0_i32_1 = arith.constant 0 : i32
    return %c0_i32, %c0_i32_0 : i32, i32
  }
  func.func @transform_18(%arg0: i32) -> (i32, i32) {
    %c0_i32 = arith.constant 0 : i32
    %c0_i32_0 = arith.constant 0 : i32
    %c0_i32_1 = arith.constant 0 : i32
    return %c0_i32, %c0_i32_0 : i32, i32
  }
  func.func @transform_19(%arg0: i32) -> (i32, i32) {
    %c0_i32 = arith.constant 0 : i32
    %c0_i32_0 = arith.constant 0 : i32
    %c0_i32_1 = arith.constant 0 : i32
    return %c0_i32, %c0_i32_0 : i32, i32
  }
  func.func @transform_20(%arg0: i32) -> (i32, i32, i32) {
    %c0_i32 = arith.constant 0 : i32
    %c0_i32_0 = arith.constant 0 : i32
    %c0_i32_1 = arith.constant 0 : i32
    return %arg0, %c0_i32, %c0_i32_0 : i32, i32, i32
  }
  func.func @transform_21(%arg0: i32) -> (i32, i32, i32) {
    %c0_i32 = arith.constant 0 : i32
    %c0_i32_0 = arith.constant 0 : i32
    %c0_i32_1 = arith.constant 0 : i32
    return %arg0, %c0_i32, %c0_i32_0 : i32, i32, i32
  }
}

</mosaic_0001>

<bundles_post_ra>
// kernel: tpu_custom_call.1
= control target key start
LH: loop header
LB: loop body
LE: loop exit
PB: predicated region body
PF: predicated region fallthrough
CT: control target
= control target key end

     0   :  { %s4069_s0 = inlined_call_operand.vmem [shape: f32[2,16,32], index: 0, kind: input, shape index: {}]   ;;  %s4070_s1 = inlined_call_operand.hbm [shape: f32[2,1,16], index: 1, kind: input, shape index: {}]   ;;  %s4071_s2 = inlined_call_operand.vmem [shape: f32[2,16,1], index: 2, kind: input, shape index: {}]   ;;  %s4072_s3 = inlined_call_operand.hbm [shape: bf16[16,32], index: 3, kind: input, shape index: {}]   ;;  %s4073_s4 = inlined_call_operand.hbm [shape: f32[6,32], index: 4, kind: input, shape index: {}]   ;;  %s4074_s5 = inlined_call_operand.hbm [shape: f32[6,32], index: 5, kind: input, shape index: {}]   ;;  %s4075_s6 = inlined_call_operand.vmem [shape: bf16[32,64], index: 6, kind: input, shape index: {}]   ;;  %s4076_s7 = inlined_call_operand.vmem [shape: bf16[64,32], index: 7, kind: input, shape index: {}]   ;;  %s4077_s8 = inlined_call_operand.hbm [shape: f32[2,64], index: 8, kind: input, shape index: {}]   ;;  %s4078_s9 = inlined_call_operand.hbm [shape: f32[5,32], index: 9, kind: input, shape index: {}]   ;;  %s4079_s10 = inlined_call_operand.vmem [shape: bf16[32,96], index: 10, kind: input, shape index: {}]   ;;  %s4080_s11 = inlined_call_operand.vmem [shape: f32[1,96], index: 11, kind: input, shape index: {}]   ;;  %s4081_s12 = inlined_call_operand.hbm [shape: f32[2,32], index: 12, kind: input, shape index: {}]   ;;  %s4082_s13 = inlined_call_operand.vmem [shape: bf16[4,8,32], index: 13, kind: input, shape index: {}]   ;;  %s4083_s14 = inlined_call_operand.vmem [shape: bf16[32,64], index: 14, kind: input, shape index: {}]   ;;  %s4084_s15 = inlined_call_operand.hbm [shape: f32[1,64], index: 15, kind: input, shape index: {}]   ;;  %s4085_s16 = inlined_call_operand.hbm [shape: f32[7,32], index: 16, kind: input, shape index: {}]   ;;  %s4086_s17 = inlined_call_operand.vmem [shape: bf16[32,32], index: 17, kind: input, shape index: {}]   ;;  %s4087_s18 = inlined_call_operand.vmem [shape: bf16[32,64], index: 18, kind: input, shape index: {}]   ;;  %s4088_s19 = inlined_call_operand.vmem [shape: bf16[64,32], index: 19, kind: input, shape index: {}]   ;;  %s4089_s20 = inlined_call_operand.hbm [shape: f32[2,16,32], index: 20, kind: output, shape index: {0}]   ;;  %s4090_s21 = inlined_call_operand.hbm [shape: bf16[2,16,64], index: 21, kind: output, shape index: {1}]  }
   0x1   :  { %4104 = sst [smem:[#allocation32_spill]] %s4069_s0 }
   0x2   :  { %4105 = sst [smem:[#allocation33_spill]] %s4070_s1 }
   0x3   :  { %4106 = sst [smem:[#allocation34_spill]] %s4071_s2 }
   0x4   :  { %4107 = sst [smem:[#allocation35_spill]] %s4072_s3 }
   0x5   :  { %4108 = sst [smem:[#allocation36_spill]] %s4073_s4 }
   0x6   :  { %4109 = sst [smem:[#allocation37_spill]] %s4074_s5 }
   0x7   :  { %4110 = sst [smem:[#allocation38_spill]] %s4077_s8 }
   0x8   :  { %4111 = sst [smem:[#allocation39_spill]] %s4078_s9 }
   0x9   :  { %4112 = sst [smem:[#allocation40_spill]] %s4081_s12 }
   0xa   :  { %4113 = sst [smem:[#allocation41_spill]] %s4084_s15 }
   0xb   :  { %4114 = sst [smem:[#allocation42_spill]] %s4085_s16 }
   0xc   :  { %4115 = sst [smem:[#allocation43_spill]] %s4086_s17 }
   0xd   :  { %4116 = sst [smem:[#allocation44_spill]] %s4087_s18 }
   0xe   :  { %4117 = sst [smem:[#allocation45_spill]] %s4088_s19 }
   0xf   :  { %4118 = sst [smem:[#allocation46_spill]] %s4089_s20 }
  0x10   :  { %4119 = sst [smem:[#allocation47_spill]] %s4090_s21 }
  0x11   :  { %27 = vsyncpa [#allocation7], 0 }
  0x12   :  { %29 = vsyncpa [#allocation7 + $0x1], 0 }
  0x13   :  { %30 = vsyncpa [#allocation10], 0 }
  0x14   :  { %31 = vsyncpa [#allocation13], 0 }
  0x15   :  { %32 = vsyncpa [#allocation16], 0 }
  0x16   :  { %33 = vsyncpa [#allocation19], 0 }
  0x17   :  { %34 = vsyncpa [#allocation8], 0 }
  0x18   :  { %36 = vsyncpa [#allocation8 + $0x1], 0 }
  0x19   :  { %37 = vsyncpa [#allocation23], 0 }
  0x1a   :  { %39 = vsyncpa [#allocation23 + $0x1], 0  ;;  %s3443_s2 = smov 0   ;;  %s3445_s25 = smov 0  }
  0x1b   :  { %s3447_s26 = smov 0   ;;  %s3449_s27 = smov 0  }
  0x1c LB: > { %s3301_s3 = smov [#allocation9]   ;;  %s3464_s29 = sadd.s32 4294967295, %s3287_s27   ;;  %s3287_s27 = sphi %s3449_s27, %s4168_s27   ;;  %s3283_s26 = sphi %s3447_s26, %s4167_s26   ;;  %s3279_s25 = sphi %s3445_s25, %s4166_s25   ;;  %s3275_s2 = sphi %s3443_s2, %s4165_s2  }
  0x1d   : > { %s549_s28 = sshll.u32 %s3301_s3, 4  ;;  %p2424_p0 = scmp.ge.s32.totalorder %s3287_s27, 1  ;;  %s550_s28 = int_to_ptr.vmem [resolvable:$true] %s549_s28 }
  0x1e   : > { %p4095_p1 = scmp.eq.s32.totalorder %s3464_s29, 0  ;;  %p537_p2 = scmp.lt.s32.totalorder %s3287_s27, 3 }
  0x1f   : > { %s3302_s4 = smov [#allocation12]   ;;  %s3303_s22 = smov [#allocation15]  }
  0x20   : > { %p3469_p3 = pnand %p2424_p0, %p537_p2  ;;  %s574_s30 = sshll.u32 %s3302_s4, 4  ;;  %s575_s30 = int_to_ptr.vmem [resolvable:$true] %s574_s30 }
  0x21   : > { %s602_s23 = sshll.u32 %s3303_s22, 4  ;;  %s2940_s24 = scalar_lea.vmem %s550_s28, 128  ;;  %s3482_s23 = int_to_ptr.vmem [resolvable:$true] %s602_s23 }
  0x22   : > { %s4120_s0 = scalar_select %p3469_p3, 1, 0 }
  0x23   : > { %p2703_p5 = pneg %p3469_p3  ;;  %p2941_p8 = scmp.ne.s32.totalorder %s550_s28, %s2940_s24 }
  0x24   : > { %p2948_p11 = scmp.lt.s32.totalorder %s550_s28, %s550_s28  ;;  %p2949_p12 = scmp.lt.s32.totalorder %s2940_s24, %s2940_s24 }
  0x25   : > { %p3478_p6 = pnand %p2703_p5, %p4095_p1 }
  0x26   : > { %p2950_p13 = por %p2949_p12, %p2948_p11 }
  0x27   : > { %p3486_p7 = pneg %p3478_p6 }
  0x29   : > { %p2943_p9 = pnand %p2941_p8, %p3486_p7 }
  0x2b   : > { %p2944_p10 = pneg %p2943_p9 }
  0x2d   : > { %p2951_p0 = pnand %p2950_p13, %p2944_p10 }
  0x2f   : > { %2954 = shalt.err (!%p2951_p0)
}
  0x30   : > { %s3304_s3 = smov 64   ;;  %s3305_s4 = smov 4  }
  0x31   : > { %s4123_s21 = sld [smem:[#allocation35_spill]]  ;;  %s2966_s19 = scalar_lea.vmem %s575_s30, 128 }
  0x32   : > { %p2967_p2 = scmp.ne.s32.totalorder %s575_s30, %s2966_s19  ;;  %p2974_p9 = scmp.lt.s32.totalorder %s575_s30, %s575_s30 }
  0x33   : > { %p2975_p4 = scmp.lt.s32.totalorder %s2966_s19, %s2966_s19 }
  0x34   : > { %p2969_p5 = pnand %p2967_p2, %p3486_p7 }
  0x35   : > { %p2976_p1 = por %p2975_p4, %p2974_p9 }
  0x36   : > { %p2970_p8 = pneg %p2969_p5 }
  0x37   : > { %2706 = dma.hbm_to_vmem [thread:$0]  (!%p3478_p6), %s4123_s21, 128, %s550_s28, [#allocation10], %s3304_s3, %s3304_s3, %s3305_s4  }
  0x38   : > { %p2977_p11 = pnand %p2976_p1, %p2970_p8 }
  0x3a   : > { %2980 = shalt.err (!%p2977_p11)
}
  0x3b   : > { %s4124_s17 = sld [smem:[#allocation37_spill]]  ;;  %s2992_s20 = scalar_lea.vmem %s3482_s23, 128 }
  0x3c   : > { %p2993_p10 = scmp.ne.s32.totalorder %s3482_s23, %s2992_s20  ;;  %p3000_p0 = scmp.lt.s32.totalorder %s3482_s23, %s3482_s23 }
  0x3d   : > { %p3001_p4 = scmp.lt.s32.totalorder %s2992_s20, %s2992_s20 }
  0x3e   : > { %p2995_p12 = pnand %p2993_p10, %p3486_p7 }
  0x3f   : > { %p3002_p1 = por %p3001_p4, %p3000_p0 }
  0x40   : > { %p2996_p13 = pneg %p2995_p12 }
  0x41   : > { %2712 = dma.hbm_to_vmem [thread:$0]  (!%p3478_p6), %s4124_s17, 128, %s575_s30, [#allocation13]  }
  0x42   : > { %p3003_p2 = pnand %p3002_p1, %p2996_p13 }
  0x44   : > { %3006 = shalt.err (!%p3003_p2)
}
  0x45   : > { %s4125_s9 = sld [smem:[#allocation39_spill]]  ;;  %s3306_s17 = smov [#allocation18]  }
  0x46   : > { %s636_s21 = sshll.u32 %s3306_s17, 4  ;;  %s3307_s28 = smov [#allocation11]   ;;  %s637_s21 = int_to_ptr.vmem [resolvable:$true] %s636_s21 }
  0x47   : > { %s563_s30 = sshll.u32 %s3307_s28, 4  ;;  %s3018_s3 = scalar_lea.vmem %s637_s21, 16  ;;  %s564_s30 = int_to_ptr.vmem [resolvable:$true] %s563_s30 }
  0x48   : > { %p3019_p5 = scmp.ne.s32.totalorder %s637_s21, %s3018_s3  ;;  %s3025_s4 = scalar_lea.vmem %s637_s21, 32 }
  0x49   : > { %p3026_p11 = scmp.lt.s32.totalorder %s637_s21, %s637_s21  ;;  %p3027_p10 = scmp.lt.s32.totalorder %s3025_s4, %s3018_s3 }
  0x4a   : > { %p3021_p8 = pnand %p3019_p5, %p3486_p7 }
  0x4b   : > { %2718 = dma.hbm_to_vmem [thread:$0]  (!%p3478_p6), %s4125_s9, 128, %s3482_s23, [#allocation16]  }
  0x4c   : > { %p3022_p9 = pneg %p3021_p8  ;;  %p3028_p12 = por %p3027_p10, %p3026_p11 }
  0x4e   : > { %p3029_p13 = pnand %p3028_p12, %p3022_p9 }
  0x50   : > { %3032 = shalt.err (!%p3029_p13)
}
  0x51   : > { %s4126_s15 = sld [smem:[#allocation41_spill]]  ;;  %s3044_s24 = scalar_lea.vmem %s564_s30, 128 }
  0x52   : > { %p3045_p0 = scmp.ne.s32.totalorder %s564_s30, %s3044_s24  ;;  %p3052_p2 = scmp.lt.s32.totalorder %s564_s30, %s564_s30 }
  0x53   : > { %p3053_p5 = scmp.lt.s32.totalorder %s3044_s24, %s3044_s24 }
  0x54   : > { %p3047_p4 = pnand %p3045_p0, %p3486_p7 }
  0x55   : > { %p3054_p8 = por %p3053_p5, %p3052_p2 }
  0x56   : > { %p3048_p1 = pneg %p3047_p4 }
  0x57   : > { %2724 = dma.hbm_to_vmem [thread:$0]  (!%p3478_p6), %s4126_s15, 16, %s637_s21, [#allocation19]  }
  0x58   : > { %p3055_p3 = pnand %p3054_p8, %p3048_p1 }
  0x5a   : > { %3058 = shalt.err (!%p3055_p3)
}
  0x5b   : > { %s4127_s19 = sld [smem:[#allocation36_spill]]  ;;  %s3308_s17 = smov [#allocation14]  }
  0x5c   : > { %s591_s21 = sshll.u32 %s3308_s17, 4  ;;  %s3309_s28 = smov [#allocation17]   ;;  %s592_s21 = int_to_ptr.vmem [resolvable:$true] %s591_s21 }
  0x5d   : > { %s619_s3 = sshll.u32 %s3309_s28, 4  ;;  %s3070_s4 = scalar_lea.vmem %s592_s21, 32  ;;  %s620_s3 = int_to_ptr.vmem [resolvable:$true] %s619_s3 }
  0x5e   : > { %p3071_p9 = scmp.ne.s32.totalorder %s592_s21, %s3070_s4  ;;  %p3078_p12 = scmp.lt.s32.totalorder %s592_s21, %s592_s21 }
  0x5f   : > { %p3079_p13 = scmp.lt.s32.totalorder %s3070_s4, %s3070_s4 }
  0x60   : > { %p3073_p11 = pnand %p3071_p9, %p3486_p7 }
  0x61   : > { %2709 = dma.hbm_to_vmem [thread:$0]  (!%p3478_p6), %s4127_s19, 128, %s564_s30, [#allocation10]  }
  0x62   : > { %p3074_p10 = pneg %p3073_p11  ;;  %p3080_p3 = por %p3079_p13, %p3078_p12 }
  0x64   : > { %p3081_p0 = pnand %p3080_p3, %p3074_p10 }
  0x66   : > { %3084 = shalt.err (!%p3081_p0)
}
  0x67   : > { %s4128_s8 = sld [smem:[#allocation38_spill]]  ;;  %s3096_s30 = scalar_lea.vmem %s620_s3, 32 }
  0x68   : > { %p3097_p4 = scmp.ne.s32.totalorder %s620_s3, %s3096_s30  ;;  %p3104_p5 = scmp.lt.s32.totalorder %s620_s3, %s620_s3 }
  0x69   : > { %p3105_p8 = scmp.lt.s32.totalorder %s3096_s30, %s3096_s30 }
  0x6a   : > { %p3099_p1 = pnand %p3097_p4, %p3486_p7 }
  0x6b   : > { %p3106_p9 = por %p3105_p8, %p3104_p5 }
  0x6c   : > { %p3100_p2 = pneg %p3099_p1 }
  0x6d   : > { %2715 = dma.hbm_to_vmem [thread:$0]  (!%p3478_p6), %s4128_s8, 32, %s592_s21, [#allocation13]  }
  0x6e   : > { %p3107_p11 = pnand %p3106_p9, %p3100_p2 }
  0x70   : > { %3110 = shalt.err (!%p3107_p11)
}
  0x71   : > { %s4129_s12 = sld [smem:[#allocation40_spill]]  ;;  %s3310_s18 = smov [#allocation20]  }
  0x72   : > { %s647_s19 = sshll.u32 %s3310_s18, 4  ;;  %s648_s19 = int_to_ptr.vmem [resolvable:$true] %s647_s19 }
  0x73   : > { %s3122_s17 = scalar_lea.vmem %s648_s19, 128  ;;  %p3130_p3 = scmp.lt.s32.totalorder %s648_s19, %s648_s19 }
  0x74   : > { %p3123_p10 = scmp.ne.s32.totalorder %s648_s19, %s3122_s17  ;;  %p3131_p0 = scmp.lt.s32.totalorder %s3122_s17, %s3122_s17 }
  0x76   : > { %p3125_p12 = pnand %p3123_p10, %p3486_p7  ;;  %p3132_p4 = por %p3131_p0, %p3130_p3 }
  0x77   : > { %2721 = dma.hbm_to_vmem [thread:$0]  (!%p3478_p6), %s4129_s12, 32, %s620_s3, [#allocation16]  }
  0x78   : > { %p3126_p13 = pneg %p3125_p12 }
  0x7a   : > { %p3133_p1 = pnand %p3132_p4, %p3126_p13 }
  0x7c   : > { %3136 = shalt.err (!%p3133_p1)
}
  0x7d   : > { %s4130_s16 = sld [smem:[#allocation42_spill]]  ;;  %s2423_s1 = sadd.s32 4294967294, %s3287_s27  }
  0x7e   : > { %s3553_s5 = sadd.s32 1, %s3287_s27   ;;  %s78_s4 = sadd.s32 1, %s3283_s26 }
  0x7f   : > { %s75_s3 = ssub.s32 %s3287_s27, %s3553_s5  ;;  %p85_p2 = scmp.ne.s32.totalorder %s3283_s26, %s3279_s25 }
  0x80   : > { %p76_p7 = scmp.eq.s32.totalorder %s75_s3, 0  ;;  %p86_p5 = scmp.eq.s32.totalorder %s3287_s27, 0 }
  0x81   : > { %p91_p8 = scmp.ne.s32.totalorder %s3279_s25, %s3275_s2  ;;  %p4133_p11 = scmp.eq.s32.totalorder %s3464_s29, 0 }
  0x82   : > { %s3564_s22 = scalar_select %p76_p7, %s3283_s26, %s78_s4  }
  0x83   : > { %2727 = dma.hbm_to_vmem [thread:$0]  (!%p3478_p6), %s4130_s16, 128, %s648_s19, [#allocation19]  }
  0x84   : > { %4131 = sst [smem:[#allocation31_spill]] %s3564_s22  ;;  %p3566_p9 = por %p86_p5, %p85_p2 }
  0x85   : > { %p3572_p6 = por %p4133_p11, %p91_p8  ;;  %p498_p10 = scmp.eq.s32.totalorder %s3464_s29, 1 }
  0x86   : > { %p504_p12 = scmp.eq.s32.totalorder %s2423_s1, 1  ;;  %p2747_p13 = scmp.lt.s32.totalorder %s3287_s27, 2 }
  0x87   : > { %s4134_s30 = scalar_select %p3572_p6, 1, 0 }
  0x88   : > { %s675_s24 = sand.u32 1, %s3283_s26   ;;  %p3579_p3 = por %p498_p10, %p85_p2 }
  0x89   : > { %p3583_p0 = por %p504_p12, %p91_p8  ;;  %s2434_s19 = sshll.u32 %s3287_s27, 4 }
  0x8a   : > { %s4135_s20 = scalar_select %p3579_p3, 1, 0 }
  0x8b   : > { %s4136_s18 = scalar_select %p3583_p0, 1, 0 }
  0x8c   : > { %s678_s17 = scalar_lea.vmem [#allocation6], %s675_s24  ;;  %s4137_s4 = sld [smem:[#allocation33_spill]] }
  0x8d   : > { %s685_s21 = sshll.u32 %s678_s17, 4  ;;  %p3595_p4 = pnand %p2747_p13, %p3566_p9  ;;  %s686_s21 = int_to_ptr.vmem [resolvable:$true] %s685_s21 }
  0x8e   : > { %s676_s9 = scalar_lea.sflag [#allocation7], %s675_s24 }
  0x8f   : > { %p3139_p7 = pneg %p3595_p4 }
  0x92   : > { %s3591_s8 = scalar_lea.hbm %s4137_s4, %s2434_s19  ;;  %s3142_s28 = scalar_lea.hbm %s4137_s4, 32 }
  0x93   : > { %s3137_s12 = scalar_lea.hbm %s3591_s8, 16  ;;  %p3143_p8 = scmp.lt.s32.totalorder %s3591_s8, %s4137_s4 }
  0x94   : > { %p3138_p1 = scmp.ne.s32.totalorder %s3591_s8, %s3137_s12  ;;  %p3144_p9 = scmp.lt.s32.totalorder %s3142_s28, %s3137_s12 }
  0x96   : > { %p3140_p2 = pnand %p3139_p7, %p3138_p1  ;;  %p3145_p11 = por %p3144_p9, %p3143_p8 }
  0x98   : > { %p3141_p5 = pneg %p3140_p2 }
  0x9a   : > { %p3146_p10 = pnand %p3145_p11, %p3141_p5 }
  0x9c   : > { %3149 = shalt.err (!%p3146_p10)
}
  0x9d   : > { %s3150_s23 = scalar_lea.vmem %s686_s21, 16  ;;  %s3311_s24 = smov [#allocation6]  }
  0x9e   : > { %p3151_p12 = scmp.ne.s32.totalorder %s686_s21, %s3150_s23  ;;  %s3155_s16 = sshll.u32 %s3311_s24, 4  ;;  %s3156_s16 = int_to_ptr.vmem [resolvable:$false] %s3155_s16 }
  0x9f   : > { %s3157_s22 = scalar_lea.vmem %s3156_s16, 32  ;;  %p3158_p1 = scmp.lt.s32.totalorder %s686_s21, %s3156_s16 }
  0xa0   : > { %p3153_p13 = pnand %p3151_p12, %p3139_p7  ;;  %p3159_p2 = scmp.lt.s32.totalorder %s3157_s22, %s3150_s23 }
  0xa2   : > { %p3154_p0 = pneg %p3153_p13  ;;  %p3160_p3 = por %p3159_p2, %p3158_p1 }
  0xa4   : > { %p3161_p6 = pnand %p3160_p3, %p3154_p0 }
  0xa6   : > { %3164 = shalt.err (!%p3161_p6)
}
  0xa7   : > { %2731 = dma.hbm_to_vmem [thread:$0]  (!%p3595_p4), %s3591_s8, 16, %s686_s21, %s676_s9  }
  0xa8   : > { %p4139_p5 = scmp.ne.s32.totalorder %s4120_s0, 0 }
  0xa9   : > { %s3616_s12 = sand.u32 (!%p4139_p5), 1, %s3279_s25   ;;  %p4140_p7 = scmp.ne.s32.totalorder (!%p4139_p5), %s4134_s30, 0 }
  0xaa   : > { %702 = sbr.rel (%p4139_p5) target bundleno = 4855 (0x12f7), region = 100  ;;  %s705_s15 = scalar_lea.sflag (!%p4139_p5), [#allocation7], %s3616_s12 }
  0xab   : > { %s707_s17 = scalar_lea.vmem (!%p4139_p5), [#allocation6], %s3616_s12 }
  0xaf   : > { %3246 = dma.done.wait (%p4140_p7), %s705_s15, 16  }
  0xb0   : > { %3248 = vsyncadd (%p4140_p7), %s705_s15, 4294967280  ;;  %p4141_p6 = scmp.eq.s32.totalorder %s3464_s29, 0 }
  0xb2   : > { %3250 = dma.done.wait (%p4141_p6), [#allocation10], 256   ;;  %p4142_p3 = pmov %p4141_p6 }
  0xb4   : > { %3252 = vsyncadd (%p4142_p3), [#allocation10], 4294967040  ;;  %p4143_p0 = pmov %p4142_p3 }
  0xb6   : > { %3254 = dma.done.wait (%p4143_p0), [#allocation13], 160   ;;  %p4144_p4 = pmov %p4143_p0 }
  0xb7   : > { %p4145_p8 = pmov %p4143_p0 }
  0xb8   : > { %3256 = vsyncadd (%p4144_p4), [#allocation13], 4294967136 }
  0xb9   : > { %3258 = dma.done.wait (%p4145_p8), [#allocation16], 160   ;;  %p4146_p9 = pmov %p4143_p0 }
  0xba   : > { %p4147_p11 = pmov %p4143_p0 }
  0xbb   : > { %3260 = vsyncadd (%p4146_p9), [#allocation16], 4294967136 }
  0xbc   : > { %3262 = dma.done.wait (%p4147_p11), [#allocation19], 144   ;;  %p4148_p10 = pmov %p4143_p0 }
  0xbd   : > { %p812_p12 = scmp.lt.s32.totalorder %s3464_s29, 1  ;;  %s4149_s22 = sld [smem:[#allocation32_spill]]  ;;  %vm830_vm0 = vcmask 261120   ;;  %v3648_v0 = vld [vmem:[%s707_s17] ss:$0 sm:$0xff]  ;;  %v2842_v17 = vld [vmem:[%s4075_s6 + $0x8] sm:$0xff]  }
  0xbe   : > { %3264 = vsyncadd (%p4148_p10), [#allocation19], 4294967152  ;;  %s4150_s19 = sld [smem:[#allocation34_spill]]  ;;  %s2444_s3 = sshll.u32 %s3616_s12, 4  ;;  %v3312_v18 = vmov 0.0   ;;  %vm3313_vm1 = vmmov 0  }
  0xbf   : > { %s813_s8 = scalar_select %p812_p12, %s3464_s29, 1  ;;  %2583 = vmatprep.subr.bf16.mxu0 %v3312_v18  ;;  %2587 = vmatprep.mubr.msk.bf16.mxu0 %vm3313_vm1, %v3312_v18  ;;  %v2843_v19 = vld [vmem:[%s4075_s6] sm:$0xff]   ;;  %v2450_v28 = vld [vmem:[#allocation11] ss:$0 sm:$0xff]  ;;  %v2451_v32 = vld [vmem:[#allocation12] ss:$0 sm:$0xff] }
  0xc0   : > { %2584 = vmatpush3.bf16.msra.mxu0 %v2842_v17  ;;  %2591 = vmatprep.subr.bf16.mxu1 %v3312_v18  ;;  %v2844_v37 = vld [vmem:[%s4076_s7 + $0x18] sm:$0xff]   ;;  %v2845_v38 = vld [vmem:[%s4076_s7 + $0x10] sm:$0xff]   ;;  %v2846_v39 = vld [vmem:[%s4076_s7 + $0x8] sm:$0xff]   ;;  %vm988_vm2 = vcmask 523264   ;;  %s4101_s15 = smov 8   ;;  %s3315_s17 = smov 120  }
  0xc1   : > { %s2539_s9 = sshll.u32 %s813_s8, 4  ;;  %2585 = vmatprep.subr.bf16.mxu0 %v3312_v18  ;;  %2599 = vmatprep.mubr.msk.bf16.mxu1 %vm3313_vm1, %v3312_v18  ;;  %v2847_v40 = vld [vmem:[%s4076_s7] sm:$0xff]   ;;  %v2452_v41 = vld [vmem:[#allocation14] ss:$0 sm:$0xff]  ;;  %v2458_v59 = vld [vmem:[#allocation15] ss:$0 sm:$0xff] }
  0xc2   : > { %2592 = vmatpush3.bf16.msra.mxu1 %v2844_v37  ;;  %s3316_s8 = smov 112   ;;  %vm1187_vm3 = vcmask 60416   ;;  %s3317_s0 = smov 88   ;;  %vm1157_vm4 = vcmask 257024   ;;  %vm1202_vm5 = vcmask 126016   ;;  %vm1160_vm6 = vcmask 519424  }
  0xc3   : > { %s816_s30 = scalar_lea.vmem %s4149_s22, %s2539_s9  ;;  %2593 = vmatprep.subr.bf16.mxu1 %v3312_v18  ;;  %s3318_s22 = smov 96  }
  0xc4   : > { %s821_s28 = scalar_lea.vmem %s4150_s19, %s2539_s9  ;;  %v3650_v1 = vld [vmem:[%s816_s30] sm:$0xff]  ;;  %v3658_v5 = vld [vmem:[%s816_s30 + $0x8] sm:$0xff]  ;;  %2586 = vmatpush3.bf16.msra.mxu0 %v2843_v19  ;;  %s3319_s30 = smov 80  }
  0xc5   : > { %v3652_v2 = vld [vmem:[%s821_s28] sm:$0xff]  ;;  %v3654_v3 = vld [vmem:[%s821_s28 + $0x8] sm:$0xff]  ;;  %v831_v4 = vsel %vm830_vm0, %v3650_v1, 0.0  ;;  %v834_v6 = vsel %vm830_vm0, %v3658_v5, 0.0  ;;  %2603 = vmatprep.subr.bf16.mxu0 %v3312_v18  ;;  %s4102_s21 = smov 64   ;;  %s3321_s1 = smov 72  }
  0xc6   : > { %832 = vadd.xlane.f32.xlu0 %v831_v4  ;;  %2594 = vmatpush3.bf16.msra.mxu1 %v2845_v38  ;;  %v2465_v38 = vld [vmem:[#allocation12 + $0x1] ss:$0 sm:$0xff]  ;;  %s3322_s19 = smov 56   ;;  %s3323_s28 = smov 48  }
  0xc7   : > { %2595 = vmatprep.subr.bf16.mxu1 %v3312_v18  ;;  %s3324_s23 = smov 104   ;;  %s3325_s24 = smov 40  }
  0xc8   : > { %s2445_s9 = sshll.u32 %s3616_s12, 3 }
  0xc9   : > { %s3771_s16 = scalar_lea.vmem [#allocation22], %s2445_s9 }
  0xca   : > { %835 = vadd.xlane.f32.xlu0 %v834_v6  ;;  %2596 = vmatpush3.bf16.msra.mxu1 %v2846_v39 }
  0xcb   : > { %2597 = vmatprep.subr.bf16.mxu1 %v3312_v18 }
  0xce   : > { %2598 = vmatpush3.bf16.msra.mxu1 %v2847_v40 }
 0x14f   : > { %v833_v7 = vpop.xlane.xlu0 %832 }
 0x150   : > { %v838_v8 = vmul.f32 0.03125, %v833_v7 }
 0x152   : > { %v840_v9 = vsub.f32 %v3650_v1, %v838_v8 }
 0x153   : > { %v836_v10 = vpop.xlane.xlu0 %835 }
 0x154   : > { %v839_v11 = vmul.f32 0.03125, %v836_v10  ;;  %v842_v12 = vmul.f32 %v840_v9, %v840_v9 }
 0x156   : > { %v841_v13 = vsub.f32 %v3658_v5, %v839_v11  ;;  %v844_v14 = vsel %vm830_vm0, %v842_v12, 0.0 }
 0x157   : > { %845 = vadd.xlane.f32.xlu1 %v844_v14 }
 0x158   : > { %v843_v15 = vmul.f32 %v841_v13, %v841_v13 }
 0x15a   : > { %v847_v16 = vsel %vm830_vm0, %v843_v15, 0.0 }
 0x15b   : > { %848 = vadd.xlane.f32.xlu1 %v847_v16 }
 0x1e0   : > { %v846_v20 = vpop.xlane.xlu1 %845 }
 0x1e1   : > { %v850_v21 = vmul.f32 0.03125, %v846_v20 }
 0x1e3   : > { %v852_v22 = vadd.f32 1e-05, %v850_v21 }
 0x1e4   : > { %v849_v23 = vpop.xlane.xlu1 %848 }
 0x1e5   : > { %2850 = vrsqrt.f32 %v852_v22  ;;  %v851_v24 = vmul.f32 0.03125, %v849_v23  ;;  %v2848_v22 = vld [vmem:[%s4079_s10 + $0x8] sm:$0xff]   ;;  %v2849_v23 = vld [vmem:[%s4079_s10] sm:$0xff]  }
 0x1e7   : > { %v853_v25 = vadd.f32 1e-05, %v851_v24  ;;  %v3721_v24 = vld [vmem:[#allocation9] sm:$0xf] }
 0x1e9   : > { %2852 = vrsqrt.f32 %v853_v25  ;;  %v3723_v25 = vld [vmem:[#allocation9 + $0x4] sm:$0xf] }
 0x1f2   : > { %v2851_v26 = vpop.eup %2850 }
 0x1f3   : > { %v856_v27 = vmul.f32 %v2851_v26, %v840_v9 }
 0x1f5   : > { %v862_v31 = vmul.f32 %v2450_v28, %v856_v27 }
 0x1f6   : > { %v2853_v29 = vpop.eup %2852 }
 0x1f7   : > { %v857_v30 = vmul.f32 %v2853_v29, %v841_v13  ;;  %v868_v34 = vadd.f32 %v2451_v32, %v862_v31 }
 0x1f9   : > { %v863_v33 = vmul.f32 %v2450_v28, %v857_v30 }
 0x1fb   : > { %v869_v35 = vadd.f32 %v2451_v32, %v863_v33 }
 0x1fd   : > { %v874_v36 = vpack.c.bf16 %v869_v35, %v868_v34  ;;  %v2464_v34 = vld [vmem:[#allocation11 + $0x1] ss:$0 sm:$0xff] }
 0x1ff   : > { %2588 = vmatmul.mubr.msk.bf16.vlgmr.msra.gmra.mxu0 %vm830_vm0, %v874_v36 }
 0x200   : > { %2607 = vmatprep.mubr.msk.bf16.mxu0 %vm3313_vm1, %v3312_v18  ;;  %2604 = vmatpush3.bf16.msra.mxu0 %v2848_v22 }
 0x201   : > { %2605 = vmatprep.subr.bf16.mxu0 %v3312_v18 }
 0x204   : > { %2606 = vmatpush3.bf16.msra.mxu0 %v2849_v23 }
 0x2bf   : > { %v929_v42 = vpop.f32.mrf.mxu0 }
 0x2c0   : > { %v930_v43 = vadd.f32 %v2452_v41, %v929_v42 }
 0x2c1   : > { %v2589_v44 = vpop.f32.mrf.mxu0 }
 0x2c2   : > { %v2456_v45 = vmul.f32 -1.442695, %v930_v43 }
 0x2c3   : > { %v932_v46 = vpop.f32.mrf.mxu0 }
 0x2c4   : > { %2854 = vpow2.f32 %v2456_v45  ;;  %v933_v47 = vadd.f32 %v2452_v41, %v932_v46  ;;  %v2472_v45 = vld [vmem:[#allocation17] ss:$0 sm:$0xff] }
 0x2c5   : > { %v2590_v48 = vpop.f32.mrf.mxu0 }
 0x2c6   : > { %v2457_v49 = vmul.f32 -1.442695, %v933_v47 }
 0x2c8   : > { %2856 = vpow2.f32 %v2457_v49 }
 0x2d1   : > { %v2855_v50 = vpop.eup %2854 }
 0x2d2   : > { %v942_v51 = vadd.f32 1.0, %v2855_v50 }
 0x2d4   : > { %2858 = vrcp.f32 %v942_v51 }
 0x2d5   : > { %v2857_v52 = vpop.eup %2856 }
 0x2d6   : > { %v943_v53 = vadd.f32 1.0, %v2857_v52 }
 0x2d8   : > { %2860 = vrcp.f32 %v943_v53 }
 0x2e1   : > { %v2859_v54 = vpop.eup %2858 }
 0x2e2   : > { %v948_v56 = vmul.f32 %v2859_v54, %v930_v43  ;;  %v2466_v43 = vld [vmem:[%s4080_s11] ss:$0 sm:$0xff] }
 0x2e5   : > { %v2861_v55 = vpop.eup %2860 }
 0x2e6   : > { %v949_v57 = vmul.f32 %v2861_v55, %v933_v47  ;;  %v2473_v55 = vld [vmem:[#allocation17 + $0x1] ss:$0 sm:$0xff] }
 0x2e8   : > { %v958_v58 = vpack.c.bf16 %v949_v57, %v948_v56 }
 0x2ea   : > { %2600 = vmatmul.mubr.msk.bf16.vlgmr.msra.gmra.mxu1 %vm988_vm2, %v958_v58 }
 0x3aa   : > { %v1026_v60 = vpop.f32.mrf.mxu1 }
 0x3ab   : > { %v1027_v61 = vadd.f32 %v2458_v59, %v1026_v60 }
 0x3ac   : > { %v2601_v62 = vpop.f32.mrf.mxu1 }
 0x3ad   : > { %v1033_v63 = vmul.f32 0.5, %v1027_v61 }
 0x3ae   : > { %v1029_v4 = vpop.f32.mrf.mxu1 }
 0x3af   : > { %v1030_v6 = vadd.f32 %v2458_v59, %v1029_v4  ;;  %v3701_v7 = vadd.f32 %v1033_v63, %v3650_v1 }
 0x3b0   : > { %v2602_v8 = vpop.f32.mrf.mxu1 }
 0x3b1   : > { %v1034_v9 = vmul.f32 0.5, %v1030_v6  ;;  %v1039_v10 = vsel %vm830_vm0, %v3701_v7, 0.0 }
 0x3b2   : > { %1040 = vadd.xlane.f32.xlu0 %v1039_v10 }
 0x3b3   : > { %v3706_v11 = vadd.f32 %v1034_v9, %v3658_v5 }
 0x3b5   : > { %v1042_v12 = vsel %vm830_vm0, %v3706_v11, 0.0 }
 0x3b6   : > { %1043 = vadd.xlane.f32.xlu1 %v1042_v12 }
 0x43b   : > { %v1041_v13 = vpop.xlane.xlu0 %1040 }
 0x43c   : > { %v1045_v14 = vmul.f32 0.03125, %v1041_v13 }
 0x43e   : > { %v1047_v15 = vsub.f32 %v3701_v7, %v1045_v14 }
 0x43f   : > { %v1044_v16 = vpop.xlane.xlu1 %1043 }
 0x440   : > { %v1046_v1 = vmul.f32 0.03125, %v1044_v16  ;;  %v1049_v17 = vmul.f32 %v1047_v15, %v1047_v15 }
 0x442   : > { %v1048_v19 = vsub.f32 %v3706_v11, %v1046_v1  ;;  %v1051_v20 = vsel %vm830_vm0, %v1049_v17, 0.0 }
 0x443   : > { %1052 = vadd.xlane.f32.xlu0 %v1051_v20 }
 0x444   : > { %v1050_v21 = vmul.f32 %v1048_v19, %v1048_v19 }
 0x446   : > { %v1054_v5 = vsel %vm830_vm0, %v1050_v21, 0.0 }
 0x447   : > { %1055 = vadd.xlane.f32.xlu1 %v1054_v5 }
 0x458   : > { %1211 = vrot.lane.b32.xlu1 %v3723_v25, %s4101_s15 }
 0x459   : > { %1209 = vrot.lane.b32.xlu0 %v3721_v24, %s4101_s15 }
 0x45c   : > { %1286 = vrot.lane.b32.xlu1 %v3723_v25, %s3315_s17 }
 0x45d   : > { %1284 = vrot.lane.b32.xlu0 %v3721_v24, %s3315_s17 }
 0x460   : > { %1329 = vrot.lane.b32.xlu1 %v3723_v25, %s3316_s8 }
 0x461   : > { %1327 = vrot.lane.b32.xlu0 %v3721_v24, %s3316_s8 }
 0x4cc   : > { %v1053_v26 = vpop.xlane.xlu0 %1052 }
 0x4cd   : > { %v1057_v27 = vmul.f32 0.03125, %v1053_v26 }
 0x4cf   : > { %v1059_v28 = vadd.f32 1e-05, %v1057_v27 }
 0x4d0   : > { %v1056_v29 = vpop.xlane.xlu1 %1055  ;;  %v1210_v62 = vpop.permute.xlu0 %1209 }
 0x4d1   : > { %2862 = vrsqrt.f32 %v1059_v28  ;;  %v1058_v30 = vmul.f32 0.03125, %v1056_v29 }
 0x4d3   : > { %v1060_v31 = vadd.f32 1e-05, %v1058_v30 }
 0x4d4   : > { %v1212_v63 = vpop.permute.xlu1 %1211  ;;  %v1285_v4 = vpop.permute.xlu0 %1284 }
 0x4d5   : > { %2864 = vrsqrt.f32 %v1060_v31 }
 0x4d8   : > { %v1287_v6 = vpop.permute.xlu1 %1286  ;;  %v1328_v8 = vpop.permute.xlu0 %1327 }
 0x4dc   : > { %v1330_v9 = vpop.permute.xlu1 %1329 }
 0x4de   : > { %v2863_v32 = vpop.eup %2862 }
 0x4df   : > { %v1063_v33 = vmul.f32 %v2863_v32, %v1047_v15 }
 0x4e1   : > { %v1069_v37 = vmul.f32 %v2464_v34, %v1063_v33 }
 0x4e2   : > { %v2865_v35 = vpop.eup %2864 }
 0x4e3   : > { %v1064_v36 = vmul.f32 %v2865_v35, %v1048_v19  ;;  %v1075_v40 = vadd.f32 %v2465_v38, %v1069_v37 }
 0x4e5   : > { %v1070_v39 = vmul.f32 %v2464_v34, %v1064_v36 }
 0x4e7   : > { %v1076_v41 = vadd.f32 %v2465_v38, %v1070_v39  ;;  %v3826_v38 = vmov 0.0   ;;  %v3828_v39 = vmov 0.0  }
 0x4e9   : > { %v1081_v42 = vpack.c.bf16 %v1076_v41, %v1075_v40 }
 0x4eb   : > { %2608 = vmatmul.mubr.msk.bf16.vlgmr.msra.gmra.mxu0 %vm830_vm0, %v1081_v42 }
 0x5ab   : > { %v1138_v44 = vpop.f32.mrf.mxu0 }
 0x5ac   : > { %v1139_v46 = vadd.f32 %v2466_v43, %v1138_v44 }
 0x5ad   : > { %v2609_v47 = vpop.f32.mrf.mxu0 }
 0x5ae   : > { %v2541_v48 = vpack.c.bf16 %v1139_v46, %v1139_v46  ;;  %v1168_v49 = vadd.f32 %v2472_v45, %v1139_v46  ;;  %v1175_v57 = vadd.f32 %v2473_v55, %v1139_v46 }
 0x5af   : > { %v1141_v50 = vpop.f32.mrf.mxu0 }
 0x5b0   : > { %v2543_v51 = vpack.c.bf16 %v1168_v49, %v1168_v49  ;;  %v1142_v52 = vadd.f32 %v2466_v43, %v1141_v50  ;;  %1238 = vrot.lane.b32.xlu1 %v2541_v48, %s3317_s0  ;;  %1151 = vrot.lane.b32.xlu0 %v2541_v48, %s3318_s22  ;;  %v3746_v58 = vpack.c.bf16 %v1175_v57, %v1175_v57 }
 0x5b1   : > { %v2610_v53 = vpop.f32.mrf.mxu0 }
 0x5b2   : > { %v1169_v54 = vadd.f32 %v2472_v45, %v1142_v52  ;;  %1188 = vst.msk [vmem:[#allocation2] sm:$0xf] %vm1187_vm3, %v2543_v51  ;;  %v2542_v59 = vpack.c.bf16 %v1142_v52, %v1142_v52  ;;  %v1176_v60 = vadd.f32 %v2473_v55, %v1142_v52 }
 0x5b4   : > { %v2544_v56 = vpack.c.bf16 %v1169_v54, %v1169_v54  ;;  %1275 = vrot.lane.b32.xlu1 %v2541_v48, %s3319_s30  ;;  %1217 = vrot.lane.b32.xlu0 %v2541_v48, %s4102_s21  ;;  %v3761_v61 = vpack.c.bf16 %v1176_v60, %v1176_v60 }
 0x5b6   : > { %1189 = vst.msk [vmem:[#allocation2 + $0x4] sm:$0xf] %vm1187_vm3, %v2544_v56 }
 0x5b8   : > { %1318 = vrot.lane.b32.xlu1 %v2541_v48, %s3321_s1  ;;  %1249 = vrot.lane.b32.xlu0 %v2541_v48, %s3322_s19 }
 0x5bc   : > { %1196 = vrot.lane.b32.xlu1 %v3746_v58, %s4101_s15  ;;  %1292 = vrot.lane.b32.xlu0 %v2541_v48, %s3323_s28 }
 0x5c0   : > { %1225 = vrot.lane.b32.xlu1 %v2543_v51, %s3315_s17  ;;  %1267 = vrot.lane.b32.xlu0 %v3746_v58, %s3315_s17 }
 0x5c4   : > { %1258 = vrot.lane.b32.xlu1 %v2543_v51, %s3316_s8  ;;  %1310 = vrot.lane.b32.xlu0 %v3746_v58, %s3316_s8 }
 0x5c8   : > { %1301 = vrot.lane.b32.xlu1 %v2543_v51, %s3324_s23  ;;  %1240 = vrot.lane.b32.xlu0 %v2542_v59, %s3317_s0 }
 0x5cc   : > { %1277 = vrot.lane.b32.xlu0 %v2542_v59, %s3319_s30  ;;  %1153 = vrot.lane.b32.xlu1 %v2542_v59, %s3318_s22 }
 0x5d0   : > { %1320 = vrot.lane.b32.xlu0 %v2542_v59, %s3321_s1  ;;  %1219 = vrot.lane.b32.xlu1 %v2542_v59, %s4102_s21 }
 0x5d4   : > { %1227 = vrot.lane.b32.xlu0 %v2544_v56, %s3315_s17  ;;  %1251 = vrot.lane.b32.xlu1 %v2542_v59, %s3322_s19 }
 0x5d8   : > { %1260 = vrot.lane.b32.xlu0 %v2544_v56, %s3316_s8  ;;  %1294 = vrot.lane.b32.xlu1 %v2542_v59, %s3323_s28 }
 0x5dc   : > { %1303 = vrot.lane.b32.xlu0 %v2544_v56, %s3324_s23  ;;  %1198 = vrot.lane.b32.xlu1 %v3761_v61, %s4101_s15 }
 0x5e0   : > { %1335 = vrot.lane.b32.xlu0 %v2541_v48, %s3325_s24  ;;  %1269 = vrot.lane.b32.xlu1 %v3761_v61, %s3315_s17  ;;  %s3824_s17 = scalar_lea.vmem [#allocation21], %s2444_s3 }
 0x5e4   : > { %1312 = vrot.lane.b32.xlu1 %v3761_v61, %s3316_s8  ;;  %s3830_s8 = smov 0  }
 0x5e8   : > { %1337 = vrot.lane.b32.xlu1 %v2542_v59, %s3325_s24 }
 0x622   : > { %v1239_v10 = vpop.permute.xlu1 %1238  ;;  %v1152_v12 = vpop.permute.xlu0 %1151 }
 0x623   : > { %1245 = vst.msk [vmem:[#allocation3 + $0x8] sm:$0xf] %vm1187_vm3, %v1239_v10  ;;  %1205 = vst.msk [vmem:[#allocation3] sm:$0xf] %vm1187_vm3, %v1152_v12 }
 0x624   : > { %1158 = vst.msk [vmem:[%s3771_s16] sm:$0xf] %vm1157_vm4, %v1152_v12 }
 0x625   : > { %1247 = vst.msk [vmem:[#allocation3 + $0x8] sm:$0xf] %vm1202_vm5, %v3721_v24  ;;  %1215 = vst.msk [vmem:[#allocation3] sm:$0xf] %vm1202_vm5, %v1210_v62 }
 0x626   : > { %1161 = vst.msk [vmem:[%s3771_s16] sm:$0xf] %vm1160_vm6, %v1152_v12  ;;  %v1276_v13 = vpop.permute.xlu1 %1275  ;;  %v1218_v14 = vpop.permute.xlu0 %1217 }
 0x627   : > { %1282 = vst.msk [vmem:[#allocation3 + $0x10] sm:$0xf] %vm1187_vm3, %v1276_v13  ;;  %1223 = vst.msk [vmem:[#allocation4] sm:$0xf] %vm1187_vm3, %v1218_v14 }
 0x628   : > { %1290 = vst.msk [vmem:[#allocation3 + $0x10] sm:$0xf] %vm1202_vm5, %v1285_v4 }
 0x62a   : > { %v1319_v15 = vpop.permute.xlu1 %1318  ;;  %v1250_v16 = vpop.permute.xlu0 %1249 }
 0x62b   : > { %1325 = vst.msk [vmem:[#allocation3 + $0x18] sm:$0xf] %vm1187_vm3, %v1319_v15  ;;  %1256 = vst.msk [vmem:[#allocation4 + $0x8] sm:$0xf] %vm1187_vm3, %v1250_v16 }
 0x62c   : > { %1333 = vst.msk [vmem:[#allocation3 + $0x18] sm:$0xf] %vm1202_vm5, %v1328_v8 }
 0x62e   : > { %v1197_v1 = vpop.permute.xlu1 %1196  ;;  %v1293_v17 = vpop.permute.xlu0 %1292 }
 0x62f   : > { %1203 = vst.msk [vmem:[#allocation2] sm:$0xf] %vm1202_vm5, %v1197_v1 }
 0x630   : > { %1299 = vst.msk [vmem:[#allocation4 + $0x10] sm:$0xf] %vm1187_vm3, %v1293_v17 }
 0x632   : > { %v1226_v19 = vpop.permute.xlu1 %1225  ;;  %v1268_v20 = vpop.permute.xlu0 %1267 }
 0x633   : > { %1232 = vst.msk [vmem:[#allocation2 + $0x8] sm:$0xf] %vm1187_vm3, %v1226_v19 }
 0x634   : > { %1236 = vst.msk [vmem:[#allocation2 + $0x8] sm:$0xf] %vm1202_vm5, %v3746_v58 }
 0x636   : > { %v1259_v21 = vpop.permute.xlu1 %1258  ;;  %v1311_v5 = vpop.permute.xlu0 %1310 }
 0x637   : > { %1265 = vst.msk [vmem:[#allocation2 + $0x10] sm:$0xf] %vm1187_vm3, %v1259_v21 }
 0x638   : > { %1273 = vst.msk [vmem:[#allocation2 + $0x10] sm:$0xf] %vm1202_vm5, %v1268_v20 }
 0x63a   : > { %v1302_v22 = vpop.permute.xlu1 %1301  ;;  %v1241_v23 = vpop.permute.xlu0 %1240 }
 0x63b   : > { %1308 = vst.msk [vmem:[#allocation2 + $0x18] sm:$0xf] %vm1187_vm3, %v1302_v22  ;;  %1246 = vst.msk [vmem:[#allocation3 + $0xc] sm:$0xf] %vm1187_vm3, %v1241_v23 }
 0x63c   : > { %1316 = vst.msk [vmem:[#allocation2 + $0x18] sm:$0xf] %vm1202_vm5, %v1311_v5  ;;  %1248 = vst.msk [vmem:[#allocation3 + $0xc] sm:$0xf] %vm1202_vm5, %v3723_v25 }
 0x63e   : > { %v1278_v24 = vpop.permute.xlu0 %1277  ;;  %v1154_v26 = vpop.permute.xlu1 %1153 }
 0x63f   : > { %1283 = vst.msk [vmem:[#allocation3 + $0x14] sm:$0xf] %vm1187_vm3, %v1278_v24  ;;  %1206 = vst.msk [vmem:[#allocation3 + $0x4] sm:$0xf] %vm1187_vm3, %v1154_v26 }
 0x640   : > { %1159 = vst.msk [vmem:[%s3771_s16 + $0x4] sm:$0xf] %vm1157_vm4, %v1154_v26 }
 0x641   : > { %1291 = vst.msk [vmem:[#allocation3 + $0x14] sm:$0xf] %vm1202_vm5, %v1287_v6  ;;  %1216 = vst.msk [vmem:[#allocation3 + $0x4] sm:$0xf] %vm1202_vm5, %v1212_v63 }
 0x642   : > { %1162 = vst.msk [vmem:[%s3771_s16 + $0x4] sm:$0xf] %vm1160_vm6, %v1154_v26  ;;  %v1321_v27 = vpop.permute.xlu0 %1320  ;;  %v1220_v28 = vpop.permute.xlu1 %1219 }
 0x643   : > { %1326 = vst.msk [vmem:[#allocation3 + $0x1c] sm:$0xf] %vm1187_vm3, %v1321_v27  ;;  %1224 = vst.msk [vmem:[#allocation4 + $0x4] sm:$0xf] %vm1187_vm3, %v1220_v28 }
 0x644   : > { %1334 = vst.msk [vmem:[#allocation3 + $0x1c] sm:$0xf] %vm1202_vm5, %v1330_v9 }
 0x646   : > { %v1228_v25 = vpop.permute.xlu0 %1227  ;;  %v1252_v29 = vpop.permute.xlu1 %1251 }
 0x647   : > { %1233 = vst.msk [vmem:[#allocation2 + $0xc] sm:$0xf] %vm1187_vm3, %v1228_v25  ;;  %1257 = vst.msk [vmem:[#allocation4 + $0xc] sm:$0xf] %vm1187_vm3, %v1252_v29 }
 0x648   : > { %1237 = vst.msk [vmem:[#allocation2 + $0xc] sm:$0xf] %vm1202_vm5, %v3761_v61 }
 0x64a   : > { %v1261_v30 = vpop.permute.xlu0 %1260  ;;  %v1295_v31 = vpop.permute.xlu1 %1294 }
 0x64b   : > { %1266 = vst.msk [vmem:[#allocation2 + $0x14] sm:$0xf] %vm1187_vm3, %v1261_v30  ;;  %1300 = vst.msk [vmem:[#allocation4 + $0x14] sm:$0xf] %vm1187_vm3, %v1295_v31 }
 0x64e   : > { %v1304_v32 = vpop.permute.xlu0 %1303  ;;  %v1199_v33 = vpop.permute.xlu1 %1198 }
 0x64f   : > { %1309 = vst.msk [vmem:[#allocation2 + $0x1c] sm:$0xf] %vm1187_vm3, %v1304_v32 }
 0x650   : > { %1204 = vst.msk [vmem:[#allocation2 + $0x4] sm:$0xf] %vm1202_vm5, %v1199_v33 }
 0x652   : > { %v1336_v34 = vpop.permute.xlu0 %1335  ;;  %v1270_v35 = vpop.permute.xlu1 %1269 }
 0x653   : > { %1342 = vst.msk [vmem:[#allocation4 + $0x18] sm:$0xf] %vm1187_vm3, %v1336_v34 }
 0x654   : > { %1274 = vst.msk [vmem:[#allocation2 + $0x14] sm:$0xf] %vm1202_vm5, %v1270_v35 }
 0x656   : > { %v1313_v36 = vpop.permute.xlu1 %1312 }
 0x657   : > { %1317 = vst.msk [vmem:[#allocation2 + $0x1c] sm:$0xf] %vm1202_vm5, %v1313_v36 }
 0x65a   : > { %v1338_v37 = vpop.permute.xlu1 %1337 }
 0x65b   : > { %1343 = vst.msk [vmem:[#allocation4 + $0x1c] sm:$0xf] %vm1187_vm3, %v1338_v37 }
 0x65c LB: >> { %v3326_v40 = vmov 0.0   ;;  %vm3327_vm7 = vmmov 0   ;;  %s3843_s3 = sshll.u32 %s3299_s8, 3  ;;  %vm1377_vm8 = vcmask 130048   ;;  %s2488_s19 = sshll.u32 %s3299_s8, 2  ;;  %vm1510_vm9 = vcmask 1043456   ;;  %s3299_s8 = sphi %s3830_s8, %s1349_s8   ;;  %v3295_v39 = vphi %v3828_v39, %v4152_v39   ;;  %v3291_v38 = vphi %v3826_v38, %v4151_v38  }
 0x65d   : >> { %2611 = vmatprep.subr.bf16.mxu0 %v3326_v40  ;;  %2613 = vmatprep.mubr.msk.bf16.mxu0 %vm3327_vm7, %v3326_v40  ;;  %s1358_s0 = scalar_lea.vmem [#allocation3], %s3843_s3  ;;  %s1354_s30 = scalar_lea.vmem [#allocation2], %s3843_s3  ;;  %vm1506_vm10 = vcmask 64512  }
 0x65e   : >> { %2617 = vmatprep.subr.bf16.mxu1 %v3326_v40  ;;  %2619 = vmatprep.mubr.msk.bf16.mxu1 %vm3327_vm7, %v3326_v40  ;;  %v2866_v41 = vld [vmem:[%s1358_s0] sm:$0xff]   ;;  %s1448_s1 = scalar_lea.vmem [#allocation4], %s3843_s3  ;;  %s1503_s24 = scalar_lea.vmem %s4082_s13, %s2488_s19 }
 0x65f   : >> { %v1382_v42 = vsel %vm1377_vm8, %v2866_v41, 0  ;;  %v2867_v43 = vld [vmem:[%s1354_s30] sm:$0xff]   ;;  %s1349_s8 = sadd.s32 1, %s3299_s8  }
 0x660   : >> { %2612 = vmatpush3.bf16.xpose.msra.mxu0 %v1382_v42  ;;  %v1504_v9 = vld [vmem:[%s1503_s24] sm:$0xf]  ;;  %p1346_p13 = scmp.ge.s32.totalorder %s1349_s8, 4  }
 0x661   : >> { %v1512_v14 = vsel %vm1510_vm9, %v1504_v9, 0  ;;  %v2490_v27 = vld [vmem:[#allocation15 + $0x1] ss:$0 sm:$0xff] (%p1346_p13)  ;;  %2629 = vmatprep.subr.bf16.mxu0 (%p1346_p13), %v3312_v18  ;;  %1708 = vst.msk [vmem:[#allocation5] sm:$0xff] (%p1346_p13), %vm830_vm0, %v3312_v18  ;;  %1709 = vst.msk [vmem:[#allocation5 + $0x18] sm:$0xff] (%p1346_p13), %vm830_vm0, %v3312_v18  ;;  %v3328_v29 = vmov (%p1346_p13), 0  }
 0x662   : >> { %v2868_v62 = vld [vmem:[%s1448_s1] sm:$0xff]   ;;  %2877 = vset.pattern.permute.xlu0 (%p1346_p13), %v3328_v29  ;;  %2878 = vset.pattern.permute.xlu1 (%p1346_p13), %v3328_v29  ;;  %s4153_s1 = sld [smem:[#allocation43_spill]] (%p1346_p13)  ;;  %s2551_s0 = sshll.u32 (%p1346_p13), %s3464_s29, 7 }
 0x663   : >> { %2618 = vmatpush3.bf16.msra.mxu1 %v2868_v62  ;;  %s4154_s9 = sld [smem:[#allocation44_spill]] (%p1346_p13)  ;;  %s2202_s24 = sshll.u32 (%p1346_p13), %s3771_s16, 4  ;;  %s3987_s24 = int_to_ptr.vmem [resolvable:$true] %s2202_s24 }
 0x664   : >> { %2623 = vmatprep.subr.bf16.mxu1 %v3326_v40  ;;  %s4155_s30 = sld [smem:[#allocation45_spill]] (%p1346_p13)  ;;  %s3165_s3 = scalar_lea.vmem (%p1346_p13), %s3987_s24, 128 }
 0x665   : > { %s4156_s28 = sld [smem:[#allocation47_spill]] (%p1346_p13)  ;;  %p3166_p1 = scmp.ne.s32.totalorder (%p1346_p13), %s3987_s24, %s3165_s3 }
 0x666   : > { %p4157_p2 = scmp.ne.s32.totalorder (%p1346_p13), %s4135_s20, 0  ;;  %s3329_s15 = smov (%p1346_p13), [#allocation22]  }
 0x667   : >> { %2614 = vmatmul.mubr.msk.bf16.vlgmr.msra.gmra.mxu0 %vm1377_vm8, %v2867_v43  ;;  %s3169_s21 = sshll.u32 (%p1346_p13), %s3329_s15, 4  ;;  %s3170_s21 = int_to_ptr.vmem [resolvable:$false] %s3169_s21 }
 0x668   : > { %2633 = vmatprep.mubr.msk.bf16.mxu0 (%p1346_p13), %vm3313_vm1, %v3312_v18  ;;  %p3167_p5 = pnand (%p1346_p13), %p3166_p1, %p4157_p2  ;;  %p3172_p6 = scmp.lt.s32.totalorder (%p1346_p13), %s3987_s24, %s3170_s21 }
 0x66a   : > { %p3168_p7 = pneg (%p1346_p13), %p3167_p5 }
 0x66b   : > { %s3984_s23 = scalar_lea.hbm (%p1346_p13), %s4156_s28, %s2551_s0 }
 0x727   : >> { %v1418_v44 = vpop.f32.mrf.mxu0 }
 0x728   : >> { %v1419_v45 = vadd.f32 %v3648_v0, %v1418_v44 }
 0x729   : >> { %v2615_v46 = vpop.f32.mrf.mxu0 }
 0x72a   : >> { %v1425_v47 = vsel %vm1377_vm8, %v1419_v45, -inf }
 0x72b   : >> { %1426 = vmax.xlane.f32.xlu0 %v1425_v47  ;;  %v1421_v48 = vpop.f32.mrf.mxu0  ;;  %v2491_v47 = vld [vmem:[#allocation11 + $0x2] ss:$0 sm:$0xff] (%p1346_p13) }
 0x72c   : >> { %v1422_v49 = vadd.f32 %v3648_v0, %v1421_v48 }
 0x72d   : >> { %v2616_v50 = vpop.f32.mrf.mxu0 }
 0x72e   : >> { %v1428_v51 = vsel %vm1377_vm8, %v1422_v49, -inf }
 0x72f   : >> { %1429 = vmax.xlane.f32.xlu0 %v1428_v51  ;;  %v2492_v51 = vld [vmem:[#allocation12 + $0x2] ss:$0 sm:$0xff] (%p1346_p13) }
 0x7b4   : >> { %v1427_v52 = vpop.xlane.xlu0 %1426 }
 0x7b5   : >> { %v1431_v53 = vsub.f32 %v1419_v45, %v1427_v52 }
 0x7b7   : >> { %v1433_v54 = vmul.f32 1.442695, %v1431_v53 }
 0x7b8   : >> { %v1430_v55 = vpop.xlane.xlu0 %1429 }
 0x7b9   : >> { %2869 = vpow2.f32 %v1433_v54  ;;  %v1432_v56 = vsub.f32 %v1422_v49, %v1430_v55 }
 0x7bb   : >> { %v1435_v57 = vmul.f32 1.442695, %v1432_v56 }
 0x7bd   : >> { %2871 = vpow2.f32 %v1435_v57 }
 0x7c6   : >> { %v2870_v58 = vpop.eup %2869 }
 0x7c7   : >> { %v1437_v59 = vsel %vm1377_vm8, %v2870_v58, 0.0 }
 0x7c8   : >> { %1438 = vadd.xlane.f32.xlu1 %v1437_v59 }
 0x7ca   : >> { %v2872_v60 = vpop.eup %2871 }
 0x7cb   : >> { %v1440_v61 = vsel %vm1377_vm8, %v2872_v60, 0.0 }
 0x7cc   : >> { %1441 = vadd.xlane.f32.xlu1 %v1440_v61  ;;  %v2493_v61 = vld [vmem:[#allocation18] ss:$0 sm:$0xff] (%p1346_p13) }
 0x851   : >> { %v1439_v63 = vpop.xlane.xlu1 %1438 }
 0x852   : >> { %2873 = vrcp.f32 %v1439_v63 }
 0x855   : >> { %v1442_v4 = vpop.xlane.xlu1 %1441 }
 0x856   : >> { %2875 = vrcp.f32 %v1442_v4 }
 0x85f   : >> { %v2874_v6 = vpop.eup %2873 }
 0x860   : >> { %v1445_v10 = vmul.f32 %v2874_v6, %v2870_v58 }
 0x863   : >> { %v2876_v8 = vpop.eup %2875 }
 0x864   : >> { %v1446_v12 = vmul.f32 %v2876_v8, %v2872_v60 }
 0x866   : >> { %v1451_v13 = vpack.c.bf16 %v1446_v12, %v1445_v10 }
 0x868   : >> { %2620 = vmatmul.mubr.msk.bf16.vlgmr.msra.gmra.mxu1 %vm1377_vm8, %v1451_v13 }
 0x869   : >> { %2624 = vmatpush3.bf16.msra.mxu1 %v1512_v14  ;;  %2625 = vmatprep.mubr.msk.bf16.mxu1 %vm3327_vm7, %v3326_v40  ;;  %v2880_v40 = vld [vmem:[%s4083_s14] sm:$0xff] (%p1346_p13)  }
 0x86a   : > { %2637 = vmatprep.subr.bf16.mxu1 (%p1346_p13), %v3312_v18 }
 0x928   : >> { %v1495_v15 = vpop.f32.mrf.mxu1 }
 0x92a   : >> { %v2621_v16 = vpop.f32.mrf.mxu1 }
 0x92c   : >> { %v1498_v1 = vpop.f32.mrf.mxu1 }
 0x92d   : >> { %v1505_v17 = vpack.c.bf16 %v1498_v1, %v1495_v15 }
 0x92e   : >> { %v2622_v19 = vpop.f32.mrf.mxu1 }
 0x92f   : >> { %2626 = vmatmul.mubr.msk.bf16.vlgmr.msra.gmra.mxu1 %vm1506_vm10, %v1505_v17 }
 0x930   : > { %2641 = vmatprep.mubr.msk.bf16.mxu1 (%p1346_p13), %vm3313_vm1, %v3312_v18 }
 0x9ef   : >> { %v1548_v20 = vpop.f32.mrf.mxu1 }
 0x9f0   : >> { %v1555_v21 = vadd.f32 %v3295_v39, %v1548_v20  }
 0x9f1   : >> { %v2627_v5 = vpop.f32.mrf.mxu1 }
 0x9f2   : >> { %v4152_v39 = vmov %v1555_v21  ;;  %1348 = sbr.rel (!%p1346_p13) target bundleno = 1628 (0x65c), region = 220  ;;  %v1557_v26 = vadd.f32 (%p1346_p13), %v1555_v21, %v3701_v7 }
 0x9f3   : >> { %v1551_v22 = vpop.f32.mrf.mxu1 }
 0x9f4   : >> { %v1556_v23 = vadd.f32 %v3291_v38, %v1551_v22   ;;  %v3884_v0 = vadd.f32 (%p1346_p13), %v2490_v27, %v1557_v26  ;;  %v2500_v22 = vld [vmem:[#allocation20] ss:$0 sm:$0xff] (%p1346_p13) }
 0x9f5   : >> { %v2628_v24 = vpop.f32.mrf.mxu1 }
 0x9f6   : >> { %v4151_v38 = vmov %v1556_v23  ;;  %v1558_v28 = vadd.f32 (%p1346_p13), %v1556_v23, %v3706_v11  ;;  %v1568_v11 = vsel (%p1346_p13), %vm830_vm0, %v3884_v0, 0.0  ;;  %v2499_v23 = vld [vmem:[#allocation15 + $0x2] ss:$0 sm:$0xff] (%p1346_p13) }
 0x9f7   : > { %1569 = vadd.xlane.f32.xlu0 %v1568_v11 }
 0x9f8   : > { %v3886_v7 = vadd.f32 %v2490_v27, %v1558_v28  ;;  %v2501_v27 = vld [vmem:[#allocation20 + $0x1] ss:$0 sm:$0xff] }
 0x9fa   : > { %v1571_v25 = vsel %vm830_vm0, %v3886_v7, 0.0 }
 0x9fb   : > { %1572 = vadd.xlane.f32.xlu0 %v1571_v25  ;;  %v2502_v25 = vld [vmem:[#allocation20 + $0x2] ss:$0 sm:$0xff] }
 0xa11   : > { %1608 = vperm.xlu0 %2877, %v3652_v2   ;;  %v2879_v2 = vld [vmem:[%s4083_s14 + $0x8] sm:$0xff]  }
 0xa12   : > { %2630 = vmatpush3.bf16.msra.mxu0 %v2879_v2 }
 0xa13   : > { %2631 = vmatprep.subr.bf16.mxu0 %v3312_v18 }
 0xa16   : > { %2632 = vmatpush3.bf16.msra.mxu0 %v2880_v40 }
 0xa17   : > { %2645 = vmatprep.subr.bf16.mxu0 %v3312_v18 }
 0xa80   : > { %v1570_v30 = vpop.xlane.xlu0 %1569 }
 0xa81   : > { %v1574_v31 = vmul.f32 0.03125, %v1570_v30 }
 0xa83   : > { %v1576_v32 = vsub.f32 %v3884_v0, %v1574_v31 }
 0xa84   : > { %v1573_v33 = vpop.xlane.xlu0 %1572 }
 0xa85   : > { %v1575_v34 = vmul.f32 0.03125, %v1573_v33  ;;  %v1578_v35 = vmul.f32 %v1576_v32, %v1576_v32 }
 0xa87   : > { %v1577_v36 = vsub.f32 %v3886_v7, %v1575_v34  ;;  %v1580_v37 = vsel %vm830_vm0, %v1578_v35, 0.0 }
 0xa88   : > { %1581 = vadd.xlane.f32.xlu1 %v1580_v37 }
 0xa89   : > { %v1579_v38 = vmul.f32 %v1577_v36, %v1577_v36 }
 0xa8b   : > { %v1583_v39 = vsel %vm830_vm0, %v1579_v38, 0.0  ;;  %v2504_v38 = vld [vmem:[#allocation20 + $0x4] ss:$0 sm:$0xff] }
 0xa8c   : > { %1584 = vadd.xlane.f32.xlu1 %v1583_v39  ;;  %v3906_v55 = vpop.permute.xlu0 %1608 }
 0xa9d   : > { %1613 = vperm.xlu1 %2878, %v3654_v3  }
 0xb11   : > { %v1582_v41 = vpop.xlane.xlu1 %1581 }
 0xb12   : > { %v1586_v42 = vmul.f32 0.03125, %v1582_v41 }
 0xb14   : > { %v1588_v43 = vadd.f32 1e-05, %v1586_v42 }
 0xb15   : > { %v1585_v44 = vpop.xlane.xlu1 %1584 }
 0xb16   : > { %2889 = vrsqrt.f32 %v1588_v43  ;;  %v1587_v3 = vmul.f32 0.03125, %v1585_v44  ;;  %v2505_v43 = vld [vmem:[#allocation20 + $0x5] ss:$0 sm:$0xff] }
 0xb18   : > { %v1589_v45 = vadd.f32 1e-05, %v1587_v3 }
 0xb19   : > { %v3908_v56 = vpop.permute.xlu1 %1613 }
 0xb1a   : > { %2891 = vrsqrt.f32 %v1589_v45 }
 0xb23   : > { %v2890_v46 = vpop.eup %2889 }
 0xb24   : > { %v1592_v48 = vmul.f32 %v2890_v46, %v1576_v32  ;;  %v2503_v32 = vld [vmem:[#allocation20 + $0x3] ss:$0 sm:$0xff] }
 0xb26   : > { %v1598_v49 = vmul.f32 %v2491_v47, %v1592_v48 }
 0xb27   : > { %v2892_v50 = vpop.eup %2891 }
 0xb28   : > { %v1593_v52 = vmul.f32 %v2892_v50, %v1577_v36  ;;  %v1604_v53 = vadd.f32 %v2492_v51, %v1598_v49  ;;  %v2506_v49 = vld [vmem:[#allocation20 + $0x6] ss:$0 sm:$0xff] }
 0xb2a   : > { %v1599_v54 = vmul.f32 %v2491_v47, %v1593_v52  ;;  %v1616_v58 = vmul.f32 %v3906_v55, %v1604_v53 }
 0xb2c   : > { %v1605_v57 = vadd.f32 %v2492_v51, %v1599_v54 }
 0xb2e   : > { %v1617_v59 = vmul.f32 %v3908_v56, %v1605_v57 }
 0xb30   : > { %v1622_v60 = vpack.c.bf16 %v1617_v59, %v1616_v58 }
 0xb32   : > { %2634 = vmatmul.mubr.msk.bf16.vlgmr.msra.gmra.mxu0 %vm830_vm0, %v1622_v60 }
 0xb33   : > { %2649 = vmatprep.mubr.msk.bf16.mxu0 %vm3313_vm1, %v3312_v18 }
 0xbf2   : > { %v1679_v62 = vpop.f32.mrf.mxu0 }
 0xbf3   : > { %v1680_v63 = vadd.f32 %v2493_v61, %v1679_v62 }
 0xbf4   : > { %v2635_v4 = vpop.f32.mrf.mxu0 }
 0xbf5   : > { %v2497_v6 = vmul.f32 -1.442695, %v1680_v63 }
 0xbf6   : > { %v1682_v8 = vpop.f32.mrf.mxu0 }
 0xbf7   : > { %2893 = vpow2.f32 %v2497_v6  ;;  %v1683_v9 = vadd.f32 %v2493_v61, %v1682_v8 }
 0xbf8   : > { %v2636_v10 = vpop.f32.mrf.mxu0 }
 0xbf9   : > { %v2498_v12 = vmul.f32 -1.442695, %v1683_v9 }
 0xbfb   : > { %2895 = vpow2.f32 %v2498_v12 }
 0xc04   : > { %v2894_v13 = vpop.eup %2893 }
 0xc05   : > { %v1692_v14 = vadd.f32 1.0, %v2894_v13 }
 0xc07   : > { %2897 = vrcp.f32 %v1692_v14 }
 0xc08   : > { %v2896_v15 = vpop.eup %2895 }
 0xc09   : > { %v1693_v16 = vadd.f32 1.0, %v2896_v15 }
 0xc0b   : > { %2899 = vrcp.f32 %v1693_v16 }
 0xc14   : > { %v2898_v1 = vpop.eup %2897 }
 0xc15   : > { %1700 = vrot.lane.b32.xlu1 %v2898_v1, %s3318_s22 }
 0xc18   : > { %v2900_v17 = vpop.eup %2899 }
 0xc19   : > { %1702 = vrot.lane.b32.xlu1 %v2900_v17, %s3318_s22 }
 0xc87   : > { %v1701_v19 = vpop.permute.xlu1 %1700 }
 0xc88   : > { %v1706_v20 = vmul.f32 %v1701_v19, %v1680_v63 }
 0xc8a   : > { %1710 = vst.msk [vmem:[#allocation5 + $0x8] sm:$0xff] %vm830_vm0, %v1706_v20 }
 0xc8b   : > { %v1703_v21 = vpop.permute.xlu1 %1702 }
 0xc8c   : > { %v1707_v5 = vmul.f32 %v1703_v21, %v1683_v9 }
 0xc8e   : > { %1711 = vst.msk [vmem:[#allocation5 + $0x10] sm:$0xff] %vm830_vm0, %v1707_v5 }
 0xc91   : > { %v1718_v24 = vld [vmem:[#allocation5 + $0x5] sm:$0xff] }
 0xc92   : > { %v1729_v26 = vld [vmem:[#allocation5 + $0x6] sm:$0xff]  ;;  %v1725_v28 = vmul.f32 %v2500_v22, %v1718_v24 }
 0xc93   : > { %v1740_v11 = vld [vmem:[#allocation5 + $0x7] sm:$0xff]  ;;  %v1736_v30 = vmul.f32 %v2501_v27, %v1729_v26 }
 0xc94   : > { %v1727_v29 = vadd.f32 %v2499_v23, %v1725_v28  ;;  %v1751_v31 = vld [vmem:[#allocation5 + $0x8] sm:$0xff]  ;;  %v1747_v34 = vmul.f32 %v2502_v25, %v1740_v11 }
 0xc95   : > { %v1719_v35 = vld [vmem:[#allocation5 + $0xd] sm:$0xff]  ;;  %v1758_v40 = vmul.f32 %v2503_v32, %v1751_v31 }
 0xc96   : > { %v1738_v33 = vadd.f32 %v1736_v30, %v1727_v29  ;;  %v1730_v36 = vld [vmem:[#allocation5 + $0xe] sm:$0xff]  ;;  %v1726_v39 = vmul.f32 %v2500_v22, %v1719_v35  ;;  %v2508_v35 = vld [vmem:[#allocation12 + $0x5] ss:$0 sm:$0xff] }
 0xc97   : > { %v1762_v37 = vld [vmem:[#allocation5 + $0x9] sm:$0xff]  ;;  %v1737_v3 = vmul.f32 %v2501_v27, %v1730_v36  ;;  %v1763_v54 = vld [vmem:[#allocation5 + $0x11] sm:$0xff]  ;;  %v2882_v27 = vld [vmem:[%s4153_s1] sm:$0xff]  }
 0xc98   : > { %v1749_v2 = vadd.f32 %v1747_v34, %v1738_v33  ;;  %v1741_v41 = vld [vmem:[#allocation5 + $0xf] sm:$0xff]  ;;  %v1728_v44 = vadd.f32 %v2499_v23, %v1726_v39  ;;  %v1769_v46 = vmul.f32 %v2504_v38, %v1762_v37  ;;  %v1770_v63 = vmul.f32 %v2504_v38, %v1763_v54 }
 0xc99   : > { %v1773_v42 = vld [vmem:[#allocation5 + $0xa] sm:$0xff]  ;;  %v1748_v51 = vmul.f32 %v2502_v25, %v1741_v41  ;;  %v1774_v61 = vld [vmem:[#allocation5 + $0x12] sm:$0xff] }
 0xc9a   : > { %v1760_v45 = vadd.f32 %v1758_v40, %v1749_v2  ;;  %v1752_v47 = vld [vmem:[#allocation5 + $0x10] sm:$0xff]  ;;  %v1739_v50 = vadd.f32 %v1737_v3, %v1728_v44  ;;  %v1780_v53 = vmul.f32 %v2505_v43, %v1773_v42  ;;  %v1781_v9 = vmul.f32 %v2505_v43, %v1774_v61  ;;  %v2881_v26 = vld [vmem:[%s4153_s1 + $0x8] sm:$0xff]   ;;  %s3171_s1 = scalar_lea.vmem %s3170_s21, 256 }
 0xc9b   : > { %v1784_v48 = vld [vmem:[#allocation5 + $0xb] sm:$0xff]  ;;  %v1759_v58 = vmul.f32 %v2503_v32, %v1752_v47  ;;  %v1785_v6 = vld [vmem:[#allocation5 + $0x13] sm:$0xff]  ;;  %2638 = vmatpush3.bf16.msra.mxu1 %v2881_v26  ;;  %p3173_p3 = scmp.lt.s32.totalorder %s3171_s1, %s3165_s3 }
 0xc9c   : > { %v1771_v52 = vadd.f32 %v1769_v46, %v1760_v45  ;;  %v1750_v57 = vadd.f32 %v1748_v51, %v1739_v50  ;;  %v1791_v60 = vmul.f32 %v2506_v49, %v1784_v48  ;;  %v1792_v13 = vmul.f32 %v2506_v49, %v1785_v6  ;;  %2639 = vmatprep.subr.bf16.mxu1 %v3312_v18  ;;  %v2507_v33 = vld [vmem:[#allocation11 + $0x5] ss:$0 sm:$0xff]  ;;  %v2511_v51 = vld [vmem:[#allocation15 + $0x3] ss:$0 sm:$0xff] }
 0xc9d   : > { %p3174_p0 = por %p3173_p3, %p3172_p6 }
 0xc9e   : > { %v1782_v59 = vadd.f32 %v1780_v53, %v1771_v52  ;;  %v1761_v62 = vadd.f32 %v1759_v58, %v1750_v57 }
 0xc9f   : > { %2640 = vmatpush3.bf16.msra.mxu1 %v2882_v27  ;;  %p3175_p4 = pnand %p3174_p0, %p3168_p7 }
 0xca0   : > { %v1793_v4 = vadd.f32 %v1791_v60, %v1782_v59  ;;  %v1772_v8 = vadd.f32 %v1770_v63, %v1761_v62  ;;  %2653 = vmatprep.subr.bf16.mxu1 %v3312_v18 }
 0xca2   : > { %v1797_v10 = vsel %vm830_vm0, %v1793_v4, 0.0  ;;  %v1783_v12 = vadd.f32 %v1781_v9, %v1772_v8 }
 0xca3   : > { %1798 = vadd.xlane.f32.xlu1 %v1797_v10 }
 0xca4   : > { %v1794_v14 = vadd.f32 %v1792_v13, %v1783_v12 }
 0xca6   : > { %v1800_v15 = vsel %vm830_vm0, %v1794_v14, 0.0 }
 0xca7   : > { %1801 = vadd.xlane.f32.xlu0 %v1800_v15  ;;  %v2883_v15 = vld [vmem:[%s4154_s9 + $0x8] sm:$0xff]  }
 0xca8   : > { %2646 = vmatpush3.bf16.msra.mxu0 %v2883_v15 }
 0xca9   : > { %2647 = vmatprep.subr.bf16.mxu0 %v3312_v18 }
 0xd2c   : > { %v1799_v16 = vpop.xlane.xlu1 %1798 }
 0xd2d   : > { %v1803_v1 = vmul.f32 0.03125, %v1799_v16  ;;  %v2884_v16 = vld [vmem:[%s4154_s9] sm:$0xff]  }
 0xd2e   : > { %2648 = vmatpush3.bf16.msra.mxu0 %v2884_v16 }
 0xd2f   : > { %v1805_v17 = vsub.f32 %v1793_v4, %v1803_v1 }
 0xd30   : > { %v1802_v19 = vpop.xlane.xlu0 %1801 }
 0xd31   : > { %v1807_v20 = vmul.f32 %v1805_v17, %v1805_v17  ;;  %v1804_v21 = vmul.f32 0.03125, %v1802_v19 }
 0xd33   : > { %v1809_v5 = vsel %vm830_vm0, %v1807_v20, 0.0  ;;  %v1806_v22 = vsub.f32 %v1794_v14, %v1804_v21 }
 0xd34   : > { %1810 = vadd.xlane.f32.xlu1 %v1809_v5 }
 0xd35   : > { %v1808_v23 = vmul.f32 %v1806_v22, %v1806_v22 }
 0xd37   : > { %v1812_v24 = vsel %vm830_vm0, %v1808_v23, 0.0 }
 0xd38   : > { %1813 = vadd.xlane.f32.xlu1 %v1812_v24  ;;  %v2515_v24 = vld [vmem:[#allocation11 + $0x3] ss:$0 sm:$0xff] }
 0xdbd   : > { %v1811_v28 = vpop.xlane.xlu1 %1810 }
 0xdbe   : > { %v1815_v11 = vmul.f32 0.03125, %v1811_v28 }
 0xdc0   : > { %v1817_v25 = vadd.f32 1e-05, %v1815_v11  ;;  %v2516_v11 = vld [vmem:[#allocation12 + $0x3] ss:$0 sm:$0xff] }
 0xdc1   : > { %v1814_v29 = vpop.xlane.xlu1 %1813 }
 0xdc2   : > { %2901 = vrsqrt.f32 %v1817_v25  ;;  %v1816_v30 = vmul.f32 0.03125, %v1814_v29 }
 0xdc4   : > { %v1818_v31 = vadd.f32 1e-05, %v1816_v30 }
 0xdc6   : > { %2903 = vrsqrt.f32 %v1818_v31 }
 0xdcf   : > { %v2902_v32 = vpop.eup %2901 }
 0xdd0   : > { %v1821_v34 = vmul.f32 %v2902_v32, %v1805_v17  ;;  %v2885_v32 = vld [vmem:[%s4155_s30 + $0x18] sm:$0xff]  }
 0xdd2   : > { %v1827_v36 = vmul.f32 %v2507_v33, %v1821_v34  ;;  %v2887_v34 = vld [vmem:[%s4155_s30 + $0x8] sm:$0xff]  }
 0xdd3   : > { %v2904_v37 = vpop.eup %2903 }
 0xdd4   : > { %v1833_v38 = vadd.f32 %v2508_v35, %v1827_v36  ;;  %v1822_v39 = vmul.f32 %v2904_v37, %v1806_v22  ;;  %v2517_v36 = vld [vmem:[#allocation14 + $0x1] ss:$0 sm:$0xff] }
 0xdd6   : > { %v2509_v2 = vmul.f32 -1.442695, %v1833_v38  ;;  %v1828_v40 = vmul.f32 %v2507_v33, %v1822_v39  ;;  %v2886_v33 = vld [vmem:[%s4155_s30 + $0x10] sm:$0xff]  }
 0xdd8   : > { %2905 = vpow2.f32 %v2509_v2  ;;  %v1834_v41 = vadd.f32 %v2508_v35, %v1828_v40  ;;  %v2888_v35 = vld [vmem:[%s4155_s30] sm:$0xff]  }
 0xdda   : > { %v2510_v42 = vmul.f32 -1.442695, %v1834_v41 }
 0xddc   : > { %2907 = vpow2.f32 %v2510_v42 }
 0xde5   : > { %v2906_v43 = vpop.eup %2905 }
 0xde6   : > { %v1841_v44 = vadd.f32 1.0, %v2906_v43 }
 0xde8   : > { %2909 = vrcp.f32 %v1841_v44 }
 0xde9   : > { %v2908_v3 = vpop.eup %2907 }
 0xdea   : > { %v1842_v45 = vadd.f32 1.0, %v2908_v3 }
 0xdec   : > { %2911 = vrcp.f32 %v1842_v45 }
 0xdf5   : > { %v2910_v46 = vpop.eup %2909 }
 0xdf6   : > { %v1847_v48 = vmul.f32 %v2910_v46, %v1833_v38 }
 0xdf9   : > { %v2912_v47 = vpop.eup %2911 }
 0xdfa   : > { %v1848_v49 = vmul.f32 %v2912_v47, %v1834_v41 }
 0xdfc   : > { %v1853_v50 = vpack.c.bf16 %v1848_v49, %v1847_v48 }
 0xdfe   : > { %2642 = vmatmul.mubr.msk.bf16.vlgmr.msra.gmra.mxu1 %vm830_vm0, %v1853_v50 }
 0xdff   : > { %2661 = vmatprep.mubr.msk.bf16.mxu1 %vm3313_vm1, %v3312_v18  ;;  %2654 = vmatpush3.bf16.msra.mxu1 %v2885_v32 }
 0xe00   : > { %2655 = vmatprep.subr.bf16.mxu1 %v3312_v18 }
 0xe03   : > { %2656 = vmatpush3.bf16.msra.mxu1 %v2886_v33 }
 0xe04   : > { %2657 = vmatprep.subr.bf16.mxu1 %v3312_v18 }
 0xe07   : > { %2658 = vmatpush3.bf16.msra.mxu1 %v2887_v34 }
 0xe08   : > { %2659 = vmatprep.subr.bf16.mxu1 %v3312_v18 }
 0xe0b   : > { %2660 = vmatpush3.bf16.msra.mxu1 %v2888_v35 }
 0xebe   : > { %v1908_v52 = vpop.f32.mrf.mxu1 }
 0xebf   : > { %v1909_v53 = vadd.f32 %v2511_v51, %v1908_v52 }
 0xec0   : > { %v2643_v54 = vpop.f32.mrf.mxu1 }
 0xec1   : > { %v1915_v57 = vmul.f32 %v1909_v53, %v3906_v55 }
 0xec2   : > { %v1911_v58 = vpop.f32.mrf.mxu1 }
 0xec3   : > { %v3936_v59 = vadd.f32 %v1915_v57, %v3884_v0  ;;  %v1912_v60 = vadd.f32 %v2511_v51, %v1911_v58  ;;  %v2523_v51 = vld [vmem:[#allocation15 + $0x4] ss:$0 sm:$0xff] }
 0xec4   : > { %v2644_v61 = vpop.f32.mrf.mxu1 }
 0xec5   : > { %v1916_v62 = vmul.f32 %v1912_v60, %v3908_v56  ;;  %v1921_v63 = vsel %vm830_vm0, %v3936_v59, 0.0 }
 0xec6   : > { %1922 = vadd.xlane.f32.xlu1 %v1921_v63 }
 0xec7   : > { %v3942_v4 = vadd.f32 %v1916_v62, %v3886_v7 }
 0xec9   : > { %v1924_v6 = vsel %vm830_vm0, %v3942_v4, 0.0 }
 0xeca   : > { %1925 = vadd.xlane.f32.xlu1 %v1924_v6 }
 0xf4f   : > { %v1923_v55 = vpop.xlane.xlu1 %1922 }
 0xf50   : > { %v1927_v8 = vmul.f32 0.03125, %v1923_v55 }
 0xf52   : > { %v1929_v0 = vsub.f32 %v3936_v59, %v1927_v8 }
 0xf53   : > { %v1926_v9 = vpop.xlane.xlu1 %1925 }
 0xf54   : > { %v1928_v10 = vmul.f32 0.03125, %v1926_v9  ;;  %v1931_v12 = vmul.f32 %v1929_v0, %v1929_v0 }
 0xf56   : > { %v1930_v56 = vsub.f32 %v3942_v4, %v1928_v10  ;;  %v1933_v13 = vsel %vm830_vm0, %v1931_v12, 0.0 }
 0xf57   : > { %1934 = vadd.xlane.f32.xlu0 %v1933_v13 }
 0xf58   : > { %v1932_v14 = vmul.f32 %v1930_v56, %v1930_v56 }
 0xf5a   : > { %v1936_v7 = vsel %vm830_vm0, %v1932_v14, 0.0 }
 0xf5b   : > { %1937 = vadd.xlane.f32.xlu1 %v1936_v7 }
 0xfe0   : > { %v1935_v1 = vpop.xlane.xlu0 %1934 }
 0xfe1   : > { %v1939_v17 = vmul.f32 0.03125, %v1935_v1 }
 0xfe3   : > { %v1941_v19 = vadd.f32 1e-05, %v1939_v17 }
 0xfe4   : > { %v1938_v20 = vpop.xlane.xlu1 %1937 }
 0xfe5   : > { %2913 = vrsqrt.f32 %v1941_v19  ;;  %v1940_v21 = vmul.f32 0.03125, %v1938_v20 }
 0xfe7   : > { %v1942_v5 = vadd.f32 1e-05, %v1940_v21 }
 0xfe9   : > { %2915 = vrsqrt.f32 %v1942_v5 }
 0xff2   : > { %v2914_v22 = vpop.eup %2913 }
 0xff3   : > { %v1945_v23 = vmul.f32 %v2914_v22, %v1929_v0 }
 0xff5   : > { %v1951_v28 = vmul.f32 %v2515_v24, %v1945_v23 }
 0xff6   : > { %v2916_v26 = vpop.eup %2915 }
 0xff7   : > { %v1946_v27 = vmul.f32 %v2916_v26, %v1930_v56  ;;  %v1957_v29 = vadd.f32 %v2516_v11, %v1951_v28 }
 0xff9   : > { %v1952_v25 = vmul.f32 %v2515_v24, %v1946_v27 }
 0xffb   : > { %v1958_v30 = vadd.f32 %v2516_v11, %v1952_v25 }
 0xffd   : > { %v1963_v31 = vpack.c.bf16 %v1958_v30, %v1957_v29 }
 0xfff   : > { %2650 = vmatmul.mubr.msk.bf16.vlgmr.msra.gmra.mxu0 %vm830_vm0, %v1963_v31 }
0x10bf   : > { %v2018_v37 = vpop.f32.mrf.mxu0 }
0x10c0   : > { %v2019_v38 = vadd.f32 %v2517_v36, %v2018_v37 }
0x10c1   : > { %v2651_v39 = vpop.f32.mrf.mxu0 }
0x10c2   : > { %v2521_v2 = vmul.f32 -1.442695, %v2019_v38 }
0x10c3   : > { %v2021_v40 = vpop.f32.mrf.mxu0 }
0x10c4   : > { %2917 = vpow2.f32 %v2521_v2  ;;  %v2022_v41 = vadd.f32 %v2517_v36, %v2021_v40 }
0x10c5   : > { %v2652_v42 = vpop.f32.mrf.mxu0 }
0x10c6   : > { %v2522_v43 = vmul.f32 -1.442695, %v2022_v41 }
0x10c8   : > { %2919 = vpow2.f32 %v2522_v43 }
0x10d1   : > { %v2918_v44 = vpop.eup %2917 }
0x10d2   : > { %v2031_v3 = vadd.f32 1.0, %v2918_v44 }
0x10d4   : > { %2921 = vrcp.f32 %v2031_v3 }
0x10d5   : > { %v2920_v45 = vpop.eup %2919 }
0x10d6   : > { %v2032_v18 = vadd.f32 1.0, %v2920_v45 }
0x10d8   : > { %2923 = vrcp.f32 %v2032_v18 }
0x10e1   : > { %v2922_v46 = vpop.eup %2921 }
0x10e2   : > { %v2037_v48 = vmul.f32 %v2922_v46, %v2019_v38 }
0x10e5   : > { %v2924_v47 = vpop.eup %2923 }
0x10e6   : > { %v2038_v49 = vmul.f32 %v2924_v47, %v2022_v41 }
0x10e8   : > { %v2047_v50 = vpack.c.bf16 %v2038_v49, %v2037_v48 }
0x10ea   : > { %2662 = vmatmul.mubr.msk.bf16.vlgmr.msra.gmra.mxu1 %vm988_vm2, %v2047_v50 }
0x11aa   : > { %v2114_v52 = vpop.f32.mrf.mxu1 }
0x11ab   : > { %v2115_v53 = vadd.f32 %v2523_v51, %v2114_v52 }
0x11ac   : > { %v2663_v54 = vpop.f32.mrf.mxu1 }
0x11ad   : > { %v2121_v57 = vmul.f32 0.5, %v2115_v53 }
0x11ae   : > { %v2117_v58 = vpop.f32.mrf.mxu1 }
0x11af   : > { %v2118_v60 = vadd.f32 %v2523_v51, %v2117_v58  ;;  %v2123_v61 = vadd.f32 %v2121_v57, %v3936_v59 }
0x11b0   : > { %v2664_v62 = vpop.f32.mrf.mxu1 }
0x11b1   : > { %v2122_v63 = vmul.f32 0.5, %v2118_v60  ;;  %v2127_v6 = vsel %vm830_vm0, %v2123_v61, 0.0 }
0x11b2   : > { %2128 = vadd.xlane.f32.xlu0 %v2127_v6 }
0x11b3   : > { %v2124_v55 = vadd.f32 %v2122_v63, %v3942_v4 }
0x11b5   : > { %v2130_v8 = vsel %vm830_vm0, %v2124_v55, 0.0 }
0x11b6   : > { %2131 = vadd.xlane.f32.xlu1 %v2130_v8 }
0x123b   : > { %v2129_v0 = vpop.xlane.xlu0 %2128 }
0x123c   : > { %v2133_v9 = vmul.f32 0.03125, %v2129_v0 }
0x123e   : > { %v2135_v10 = vsub.f32 %v2123_v61, %v2133_v9 }
0x123f   : > { %v2132_v12 = vpop.xlane.xlu1 %2131 }
0x1240   : > { %v2134_v56 = vmul.f32 0.03125, %v2132_v12  ;;  %v2137_v59 = vmul.f32 %v2135_v10, %v2135_v10 }
0x1242   : > { %v2136_v13 = vsub.f32 %v2124_v55, %v2134_v56  ;;  %v2139_v14 = vsel %vm830_vm0, %v2137_v59, 0.0 }
0x1243   : > { %2140 = vadd.xlane.f32.xlu0 %v2139_v14 }
0x1244   : > { %v2138_v7 = vmul.f32 %v2136_v13, %v2136_v13 }
0x1246   : > { %v2142_v15 = vsel %vm830_vm0, %v2138_v7, 0.0 }
0x1247   : > { %2143 = vadd.xlane.f32.xlu1 %v2142_v15 }
0x1248   : > { %3178 = shalt.err (!%p3175_p4)
}
0x1249   : > { %s3179_s16 = scalar_lea.hbm %s3984_s23, 128  ;;  %s3183_s15 = scalar_lea.hbm %s4156_s28, 256 }
0x124a   : > { %p3180_p8 = scmp.ne.s32.totalorder %s3984_s23, %s3179_s16  ;;  %p3184_p10 = scmp.lt.s32.totalorder %s3984_s23, %s4156_s28 }
0x124b   : > { %p3185_p12 = scmp.lt.s32.totalorder %s3183_s15, %s3179_s16 }
0x124c   : > { %p3181_p9 = pnand %p3180_p8, %p4157_p2 }
0x124d   : > { %p3186_p13 = por %p3185_p12, %p3184_p10 }
0x124e   : > { %p3182_p11 = pneg %p3181_p9 }
0x1250   : > { %p3187_p1 = pnand %p3186_p13, %p3182_p11 }
0x1252   : > { %3190 = shalt.err (!%p3187_p1)
}
0x1253   : > { %s3330_s21 = smov 4   ;;  %s4158_s1 = smov 64   ;;  %v2529_v5 = vld [vmem:[#allocation11 + $0x4] ss:$0 sm:$0xff]  ;;  %v2530_v23 = vld [vmem:[#allocation12 + $0x4] ss:$0 sm:$0xff] }
0x1254   : > { %s4159_s3 = scalar_lea.sflag [#allocation23], %s3616_s12  ;;  %s4160_s0 = sld [smem:[#allocation46_spill]] }
0x1255   : > { %2700 = dma.vmem_to_hbm [thread:$0]  (%p4157_p2), %s3987_s24, 128, %s3984_s23, %s4159_s3, %s4158_s1, %s4158_s1, %s3330_s21  }
0x1256   : > { %s2550_s23 = sshll.u32 %s3464_s29, 8  ;;  %s2186_s24 = sshll.u32 %s3824_s17, 4  ;;  %s4023_s24 = int_to_ptr.vmem [resolvable:$true] %s2186_s24 }
0x1257   : > { %s2168_s15 = scalar_lea.sflag [#allocation8], %s3616_s12  ;;  %s3191_s19 = scalar_lea.vmem %s4023_s24, 256 }
0x1258   : > { %p3192_p5 = scmp.ne.s32.totalorder %s4023_s24, %s3191_s19  ;;  %s3331_s29 = smov [#allocation21]  }
0x1259   : > { %s3195_s21 = sshll.u32 %s3331_s29, 4  ;;  %s3196_s21 = int_to_ptr.vmem [resolvable:$false] %s3195_s21 }
0x125a   : > { %s4021_s22 = scalar_lea.hbm %s4160_s0, %s2550_s23  ;;  %p3193_p7 = pnand %p3192_p5, %p4157_p2 }
0x125b   : > { %s3197_s1 = scalar_lea.vmem %s3196_s21, 512  ;;  %p3198_p3 = scmp.lt.s32.totalorder %s4023_s24, %s3196_s21 }
0x125c   : > { %p3194_p6 = pneg %p3193_p7  ;;  %p3199_p0 = scmp.lt.s32.totalorder %s3197_s1, %s3191_s19 }
0x125e   : > { %p3200_p4 = por %p3199_p0, %p3198_p3 }
0x1260   : > { %p3201_p8 = pnand %p3200_p4, %p3194_p6 }
0x12cc   : > { %v2141_v4 = vpop.xlane.xlu0 %2140 }
0x12cd   : > { %v2145_v16 = vmul.f32 0.03125, %v2141_v4 }
0x12cf   : > { %v2147_v1 = vadd.f32 1e-05, %v2145_v16 }
0x12d0   : > { %v2144_v17 = vpop.xlane.xlu1 %2143 }
0x12d1   : > { %2925 = vrsqrt.f32 %v2147_v1  ;;  %v2146_v19 = vmul.f32 0.03125, %v2144_v17 }
0x12d3   : > { %v2148_v20 = vadd.f32 1e-05, %v2146_v19 }
0x12d5   : > { %2927 = vrsqrt.f32 %v2148_v20 }
0x12de   : > { %v2926_v21 = vpop.eup %2925 }
0x12df   : > { %v2151_v22 = vmul.f32 %v2926_v21, %v2135_v10 }
0x12e1   : > { %v2157_v24 = vmul.f32 %v2529_v5, %v2151_v22 }
0x12e2   : > { %v2928_v26 = vpop.eup %2927 }
0x12e3   : > { %v2152_v27 = vmul.f32 %v2928_v26, %v2136_v13  ;;  %v2163_v28 = vadd.f32 %v2530_v23, %v2157_v24 }
0x12e5   : > { %v2158_v11 = vmul.f32 %v2529_v5, %v2152_v27  ;;  %2165 = vst.msk [vmem:[%s3824_s17] sm:$0xff] %vm830_vm0, %v2163_v28 }
0x12e7   : > { %v2164_v25 = vadd.f32 %v2530_v23, %v2158_v11 }
0x12e9   : > { %2166 = vst.msk [vmem:[%s3824_s17 + $0x8] sm:$0xff] %vm830_vm0, %v2164_v25 }
0x12ea   : > { %3204 = shalt.err (!%p3201_p8)
}
0x12eb   : > { %s3205_s17 = scalar_lea.hbm %s4021_s22, 256  ;;  %s3209_s8 = scalar_lea.hbm %s4160_s0, 512 }
0x12ec   : > { %p3206_p9 = scmp.ne.s32.totalorder %s4021_s22, %s3205_s17  ;;  %p3210_p12 = scmp.lt.s32.totalorder %s4021_s22, %s4160_s0 }
0x12ed   : > { %p3211_p13 = scmp.lt.s32.totalorder %s3209_s8, %s3205_s17 }
0x12ee   : > { %p3207_p11 = pnand %p3206_p9, %p4157_p2 }
0x12ef   : > { %p3212_p1 = por %p3211_p13, %p3210_p12 }
0x12f0   : > { %p3208_p10 = pneg %p3207_p11 }
0x12f2   : > { %p3213_p5 = pnand %p3212_p1, %p3208_p10 }
0x12f4   : > { %3216 = shalt.err (!%p3213_p5)
}
0x12f5   : > { %s3332_s19 = smov 128   ;;  %s4161_s21 = smov 8  }
0x12f6   : > { %2699 = dma.vmem_to_hbm [thread:$0]  (%p4157_p2), %s4023_s24, 256, %s4021_s22, %s2168_s15, %s3332_s19, %s3332_s19, %s4161_s21  }
0x12f7 PF: > { %s2217_s1 = sand.u32 1, %s3275_s2   ;;  %p4162_p7 = scmp.ne.s32.totalorder %s4136_s18, 0 }
0x12f8   : > { %p4163_p6 = scmp.ge.s32.totalorder %s3287_s27, 2  ;;  %s2218_s17 = scalar_lea.sflag [#allocation8], %s2217_s1 }
0x12fa   : > { %p2733_p3 = pnand %p4163_p6, %p4162_p7 }
0x12fc   : > { %p2734_p0 = pneg %p2733_p3 }
0x12fe   : > { %3266 = dma.done.wait (%p2734_p0), %s2218_s17, 256  }
0x12ff   : > { %3268 = vsyncadd (%p2734_p0), %s2218_s17, 4294967040  ;;  %s2227_s3 = scalar_lea.sflag [#allocation23], %s2217_s1 }
0x1300   : > { %3270 = dma.done.wait (%p2734_p0), %s2227_s3, 128  }
0x1301   : > { %3272 = vsyncadd (%p2734_p0), %s2227_s3, 4294967168  ;;  %s4164_s20 = sld [smem:[#allocation31_spill]]  ;;  %p42_p2 = scmp.ge.s32.totalorder %s3553_s5, 4  }
0x1302   : > { %s4165_s2 = smov %s3279_s25  ;;  %s4166_s25 = smov %s3283_s26 }
0x1303   : > { %s4168_s27 = smov %s3553_s5  ;;  %44 = sbr.rel (!%p42_p2) target bundleno = 28 (0x1c), region = 231 }
0x1307   : > { %s4167_s26 = smov %s4164_s20 }
0x1308   :  { %2232 = vsyncpa [#allocation7], 1 }
0x1309   :  { %2234 = vsyncpa [#allocation7 + $0x1], 1 }
0x130a   :  { %2235 = vsyncpa [#allocation10], 1 }
0x130b   :  { %2236 = vsyncpa [#allocation13], 1 }
0x130c   :  { %2237 = vsyncpa [#allocation16], 1 }
0x130d   :  { %2238 = vsyncpa [#allocation19], 1 }
0x130e   :  { %2239 = vsyncpa [#allocation8], 1 }
0x130f   :  { %2241 = vsyncpa [#allocation8 + $0x1], 1 }
0x1310   :  { %2242 = vsyncpa [#allocation23], 1 }
0x1311   :  { %2244 = vsyncpa [#allocation23 + $0x1], 1 }

// kernel: tpu_custom_call.1
= control target key start
LH: loop header
LB: loop body
LE: loop exit
PB: predicated region body
PF: predicated region fallthrough
CT: control target
= control target key end

     0   :  { %s4069_s0 = inlined_call_operand.vmem [shape: f32[2,16,32], index: 0, kind: input, shape index: {}]   ;;  %s4070_s1 = inlined_call_operand.hbm [shape: f32[2,1,16], index: 1, kind: input, shape index: {}]   ;;  %s4071_s2 = inlined_call_operand.vmem [shape: f32[2,16,1], index: 2, kind: input, shape index: {}]   ;;  %s4072_s3 = inlined_call_operand.hbm [shape: bf16[16,32], index: 3, kind: input, shape index: {}]   ;;  %s4073_s4 = inlined_call_operand.hbm [shape: f32[6,32], index: 4, kind: input, shape index: {}]   ;;  %s4074_s5 = inlined_call_operand.hbm [shape: f32[6,32], index: 5, kind: input, shape index: {}]   ;;  %s4075_s6 = inlined_call_operand.vmem [shape: bf16[32,64], index: 6, kind: input, shape index: {}]   ;;  %s4076_s7 = inlined_call_operand.vmem [shape: bf16[64,32], index: 7, kind: input, shape index: {}]   ;;  %s4077_s8 = inlined_call_operand.hbm [shape: f32[2,64], index: 8, kind: input, shape index: {}]   ;;  %s4078_s9 = inlined_call_operand.hbm [shape: f32[5,32], index: 9, kind: input, shape index: {}]   ;;  %s4079_s10 = inlined_call_operand.vmem [shape: bf16[32,96], index: 10, kind: input, shape index: {}]   ;;  %s4080_s11 = inlined_call_operand.vmem [shape: f32[1,96], index: 11, kind: input, shape index: {}]   ;;  %s4081_s12 = inlined_call_operand.hbm [shape: f32[2,32], index: 12, kind: input, shape index: {}]   ;;  %s4082_s13 = inlined_call_operand.vmem [shape: bf16[4,8,32], index: 13, kind: input, shape index: {}]   ;;  %s4083_s14 = inlined_call_operand.vmem [shape: bf16[32,64], index: 14, kind: input, shape index: {}]   ;;  %s4084_s15 = inlined_call_operand.hbm [shape: f32[1,64], index: 15, kind: input, shape index: {}]   ;;  %s4085_s16 = inlined_call_operand.hbm [shape: f32[7,32], index: 16, kind: input, shape index: {}]   ;;  %s4086_s17 = inlined_call_operand.vmem [shape: bf16[32,32], index: 17, kind: input, shape index: {}]   ;;  %s4087_s18 = inlined_call_operand.vmem [shape: bf16[32,64], index: 18, kind: input, shape index: {}]   ;;  %s4088_s19 = inlined_call_operand.vmem [shape: bf16[64,32], index: 19, kind: input, shape index: {}]   ;;  %s4089_s20 = inlined_call_operand.hbm [shape: f32[2,16,32], index: 20, kind: output, shape index: {0}]   ;;  %s4090_s21 = inlined_call_operand.hbm [shape: bf16[2,16,64], index: 21, kind: output, shape index: {1}]  }
   0x1   :  { %4104 = sst [smem:[#allocation32_spill]] %s4069_s0 }
   0x2   :  { %4105 = sst [smem:[#allocation33_spill]] %s4070_s1 }
   0x3   :  { %4106 = sst [smem:[#allocation34_spill]] %s4071_s2 }
   0x4   :  { %4107 = sst [smem:[#allocation35_spill]] %s4072_s3 }
   0x5   :  { %4108 = sst [smem:[#allocation36_spill]] %s4073_s4 }
   0x6   :  { %4109 = sst [smem:[#allocation37_spill]] %s4074_s5 }
   0x7   :  { %4110 = sst [smem:[#allocation38_spill]] %s4077_s8 }
   0x8   :  { %4111 = sst [smem:[#allocation39_spill]] %s4078_s9 }
   0x9   :  { %4112 = sst [smem:[#allocation40_spill]] %s4081_s12 }
   0xa   :  { %4113 = sst [smem:[#allocation41_spill]] %s4084_s15 }
   0xb   :  { %4114 = sst [smem:[#allocation42_spill]] %s4085_s16 }
   0xc   :  { %4115 = sst [smem:[#allocation43_spill]] %s4086_s17 }
   0xd   :  { %4116 = sst [smem:[#allocation44_spill]] %s4087_s18 }
   0xe   :  { %4117 = sst [smem:[#allocation45_spill]] %s4088_s19 }
   0xf   :  { %4118 = sst [smem:[#allocation46_spill]] %s4089_s20 }
  0x10   :  { %4119 = sst [smem:[#allocation47_spill]] %s4090_s21 }
  0x11   :  { %27 = vsyncpa [#allocation7], 0 }
  0x12   :  { %29 = vsyncpa [#allocation7 + $0x1], 0 }
  0x13   :  { %30 = vsyncpa [#allocation10], 0 }
  0x14   :  { %31 = vsyncpa [#allocation13], 0 }
  0x15   :  { %32 = vsyncpa [#allocation16], 0 }
  0x16   :  { %33 = vsyncpa [#allocation19], 0 }
  0x17   :  { %34 = vsyncpa [#allocation8], 0 }
  0x18   :  { %36 = vsyncpa [#allocation8 + $0x1], 0 }
  0x19   :  { %37 = vsyncpa [#allocation23], 0 }
  0x1a   :  { %39 = vsyncpa [#allocation23 + $0x1], 0  ;;  %s3443_s2 = smov 0   ;;  %s3445_s25 = smov 0  }
  0x1b   :  { %s3447_s26 = smov 0   ;;  %s3449_s27 = smov 0  }
  0x1c LB: > { %s3301_s3 = smov [#allocation9]   ;;  %s3464_s29 = sadd.s32 4294967295, %s3287_s27   ;;  %s3287_s27 = sphi %s3449_s27, %s4168_s27   ;;  %s3283_s26 = sphi %s3447_s26, %s4167_s26   ;;  %s3279_s25 = sphi %s3445_s25, %s4166_s25   ;;  %s3275_s2 = sphi %s3443_s2, %s4165_s2  }
  0x1d   : > { %s549_s28 = sshll.u32 %s3301_s3, 4  ;;  %p2424_p0 = scmp.ge.s32.totalorder %s3287_s27, 1  ;;  %s550_s28 = int_to_ptr.vmem [resolvable:$true] %s549_s28 }
  0x1e   : > { %p4095_p1 = scmp.eq.s32.totalorder %s3464_s29, 0  ;;  %p537_p2 = scmp.lt.s32.totalorder %s3287_s27, 3 }
  0x1f   : > { %s3302_s4 = smov [#allocation12]   ;;  %s3303_s22 = smov [#allocation15]  }
  0x20   : > { %p3469_p3 = pnand %p2424_p0, %p537_p2  ;;  %s574_s30 = sshll.u32 %s3302_s4, 4  ;;  %s575_s30 = int_to_ptr.vmem [resolvable:$true] %s574_s30 }
  0x21   : > { %s602_s23 = sshll.u32 %s3303_s22, 4  ;;  %s2940_s24 = scalar_lea.vmem %s550_s28, 128  ;;  %s3482_s23 = int_to_ptr.vmem [resolvable:$true] %s602_s23 }
  0x22   : > { %s4120_s0 = scalar_select %p3469_p3, 1, 0 }
  0x23   : > { %p2703_p5 = pneg %p3469_p3  ;;  %p2941_p8 = scmp.ne.s32.totalorder %s550_s28, %s2940_s24 }
  0x24   : > { %p2948_p11 = scmp.lt.s32.totalorder %s550_s28, %s550_s28  ;;  %p2949_p12 = scmp.lt.s32.totalorder %s2940_s24, %s2940_s24 }
  0x25   : > { %p3478_p6 = pnand %p2703_p5, %p4095_p1 }
  0x26   : > { %p2950_p13 = por %p2949_p12, %p2948_p11 }
  0x27   : > { %p3486_p7 = pneg %p3478_p6 }
  0x29   : > { %p2943_p9 = pnand %p2941_p8, %p3486_p7 }
  0x2b   : > { %p2944_p10 = pneg %p2943_p9 }
  0x2d   : > { %p2951_p0 = pnand %p2950_p13, %p2944_p10 }
  0x2f   : > { %2954 = shalt.err (!%p2951_p0)
}
  0x30   : > { %s3304_s3 = smov 64   ;;  %s3305_s4 = smov 4  }
  0x31   : > { %s4123_s21 = sld [smem:[#allocation35_spill]]  ;;  %s2966_s19 = scalar_lea.vmem %s575_s30, 128 }
  0x32   : > { %p2967_p2 = scmp.ne.s32.totalorder %s575_s30, %s2966_s19  ;;  %p2974_p9 = scmp.lt.s32.totalorder %s575_s30, %s575_s30 }
  0x33   : > { %p2975_p4 = scmp.lt.s32.totalorder %s2966_s19, %s2966_s19 }
  0x34   : > { %p2969_p5 = pnand %p2967_p2, %p3486_p7 }
  0x35   : > { %p2976_p1 = por %p2975_p4, %p2974_p9 }
  0x36   : > { %p2970_p8 = pneg %p2969_p5 }
  0x37   : > { %2706 = dma.hbm_to_vmem [thread:$0]  (!%p3478_p6), %s4123_s21, 128, %s550_s28, [#allocation10], %s3304_s3, %s3304_s3, %s3305_s4  }
  0x38   : > { %p2977_p11 = pnand %p2976_p1, %p2970_p8 }
  0x3a   : > { %2980 = shalt.err (!%p2977_p11)
}
  0x3b   : > { %s4124_s17 = sld [smem:[#allocation37_spill]]  ;;  %s2992_s20 = scalar_lea.vmem %s3482_s23, 128 }
  0x3c   : > { %p2993_p10 = scmp.ne.s32.totalorder %s3482_s23, %s2992_s20  ;;  %p3000_p0 = scmp.lt.s32.totalorder %s3482_s23, %s3482_s23 }
  0x3d   : > { %p3001_p4 = scmp.lt.s32.totalorder %s2992_s20, %s2992_s20 }
  0x3e   : > { %p2995_p12 = pnand %p2993_p10, %p3486_p7 }
  0x3f   : > { %p3002_p1 = por %p3001_p4, %p3000_p0 }
  0x40   : > { %p2996_p13 = pneg %p2995_p12 }
  0x41   : > { %2712 = dma.hbm_to_vmem [thread:$0]  (!%p3478_p6), %s4124_s17, 128, %s575_s30, [#allocation13]  }
  0x42   : > { %p3003_p2 = pnand %p3002_p1, %p2996_p13 }
  0x44   : > { %3006 = shalt.err (!%p3003_p2)
}
  0x45   : > { %s4125_s9 = sld [smem:[#allocation39_spill]]  ;;  %s3306_s17 = smov [#allocation18]  }
  0x46   : > { %s636_s21 = sshll.u32 %s3306_s17, 4  ;;  %s3307_s28 = smov [#allocation11]   ;;  %s637_s21 = int_to_ptr.vmem [resolvable:$true] %s636_s21 }
  0x47   : > { %s563_s30 = sshll.u32 %s3307_s28, 4  ;;  %s3018_s3 = scalar_lea.vmem %s637_s21, 16  ;;  %s564_s30 = int_to_ptr.vmem [resolvable:$true] %s563_s30 }
  0x48   : > { %p3019_p5 = scmp.ne.s32.totalorder %s637_s21, %s3018_s3  ;;  %s3025_s4 = scalar_lea.vmem %s637_s21, 32 }
  0x49   : > { %p3026_p11 = scmp.lt.s32.totalorder %s637_s21, %s637_s21  ;;  %p3027_p10 = scmp.lt.s32.totalorder %s3025_s4, %s3018_s3 }
  0x4a   : > { %p3021_p8 = pnand %p3019_p5, %p3486_p7 }
  0x4b   : > { %2718 = dma.hbm_to_vmem [thread:$0]  (!%p3478_p6), %s4125_s9, 128, %s3482_s23, [#allocation16]  }
  0x4c   : > { %p3022_p9 = pneg %p3021_p8  ;;  %p3028_p12 = por %p3027_p10, %p3026_p11 }
  0x4e   : > { %p3029_p13 = pnand %p3028_p12, %p3022_p9 }
  0x50   : > { %3032 = shalt.err (!%p3029_p13)
}
  0x51   : > { %s4126_s15 = sld [smem:[#allocation41_spill]]  ;;  %s3044_s24 = scalar_lea.vmem %s564_s30, 128 }
  0x52   : > { %p3045_p0 = scmp.ne.s32.totalorder %s564_s30, %s3044_s24  ;;  %p3052_p2 = scmp.lt.s32.totalorder %s564_s30, %s564_s30 }
  0x53   : > { %p3053_p5 = scmp.lt.s32.totalorder %s3044_s24, %s3044_s24 }
  0x54   : > { %p3047_p4 = pnand %p3045_p0, %p3486_p7 }
  0x55   : > { %p3054_p8 = por %p3053_p5, %p3052_p2 }
  0x56   : > { %p3048_p1 = pneg %p3047_p4 }
  0x57   : > { %2724 = dma.hbm_to_vmem [thread:$0]  (!%p3478_p6), %s4126_s15, 16, %s637_s21, [#allocation19]  }
  0x58   : > { %p3055_p3 = pnand %p3054_p8, %p3048_p1 }
  0x5a   : > { %3058 = shalt.err (!%p3055_p3)
}
  0x5b   : > { %s4127_s19 = sld [smem:[#allocation36_spill]]  ;;  %s3308_s17 = smov [#allocation14]  }
  0x5c   : > { %s591_s21 = sshll.u32 %s3308_s17, 4  ;;  %s3309_s28 = smov [#allocation17]   ;;  %s592_s21 = int_to_ptr.vmem [resolvable:$true] %s591_s21 }
  0x5d   : > { %s619_s3 = sshll.u32 %s3309_s28, 4  ;;  %s3070_s4 = scalar_lea.vmem %s592_s21, 32  ;;  %s620_s3 = int_to_ptr.vmem [resolvable:$true] %s619_s3 }
  0x5e   : > { %p3071_p9 = scmp.ne.s32.totalorder %s592_s21, %s3070_s4  ;;  %p3078_p12 = scmp.lt.s32.totalorder %s592_s21, %s592_s21 }
  0x5f   : > { %p3079_p13 = scmp.lt.s32.totalorder %s3070_s4, %s3070_s4 }
  0x60   : > { %p3073_p11 = pnand %p3071_p9, %p3486_p7 }
  0x61   : > { %2709 = dma.hbm_to_vmem [thread:$0]  (!%p3478_p6), %s4127_s19, 128, %s564_s30, [#allocation10]  }
  0x62   : > { %p3074_p10 = pneg %p3073_p11  ;;  %p3080_p3 = por %p3079_p13, %p3078_p12 }
  0x64   : > { %p3081_p0 = pnand %p3080_p3, %p3074_p10 }
  0x66   : > { %3084 = shalt.err (!%p3081_p0)
}
  0x67   : > { %s4128_s8 = sld [smem:[#allocation38_spill]]  ;;  %s3096_s30 = scalar_lea.vmem %s620_s3, 32 }
  0x68   : > { %p3097_p4 = scmp.ne.s32.totalorder %s620_s3, %s3096_s30  ;;  %p3104_p5 = scmp.lt.s32.totalorder %s620_s3, %s620_s3 }
  0x69   : > { %p3105_p8 = scmp.lt.s32.totalorder %s3096_s30, %s3096_s30 }
  0x6a   : > { %p3099_p1 = pnand %p3097_p4, %p3486_p7 }
  0x6b   : > { %p3106_p9 = por %p3105_p8, %p3104_p5 }
  0x6c   : > { %p3100_p2 = pneg %p3099_p1 }
  0x6d   : > { %2715 = dma.hbm_to_vmem [thread:$0]  (!%p3478_p6), %s4128_s8, 32, %s592_s21, [#allocation13]  }
  0x6e   : > { %p3107_p11 = pnand %p3106_p9, %p3100_p2 }
  0x70   : > { %3110 = shalt.err (!%p3107_p11)
}
  0x71   : > { %s4129_s12 = sld [smem:[#allocation40_spill]]  ;;  %s3310_s18 = smov [#allocation20]  }
  0x72   : > { %s647_s19 = sshll.u32 %s3310_s18, 4  ;;  %s648_s19 = int_to_ptr.vmem [resolvable:$true] %s647_s19 }
  0x73   : > { %s3122_s17 = scalar_lea.vmem %s648_s19, 128  ;;  %p3130_p3 = scmp.lt.s32.totalorder %s648_s19, %s648_s19 }
  0x74   : > { %p3123_p10 = scmp.ne.s32.totalorder %s648_s19, %s3122_s17  ;;  %p3131_p0 = scmp.lt.s32.totalorder %s3122_s17, %s3122_s17 }
  0x76   : > { %p3125_p12 = pnand %p3123_p10, %p3486_p7  ;;  %p3132_p4 = por %p3131_p0, %p3130_p3 }
  0x77   : > { %2721 = dma.hbm_to_vmem [thread:$0]  (!%p3478_p6), %s4129_s12, 32, %s620_s3, [#allocation16]  }
  0x78   : > { %p3126_p13 = pneg %p3125_p12 }
  0x7a   : > { %p3133_p1 = pnand %p3132_p4, %p3126_p13 }
  0x7c   : > { %3136 = shalt.err (!%p3133_p1)
}
  0x7d   : > { %s4130_s16 = sld [smem:[#allocation42_spill]]  ;;  %s2423_s1 = sadd.s32 4294967294, %s3287_s27  }
  0x7e   : > { %s3553_s5 = sadd.s32 1, %s3287_s27   ;;  %s78_s4 = sadd.s32 1, %s3283_s26 }
  0x7f   : > { %s75_s3 = ssub.s32 %s3287_s27, %s3553_s5  ;;  %p85_p2 = scmp.ne.s32.totalorder %s3283_s26, %s3279_s25 }
  0x80   : > { %p76_p7 = scmp.eq.s32.totalorder %s75_s3, 0  ;;  %p86_p5 = scmp.eq.s32.totalorder %s3287_s27, 0 }
  0x81   : > { %p91_p8 = scmp.ne.s32.totalorder %s3279_s25, %s3275_s2  ;;  %p4133_p11 = scmp.eq.s32.totalorder %s3464_s29, 0 }
  0x82   : > { %s3564_s22 = scalar_select %p76_p7, %s3283_s26, %s78_s4  }
  0x83   : > { %2727 = dma.hbm_to_vmem [thread:$0]  (!%p3478_p6), %s4130_s16, 128, %s648_s19, [#allocation19]  }
  0x84   : > { %4131 = sst [smem:[#allocation31_spill]] %s3564_s22  ;;  %p3566_p9 = por %p86_p5, %p85_p2 }
  0x85   : > { %p3572_p6 = por %p4133_p11, %p91_p8  ;;  %p498_p10 = scmp.eq.s32.totalorder %s3464_s29, 1 }
  0x86   : > { %p504_p12 = scmp.eq.s32.totalorder %s2423_s1, 1  ;;  %p2747_p13 = scmp.lt.s32.totalorder %s3287_s27, 2 }
  0x87   : > { %s4134_s30 = scalar_select %p3572_p6, 1, 0 }
  0x88   : > { %s675_s24 = sand.u32 1, %s3283_s26   ;;  %p3579_p3 = por %p498_p10, %p85_p2 }
  0x89   : > { %p3583_p0 = por %p504_p12, %p91_p8  ;;  %s2434_s19 = sshll.u32 %s3287_s27, 4 }
  0x8a   : > { %s4135_s20 = scalar_select %p3579_p3, 1, 0 }
  0x8b   : > { %s4136_s18 = scalar_select %p3583_p0, 1, 0 }
  0x8c   : > { %s678_s17 = scalar_lea.vmem [#allocation6], %s675_s24  ;;  %s4137_s4 = sld [smem:[#allocation33_spill]] }
  0x8d   : > { %s685_s21 = sshll.u32 %s678_s17, 4  ;;  %p3595_p4 = pnand %p2747_p13, %p3566_p9  ;;  %s686_s21 = int_to_ptr.vmem [resolvable:$true] %s685_s21 }
  0x8e   : > { %s676_s9 = scalar_lea.sflag [#allocation7], %s675_s24 }
  0x8f   : > { %p3139_p7 = pneg %p3595_p4 }
  0x92   : > { %s3591_s8 = scalar_lea.hbm %s4137_s4, %s2434_s19  ;;  %s3142_s28 = scalar_lea.hbm %s4137_s4, 32 }
  0x93   : > { %s3137_s12 = scalar_lea.hbm %s3591_s8, 16  ;;  %p3143_p8 = scmp.lt.s32.totalorder %s3591_s8, %s4137_s4 }
  0x94   : > { %p3138_p1 = scmp.ne.s32.totalorder %s3591_s8, %s3137_s12  ;;  %p3144_p9 = scmp.lt.s32.totalorder %s3142_s28, %s3137_s12 }
  0x96   : > { %p3140_p2 = pnand %p3139_p7, %p3138_p1  ;;  %p3145_p11 = por %p3144_p9, %p3143_p8 }
  0x98   : > { %p3141_p5 = pneg %p3140_p2 }
  0x9a   : > { %p3146_p10 = pnand %p3145_p11, %p3141_p5 }
  0x9c   : > { %3149 = shalt.err (!%p3146_p10)
}
  0x9d   : > { %s3150_s23 = scalar_lea.vmem %s686_s21, 16  ;;  %s3311_s24 = smov [#allocation6]  }
  0x9e   : > { %p3151_p12 = scmp.ne.s32.totalorder %s686_s21, %s3150_s23  ;;  %s3155_s16 = sshll.u32 %s3311_s24, 4  ;;  %s3156_s16 = int_to_ptr.vmem [resolvable:$false] %s3155_s16 }
  0x9f   : > { %s3157_s22 = scalar_lea.vmem %s3156_s16, 32  ;;  %p3158_p1 = scmp.lt.s32.totalorder %s686_s21, %s3156_s16 }
  0xa0   : > { %p3153_p13 = pnand %p3151_p12, %p3139_p7  ;;  %p3159_p2 = scmp.lt.s32.totalorder %s3157_s22, %s3150_s23 }
  0xa2   : > { %p3154_p0 = pneg %p3153_p13  ;;  %p3160_p3 = por %p3159_p2, %p3158_p1 }
  0xa4   : > { %p3161_p6 = pnand %p3160_p3, %p3154_p0 }
  0xa6   : > { %3164 = shalt.err (!%p3161_p6)
}
  0xa7   : > { %2731 = dma.hbm_to_vmem [thread:$0]  (!%p3595_p4), %s3591_s8, 16, %s686_s21, %s676_s9  }
  0xa8   : > { %p4139_p5 = scmp.ne.s32.totalorder %s4120_s0, 0 }
  0xa9   : > { %s3616_s12 = sand.u32 (!%p4139_p5), 1, %s3279_s25   ;;  %p4140_p7 = scmp.ne.s32.totalorder (!%p4139_p5), %s4134_s30, 0 }
  0xaa   : > { %702 = sbr.rel (%p4139_p5) target bundleno = 4855 (0x12f7), region = 100  ;;  %s705_s15 = scalar_lea.sflag (!%p4139_p5), [#allocation7], %s3616_s12 }
  0xab   : > { %s707_s17 = scalar_lea.vmem (!%p4139_p5), [#allocation6], %s3616_s12 }
  0xaf   : > { %3246 = dma.done.wait (%p4140_p7), %s705_s15, 16  }
  0xb0   : > { %3248 = vsyncadd (%p4140_p7), %s705_s15, 4294967280  ;;  %p4141_p6 = scmp.eq.s32.totalorder %s3464_s29, 0 }
  0xb2   : > { %3250 = dma.done.wait (%p4141_p6), [#allocation10], 256   ;;  %p4142_p3 = pmov %p4141_p6 }
  0xb4   : > { %3252 = vsyncadd (%p4142_p3), [#allocation10], 4294967040  ;;  %p4143_p0 = pmov %p4142_p3 }
  0xb6   : > { %3254 = dma.done.wait (%p4143_p0), [#allocation13], 160   ;;  %p4144_p4 = pmov %p4143_p0 }
  0xb7   : > { %p4145_p8 = pmov %p4143_p0 }
  0xb8   : > { %3256 = vsyncadd (%p4144_p4), [#allocation13], 4294967136 }
  0xb9   : > { %3258 = dma.done.wait (%p4145_p8), [#allocation16], 160   ;;  %p4146_p9 = pmov %p4143_p0 }
  0xba   : > { %p4147_p11 = pmov %p4143_p0 }
  0xbb   : > { %3260 = vsyncadd (%p4146_p9), [#allocation16], 4294967136 }
  0xbc   : > { %3262 = dma.done.wait (%p4147_p11), [#allocation19], 144   ;;  %p4148_p10 = pmov %p4143_p0 }
  0xbd   : > { %p812_p12 = scmp.lt.s32.totalorder %s3464_s29, 1  ;;  %s4149_s22 = sld [smem:[#allocation32_spill]]  ;;  %vm830_vm0 = vcmask 261120   ;;  %v3648_v0 = vld [vmem:[%s707_s17] ss:$0 sm:$0xff]  ;;  %v2842_v17 = vld [vmem:[%s4075_s6 + $0x8] sm:$0xff]  }
  0xbe   : > { %3264 = vsyncadd (%p4148_p10), [#allocation19], 4294967152  ;;  %s4150_s19 = sld [smem:[#allocation34_spill]]  ;;  %s2444_s3 = sshll.u32 %s3616_s12, 4  ;;  %v3312_v18 = vmov 0.0   ;;  %vm3313_vm1 = vmmov 0  }
  0xbf   : > { %s813_s8 = scalar_select %p812_p12, %s3464_s29, 1  ;;  %2583 = vmatprep.subr.bf16.mxu0 %v3312_v18  ;;  %2587 = vmatprep.mubr.msk.bf16.mxu0 %vm3313_vm1, %v3312_v18  ;;  %v2843_v19 = vld [vmem:[%s4075_s6] sm:$0xff]   ;;  %v2450_v28 = vld [vmem:[#allocation11] ss:$0 sm:$0xff]  ;;  %v2451_v32 = vld [vmem:[#allocation12] ss:$0 sm:$0xff] }
  0xc0   : > { %2584 = vmatpush3.bf16.msra.mxu0 %v2842_v17  ;;  %2591 = vmatprep.subr.bf16.mxu1 %v3312_v18  ;;  %v2844_v37 = vld [vmem:[%s4076_s7 + $0x18] sm:$0xff]   ;;  %v2845_v38 = vld [vmem:[%s4076_s7 + $0x10] sm:$0xff]   ;;  %v2846_v39 = vld [vmem:[%s4076_s7 + $0x8] sm:$0xff]   ;;  %vm988_vm2 = vcmask 523264   ;;  %s4101_s15 = smov 8   ;;  %s3315_s17 = smov 120  }
  0xc1   : > { %s2539_s9 = sshll.u32 %s813_s8, 4  ;;  %2585 = vmatprep.subr.bf16.mxu0 %v3312_v18  ;;  %2599 = vmatprep.mubr.msk.bf16.mxu1 %vm3313_vm1, %v3312_v18  ;;  %v2847_v40 = vld [vmem:[%s4076_s7] sm:$0xff]   ;;  %v2452_v41 = vld [vmem:[#allocation14] ss:$0 sm:$0xff]  ;;  %v2458_v59 = vld [vmem:[#allocation15] ss:$0 sm:$0xff] }
  0xc2   : > { %2592 = vmatpush3.bf16.msra.mxu1 %v2844_v37  ;;  %s3316_s8 = smov 112   ;;  %vm1187_vm3 = vcmask 60416   ;;  %s3317_s0 = smov 88   ;;  %vm1157_vm4 = vcmask 257024   ;;  %vm1202_vm5 = vcmask 126016   ;;  %vm1160_vm6 = vcmask 519424  }
  0xc3   : > { %s816_s30 = scalar_lea.vmem %s4149_s22, %s2539_s9  ;;  %2593 = vmatprep.subr.bf16.mxu1 %v3312_v18  ;;  %s3318_s22 = smov 96  }
  0xc4   : > { %s821_s28 = scalar_lea.vmem %s4150_s19, %s2539_s9  ;;  %v3650_v1 = vld [vmem:[%s816_s30] sm:$0xff]  ;;  %v3658_v5 = vld [vmem:[%s816_s30 + $0x8] sm:$0xff]  ;;  %2586 = vmatpush3.bf16.msra.mxu0 %v2843_v19  ;;  %s3319_s30 = smov 80  }
  0xc5   : > { %v3652_v2 = vld [vmem:[%s821_s28] sm:$0xff]  ;;  %v3654_v3 = vld [vmem:[%s821_s28 + $0x8] sm:$0xff]  ;;  %v831_v4 = vsel %vm830_vm0, %v3650_v1, 0.0  ;;  %v834_v6 = vsel %vm830_vm0, %v3658_v5, 0.0  ;;  %2603 = vmatprep.subr.bf16.mxu0 %v3312_v18  ;;  %s4102_s21 = smov 64   ;;  %s3321_s1 = smov 72  }
  0xc6   : > { %832 = vadd.xlane.f32.xlu0 %v831_v4  ;;  %2594 = vmatpush3.bf16.msra.mxu1 %v2845_v38  ;;  %v2465_v38 = vld [vmem:[#allocation12 + $0x1] ss:$0 sm:$0xff]  ;;  %s3322_s19 = smov 56   ;;  %s3323_s28 = smov 48  }
  0xc7   : > { %2595 = vmatprep.subr.bf16.mxu1 %v3312_v18  ;;  %s3324_s23 = smov 104   ;;  %s3325_s24 = smov 40  }
  0xc8   : > { %s2445_s9 = sshll.u32 %s3616_s12, 3 }
  0xc9   : > { %s3771_s16 = scalar_lea.vmem [#allocation22], %s2445_s9 }
  0xca   : > { %835 = vadd.xlane.f32.xlu0 %v834_v6  ;;  %2596 = vmatpush3.bf16.msra.mxu1 %v2846_v39 }
  0xcb   : > { %2597 = vmatprep.subr.bf16.mxu1 %v3312_v18 }
  0xce   : > { %2598 = vmatpush3.bf16.msra.mxu1 %v2847_v40 }
 0x14f   : > { %v833_v7 = vpop.xlane.xlu0 %832 }
 0x150   : > { %v838_v8 = vmul.f32 0.03125, %v833_v7 }
 0x152   : > { %v840_v9 = vsub.f32 %v3650_v1, %v838_v8 }
 0x153   : > { %v836_v10 = vpop.xlane.xlu0 %835 }
 0x154   : > { %v839_v11 = vmul.f32 0.03125, %v836_v10  ;;  %v842_v12 = vmul.f32 %v840_v9, %v840_v9 }
 0x156   : > { %v841_v13 = vsub.f32 %v3658_v5, %v839_v11  ;;  %v844_v14 = vsel %vm830_vm0, %v842_v12, 0.0 }
 0x157   : > { %845 = vadd.xlane.f32.xlu1 %v844_v14 }
 0x158   : > { %v843_v15 = vmul.f32 %v841_v13, %v841_v13 }
 0x15a   : > { %v847_v16 = vsel %vm830_vm0, %v843_v15, 0.0 }
 0x15b   : > { %848 = vadd.xlane.f32.xlu1 %v847_v16 }
 0x1e0   : > { %v846_v20 = vpop.xlane.xlu1 %845 }
 0x1e1   : > { %v850_v21 = vmul.f32 0.03125, %v846_v20 }
 0x1e3   : > { %v852_v22 = vadd.f32 1e-05, %v850_v21 }
 0x1e4   : > { %v849_v23 = vpop.xlane.xlu1 %848 }
 0x1e5   : > { %2850 = vrsqrt.f32 %v852_v22  ;;  %v851_v24 = vmul.f32 0.03125, %v849_v23  ;;  %v2848_v22 = vld [vmem:[%s4079_s10 + $0x8] sm:$0xff]   ;;  %v2849_v23 = vld [vmem:[%s4079_s10] sm:$0xff]  }
 0x1e7   : > { %v853_v25 = vadd.f32 1e-05, %v851_v24  ;;  %v3721_v24 = vld [vmem:[#allocation9] sm:$0xf] }
 0x1e9   : > { %2852 = vrsqrt.f32 %v853_v25  ;;  %v3723_v25 = vld [vmem:[#allocation9 + $0x4] sm:$0xf] }
 0x1f2   : > { %v2851_v26 = vpop.eup %2850 }
 0x1f3   : > { %v856_v27 = vmul.f32 %v2851_v26, %v840_v9 }
 0x1f5   : > { %v862_v31 = vmul.f32 %v2450_v28, %v856_v27 }
 0x1f6   : > { %v2853_v29 = vpop.eup %2852 }
 0x1f7   : > { %v857_v30 = vmul.f32 %v2853_v29, %v841_v13  ;;  %v868_v34 = vadd.f32 %v2451_v32, %v862_v31 }
 0x1f9   : > { %v863_v33 = vmul.f32 %v2450_v28, %v857_v30 }
 0x1fb   : > { %v869_v35 = vadd.f32 %v2451_v32, %v863_v33 }
 0x1fd   : > { %v874_v36 = vpack.c.bf16 %v869_v35, %v868_v34  ;;  %v2464_v34 = vld [vmem:[#allocation11 + $0x1] ss:$0 sm:$0xff] }
 0x1ff   : > { %2588 = vmatmul.mubr.msk.bf16.vlgmr.msra.gmra.mxu0 %vm830_vm0, %v874_v36 }
 0x200   : > { %2607 = vmatprep.mubr.msk.bf16.mxu0 %vm3313_vm1, %v3312_v18  ;;  %2604 = vmatpush3.bf16.msra.mxu0 %v2848_v22 }
 0x201   : > { %2605 = vmatprep.subr.bf16.mxu0 %v3312_v18 }
 0x204   : > { %2606 = vmatpush3.bf16.msra.mxu0 %v2849_v23 }
 0x2bf   : > { %v929_v42 = vpop.f32.mrf.mxu0 }
 0x2c0   : > { %v930_v43 = vadd.f32 %v2452_v41, %v929_v42 }
 0x2c1   : > { %v2589_v44 = vpop.f32.mrf.mxu0 }
 0x2c2   : > { %v2456_v45 = vmul.f32 -1.442695, %v930_v43 }
 0x2c3   : > { %v932_v46 = vpop.f32.mrf.mxu0 }
 0x2c4   : > { %2854 = vpow2.f32 %v2456_v45  ;;  %v933_v47 = vadd.f32 %v2452_v41, %v932_v46  ;;  %v2472_v45 = vld [vmem:[#allocation17] ss:$0 sm:$0xff] }
 0x2c5   : > { %v2590_v48 = vpop.f32.mrf.mxu0 }
 0x2c6   : > { %v2457_v49 = vmul.f32 -1.442695, %v933_v47 }
 0x2c8   : > { %2856 = vpow2.f32 %v2457_v49 }
 0x2d1   : > { %v2855_v50 = vpop.eup %2854 }
 0x2d2   : > { %v942_v51 = vadd.f32 1.0, %v2855_v50 }
 0x2d4   : > { %2858 = vrcp.f32 %v942_v51 }
 0x2d5   : > { %v2857_v52 = vpop.eup %2856 }
 0x2d6   : > { %v943_v53 = vadd.f32 1.0, %v2857_v52 }
 0x2d8   : > { %2860 = vrcp.f32 %v943_v53 }
 0x2e1   : > { %v2859_v54 = vpop.eup %2858 }
 0x2e2   : > { %v948_v56 = vmul.f32 %v2859_v54, %v930_v43  ;;  %v2466_v43 = vld [vmem:[%s4080_s11] ss:$0 sm:$0xff] }
 0x2e5   : > { %v2861_v55 = vpop.eup %2860 }
 0x2e6   : > { %v949_v57 = vmul.f32 %v2861_v55, %v933_v47  ;;  %v2473_v55 = vld [vmem:[#allocation17 + $0x1] ss:$0 sm:$0xff] }
 0x2e8   : > { %v958_v58 = vpack.c.bf16 %v949_v57, %v948_v56 }
 0x2ea   : > { %2600 = vmatmul.mubr.msk.bf16.vlgmr.msra.gmra.mxu1 %vm988_vm2, %v958_v58 }
 0x3aa   : > { %v1026_v60 = vpop.f32.mrf.mxu1 }
 0x3ab   : > { %v1027_v61 = vadd.f32 %v2458_v59, %v1026_v60 }
 0x3ac   : > { %v2601_v62 = vpop.f32.mrf.mxu1 }
 0x3ad   : > { %v1033_v63 = vmul.f32 0.5, %v1027_v61 }
 0x3ae   : > { %v1029_v4 = vpop.f32.mrf.mxu1 }
 0x3af   : > { %v1030_v6 = vadd.f32 %v2458_v59, %v1029_v4  ;;  %v3701_v7 = vadd.f32 %v1033_v63, %v3650_v1 }
 0x3b0   : > { %v2602_v8 = vpop.f32.mrf.mxu1 }
 0x3b1   : > { %v1034_v9 = vmul.f32 0.5, %v1030_v6  ;;  %v1039_v10 = vsel %vm830_vm0, %v3701_v7, 0.0 }
 0x3b2   : > { %1040 = vadd.xlane.f32.xlu0 %v1039_v10 }
 0x3b3   : > { %v3706_v11 = vadd.f32 %v1034_v9, %v3658_v5 }
 0x3b5   : > { %v1042_v12 = vsel %vm830_vm0, %v3706_v11, 0.0 }
 0x3b6   : > { %1043 = vadd.xlane.f32.xlu1 %v1042_v12 }
 0x43b   : > { %v1041_v13 = vpop.xlane.xlu0 %1040 }
 0x43c   : > { %v1045_v14 = vmul.f32 0.03125, %v1041_v13 }
 0x43e   : > { %v1047_v15 = vsub.f32 %v3701_v7, %v1045_v14 }
 0x43f   : > { %v1044_v16 = vpop.xlane.xlu1 %1043 }
 0x440   : > { %v1046_v1 = vmul.f32 0.03125, %v1044_v16  ;;  %v1049_v17 = vmul.f32 %v1047_v15, %v1047_v15 }
 0x442   : > { %v1048_v19 = vsub.f32 %v3706_v11, %v1046_v1  ;;  %v1051_v20 = vsel %vm830_vm0, %v1049_v17, 0.0 }
 0x443   : > { %1052 = vadd.xlane.f32.xlu0 %v1051_v20 }
 0x444   : > { %v1050_v21 = vmul.f32 %v1048_v19, %v1048_v19 }
 0x446   : > { %v1054_v5 = vsel %vm830_vm0, %v1050_v21, 0.0 }
 0x447   : > { %1055 = vadd.xlane.f32.xlu1 %v1054_v5 }
 0x458   : > { %1211 = vrot.lane.b32.xlu1 %v3723_v25, %s4101_s15 }
 0x459   : > { %1209 = vrot.lane.b32.xlu0 %v3721_v24, %s4101_s15 }
 0x45c   : > { %1286 = vrot.lane.b32.xlu1 %v3723_v25, %s3315_s17 }
 0x45d   : > { %1284 = vrot.lane.b32.xlu0 %v3721_v24, %s3315_s17 }
 0x460   : > { %1329 = vrot.lane.b32.xlu1 %v3723_v25, %s3316_s8 }
 0x461   : > { %1327 = vrot.lane.b32.xlu0 %v3721_v24, %s3316_s8 }
 0x4cc   : > { %v1053_v26 = vpop.xlane.xlu0 %1052 }
 0x4cd   : > { %v1057_v27 = vmul.f32 0.03125, %v1053_v26 }
 0x4cf   : > { %v1059_v28 = vadd.f32 1e-05, %v1057_v27 }
 0x4d0   : > { %v1056_v29 = vpop.xlane.xlu1 %1055  ;;  %v1210_v62 = vpop.permute.xlu0 %1209 }
 0x4d1   : > { %2862 = vrsqrt.f32 %v1059_v28  ;;  %v1058_v30 = vmul.f32 0.03125, %v1056_v29 }
 0x4d3   : > { %v1060_v31 = vadd.f32 1e-05, %v1058_v30 }
 0x4d4   : > { %v1212_v63 = vpop.permute.xlu1 %1211  ;;  %v1285_v4 = vpop.permute.xlu0 %1284 }
 0x4d5   : > { %2864 = vrsqrt.f32 %v1060_v31 }
 0x4d8   : > { %v1287_v6 = vpop.permute.xlu1 %1286  ;;  %v1328_v8 = vpop.permute.xlu0 %1327 }
 0x4dc   : > { %v1330_v9 = vpop.permute.xlu1 %1329 }
 0x4de   : > { %v2863_v32 = vpop.eup %2862 }
 0x4df   : > { %v1063_v33 = vmul.f32 %v2863_v32, %v1047_v15 }
 0x4e1   : > { %v1069_v37 = vmul.f32 %v2464_v34, %v1063_v33 }
 0x4e2   : > { %v2865_v35 = vpop.eup %2864 }
 0x4e3   : > { %v1064_v36 = vmul.f32 %v2865_v35, %v1048_v19  ;;  %v1075_v40 = vadd.f32 %v2465_v38, %v1069_v37 }
 0x4e5   : > { %v1070_v39 = vmul.f32 %v2464_v34, %v1064_v36 }
 0x4e7   : > { %v1076_v41 = vadd.f32 %v2465_v38, %v1070_v39  ;;  %v3826_v38 = vmov 0.0   ;;  %v3828_v39 = vmov 0.0  }
 0x4e9   : > { %v1081_v42 = vpack.c.bf16 %v1076_v41, %v1075_v40 }
 0x4eb   : > { %2608 = vmatmul.mubr.msk.bf16.vlgmr.msra.gmra.mxu0 %vm830_vm0, %v1081_v42 }
 0x5ab   : > { %v1138_v44 = vpop.f32.mrf.mxu0 }
 0x5ac   : > { %v1139_v46 = vadd.f32 %v2466_v43, %v1138_v44 }
 0x5ad   : > { %v2609_v47 = vpop.f32.mrf.mxu0 }
 0x5ae   : > { %v2541_v48 = vpack.c.bf16 %v1139_v46, %v1139_v46  ;;  %v1168_v49 = vadd.f32 %v2472_v45, %v1139_v46  ;;  %v1175_v57 = vadd.f32 %v2473_v55, %v1139_v46 }
 0x5af   : > { %v1141_v50 = vpop.f32.mrf.mxu0 }
 0x5b0   : > { %v2543_v51 = vpack.c.bf16 %v1168_v49, %v1168_v49  ;;  %v1142_v52 = vadd.f32 %v2466_v43, %v1141_v50  ;;  %1238 = vrot.lane.b32.xlu1 %v2541_v48, %s3317_s0  ;;  %1151 = vrot.lane.b32.xlu0 %v2541_v48, %s3318_s22  ;;  %v3746_v58 = vpack.c.bf16 %v1175_v57, %v1175_v57 }
 0x5b1   : > { %v2610_v53 = vpop.f32.mrf.mxu0 }
 0x5b2   : > { %v1169_v54 = vadd.f32 %v2472_v45, %v1142_v52  ;;  %1188 = vst.msk [vmem:[#allocation2] sm:$0xf] %vm1187_vm3, %v2543_v51  ;;  %v2542_v59 = vpack.c.bf16 %v1142_v52, %v1142_v52  ;;  %v1176_v60 = vadd.f32 %v2473_v55, %v1142_v52 }
 0x5b4   : > { %v2544_v56 = vpack.c.bf16 %v1169_v54, %v1169_v54  ;;  %1275 = vrot.lane.b32.xlu1 %v2541_v48, %s3319_s30  ;;  %1217 = vrot.lane.b32.xlu0 %v2541_v48, %s4102_s21  ;;  %v3761_v61 = vpack.c.bf16 %v1176_v60, %v1176_v60 }
 0x5b6   : > { %1189 = vst.msk [vmem:[#allocation2 + $0x4] sm:$0xf] %vm1187_vm3, %v2544_v56 }
 0x5b8   : > { %1318 = vrot.lane.b32.xlu1 %v2541_v48, %s3321_s1  ;;  %1249 = vrot.lane.b32.xlu0 %v2541_v48, %s3322_s19 }
 0x5bc   : > { %1196 = vrot.lane.b32.xlu1 %v3746_v58, %s4101_s15  ;;  %1292 = vrot.lane.b32.xlu0 %v2541_v48, %s3323_s28 }
 0x5c0   : > { %1225 = vrot.lane.b32.xlu1 %v2543_v51, %s3315_s17  ;;  %1267 = vrot.lane.b32.xlu0 %v3746_v58, %s3315_s17 }
 0x5c4   : > { %1258 = vrot.lane.b32.xlu1 %v2543_v51, %s3316_s8  ;;  %1310 = vrot.lane.b32.xlu0 %v3746_v58, %s3316_s8 }
 0x5c8   : > { %1301 = vrot.lane.b32.xlu1 %v2543_v51, %s3324_s23  ;;  %1240 = vrot.lane.b32.xlu0 %v2542_v59, %s3317_s0 }
 0x5cc   : > { %1277 = vrot.lane.b32.xlu0 %v2542_v59, %s3319_s30  ;;  %1153 = vrot.lane.b32.xlu1 %v2542_v59, %s3318_s22 }
 0x5d0   : > { %1320 = vrot.lane.b32.xlu0 %v2542_v59, %s3321_s1  ;;  %1219 = vrot.lane.b32.xlu1 %v2542_v59, %s4102_s21 }
 0x5d4   : > { %1227 = vrot.lane.b32.xlu0 %v2544_v56, %s3315_s17  ;;  %1251 = vrot.lane.b32.xlu1 %v2542_v59, %s3322_s19 }
 0x5d8   : > { %1260 = vrot.lane.b32.xlu0 %v2544_v56, %s3316_s8  ;;  %1294 = vrot.lane.b32.xlu1 %v2542_v59, %s3323_s28 }
 0x5dc   : > { %1303 = vrot.lane.b32.xlu0 %v2544_v56, %s3324_s23  ;;  %1198 = vrot.lane.b32.xlu1 %v3761_v61, %s4101_s15 }
 0x5e0   : > { %1335 = vrot.lane.b32.xlu0 %v2541_v48, %s3325_s24  ;;  %1269 = vrot.lane.b32.xlu1 %v3761_v61, %s3315_s17  ;;  %s3824_s17 = scalar_lea.vmem [#allocation21], %s2444_s3 }
 0x5e4   : > { %1312 = vrot.lane.b32.xlu1 %v3761_v61, %s3316_s8  ;;  %s3830_s8 = smov 0  }
 0x5e8   : > { %1337 = vrot.lane.b32.xlu1 %v2542_v59, %s3325_s24 }
 0x622   : > { %v1239_v10 = vpop.permute.xlu1 %1238  ;;  %v1152_v12 = vpop.permute.xlu0 %1151 }
 0x623   : > { %1245 = vst.msk [vmem:[#allocation3 + $0x8] sm:$0xf] %vm1187_vm3, %v1239_v10  ;;  %1205 = vst.msk [vmem:[#allocation3] sm:$0xf] %vm1187_vm3, %v1152_v12 }
 0x624   : > { %1158 = vst.msk [vmem:[%s3771_s16] sm:$0xf] %vm1157_vm4, %v1152_v12 }
 0x625   : > { %1247 = vst.msk [vmem:[#allocation3 + $0x8] sm:$0xf] %vm1202_vm5, %v3721_v24  ;;  %1215 = vst.msk [vmem:[#allocation3] sm:$0xf] %vm1202_vm5, %v1210_v62 }
 0x626   : > { %1161 = vst.msk [vmem:[%s3771_s16] sm:$0xf] %vm1160_vm6, %v1152_v12  ;;  %v1276_v13 = vpop.permute.xlu1 %1275  ;;  %v1218_v14 = vpop.permute.xlu0 %1217 }
 0x627   : > { %1282 = vst.msk [vmem:[#allocation3 + $0x10] sm:$0xf] %vm1187_vm3, %v1276_v13  ;;  %1223 = vst.msk [vmem:[#allocation4] sm:$0xf] %vm1187_vm3, %v1218_v14 }
 0x628   : > { %1290 = vst.msk [vmem:[#allocation3 + $0x10] sm:$0xf] %vm1202_vm5, %v1285_v4 }
 0x62a   : > { %v1319_v15 = vpop.permute.xlu1 %1318  ;;  %v1250_v16 = vpop.permute.xlu0 %1249 }
 0x62b   : > { %1325 = vst.msk [vmem:[#allocation3 + $0x18] sm:$0xf] %vm1187_vm3, %v1319_v15  ;;  %1256 = vst.msk [vmem:[#allocation4 + $0x8] sm:$0xf] %vm1187_vm3, %v1250_v16 }
 0x62c   : > { %1333 = vst.msk [vmem:[#allocation3 + $0x18] sm:$0xf] %vm1202_vm5, %v1328_v8 }
 0x62e   : > { %v1197_v1 = vpop.permute.xlu1 %1196  ;;  %v1293_v17 = vpop.permute.xlu0 %1292 }
 0x62f   : > { %1203 = vst.msk [vmem:[#allocation2] sm:$0xf] %vm1202_vm5, %v1197_v1 }
 0x630   : > { %1299 = vst.msk [vmem:[#allocation4 + $0x10] sm:$0xf] %vm1187_vm3, %v1293_v17 }
 0x632   : > { %v1226_v19 = vpop.permute.xlu1 %1225  ;;  %v1268_v20 = vpop.permute.xlu0 %1267 }
 0x633   : > { %1232 = vst.msk [vmem:[#allocation2 + $0x8] sm:$0xf] %vm1187_vm3, %v1226_v19 }
 0x634   : > { %1236 = vst.msk [vmem:[#allocation2 + $0x8] sm:$0xf] %vm1202_vm5, %v3746_v58 }
 0x636   : > { %v1259_v21 = vpop.permute.xlu1 %1258  ;;  %v1311_v5 = vpop.permute.xlu0 %1310 }
 0x637   : > { %1265 = vst.msk [vmem:[#allocation2 + $0x10] sm:$0xf] %vm1187_vm3, %v1259_v21 }
 0x638   : > { %1273 = vst.msk [vmem:[#allocation2 + $0x10] sm:$0xf] %vm1202_vm5, %v1268_v20 }
 0x63a   : > { %v1302_v22 = vpop.permute.xlu1 %1301  ;;  %v1241_v23 = vpop.permute.xlu0 %1240 }
 0x63b   : > { %1308 = vst.msk [vmem:[#allocation2 + $0x18] sm:$0xf] %vm1187_vm3, %v1302_v22  ;;  %1246 = vst.msk [vmem:[#allocation3 + $0xc] sm:$0xf] %vm1187_vm3, %v1241_v23 }
 0x63c   : > { %1316 = vst.msk [vmem:[#allocation2 + $0x18] sm:$0xf] %vm1202_vm5, %v1311_v5  ;;  %1248 = vst.msk [vmem:[#allocation3 + $0xc] sm:$0xf] %vm1202_vm5, %v3723_v25 }
 0x63e   : > { %v1278_v24 = vpop.permute.xlu0 %1277  ;;  %v1154_v26 = vpop.permute.xlu1 %1153 }
 0x63f   : > { %1283 = vst.msk [vmem:[#allocation3 + $0x14] sm:$0xf] %vm1187_vm3, %v1278_v24  ;;  %1206 = vst.msk [vmem:[#allocation3 + $0x4] sm:$0xf] %vm1187_vm3, %v1154_v26 }
 0x640   : > { %1159 = vst.msk [vmem:[%s3771_s16 + $0x4] sm:$0xf] %vm1157_vm4, %v1154_v26 }
 0x641   : > { %1291 = vst.msk [vmem:[#allocation3 + $0x14] sm:$0xf] %vm1202_vm5, %v1287_v6  ;;  %1216 = vst.msk [vmem:[#allocation3 + $0x4] sm:$0xf] %vm1202_vm5, %v1212_v63 }
 0x642   : > { %1162 = vst.msk [vmem:[%s3771_s16 + $0x4] sm:$0xf] %vm1160_vm6, %v1154_v26  ;;  %v1321_v27 = vpop.permute.xlu0 %1320  ;;  %v1220_v28 = vpop.permute.xlu1 %1219 }
 0x643   : > { %1326 = vst.msk [vmem:[#allocation3 + $0x1c] sm:$0xf] %vm1187_vm3, %v1321_v27  ;;  %1224 = vst.msk [vmem:[#allocation4 + $0x4] sm:$0xf] %vm1187_vm3, %v1220_v28 }
 0x644   : > { %1334 = vst.msk [vmem:[#allocation3 + $0x1c] sm:$0xf] %vm1202_vm5, %v1330_v9 }
 0x646   : > { %v1228_v25 = vpop.permute.xlu0 %1227  ;;  %v1252_v29 = vpop.permute.xlu1 %1251 }
 0x647   : > { %1233 = vst.msk [vmem:[#allocation2 + $0xc] sm:$0xf] %vm1187_vm3, %v1228_v25  ;;  %1257 = vst.msk [vmem:[#allocation4 + $0xc] sm:$0xf] %vm1187_vm3, %v1252_v29 }
 0x648   : > { %1237 = vst.msk [vmem:[#allocation2 + $0xc] sm:$0xf] %vm1202_vm5, %v3761_v61 }
 0x64a   : > { %v1261_v30 = vpop.permute.xlu0 %1260  ;;  %v1295_v31 = vpop.permute.xlu1 %1294 }
 0x64b   : > { %1266 = vst.msk [vmem:[#allocation2 + $0x14] sm:$0xf] %vm1187_vm3, %v1261_v30  ;;  %1300 = vst.msk [vmem:[#allocation4 + $0x14] sm:$0xf] %vm1187_vm3, %v1295_v31 }
 0x64e   : > { %v1304_v32 = vpop.permute.xlu0 %1303  ;;  %v1199_v33 = vpop.permute.xlu1 %1198 }
 0x64f   : > { %1309 = vst.msk [vmem:[#allocation2 + $0x1c] sm:$0xf] %vm1187_vm3, %v1304_v32 }
 0x650   : > { %1204 = vst.msk [vmem:[#allocation2 + $0x4] sm:$0xf] %vm1202_vm5, %v1199_v33 }
 0x652   : > { %v1336_v34 = vpop.permute.xlu0 %1335  ;;  %v1270_v35 = vpop.permute.xlu1 %1269 }
 0x653   : > { %1342 = vst.msk [vmem:[#allocation4 + $0x18] sm:$0xf] %vm1187_vm3, %v1336_v34 }
 0x654   : > { %1274 = vst.msk [vmem:[#allocation2 + $0x14] sm:$0xf] %vm1202_vm5, %v1270_v35 }
 0x656   : > { %v1313_v36 = vpop.permute.xlu1 %1312 }
 0x657   : > { %1317 = vst.msk [vmem:[#allocation2 + $0x1c] sm:$0xf] %vm1202_vm5, %v1313_v36 }
 0x65a   : > { %v1338_v37 = vpop.permute.xlu1 %1337 }
 0x65b   : > { %1343 = vst.msk [vmem:[#allocation4 + $0x1c] sm:$0xf] %vm1187_vm3, %v1338_v37 }
 0x65c LB: >> { %v3326_v40 = vmov 0.0   ;;  %vm3327_vm7 = vmmov 0   ;;  %s3843_s3 = sshll.u32 %s3299_s8, 3  ;;  %vm1377_vm8 = vcmask 130048   ;;  %s2488_s19 = sshll.u32 %s3299_s8, 2  ;;  %vm1510_vm9 = vcmask 1043456   ;;  %s3299_s8 = sphi %s3830_s8, %s1349_s8   ;;  %v3295_v39 = vphi %v3828_v39, %v4152_v39   ;;  %v3291_v38 = vphi %v3826_v38, %v4151_v38  }
 0x65d   : >> { %2611 = vmatprep.subr.bf16.mxu0 %v3326_v40  ;;  %2613 = vmatprep.mubr.msk.bf16.mxu0 %vm3327_vm7, %v3326_v40  ;;  %s1358_s0 = scalar_lea.vmem [#allocation3], %s3843_s3  ;;  %s1354_s30 = scalar_lea.vmem [#allocation2], %s3843_s3  ;;  %vm1506_vm10 = vcmask 64512  }
 0x65e   : >> { %2617 = vmatprep.subr.bf16.mxu1 %v3326_v40  ;;  %2619 = vmatprep.mubr.msk.bf16.mxu1 %vm3327_vm7, %v3326_v40  ;;  %v2866_v41 = vld [vmem:[%s1358_s0] sm:$0xff]   ;;  %s1448_s1 = scalar_lea.vmem [#allocation4], %s3843_s3  ;;  %s1503_s24 = scalar_lea.vmem %s4082_s13, %s2488_s19 }
 0x65f   : >> { %v1382_v42 = vsel %vm1377_vm8, %v2866_v41, 0  ;;  %v2867_v43 = vld [vmem:[%s1354_s30] sm:$0xff]   ;;  %s1349_s8 = sadd.s32 1, %s3299_s8  }
 0x660   : >> { %2612 = vmatpush3.bf16.xpose.msra.mxu0 %v1382_v42  ;;  %v1504_v9 = vld [vmem:[%s1503_s24] sm:$0xf]  ;;  %p1346_p13 = scmp.ge.s32.totalorder %s1349_s8, 4  }
 0x661   : >> { %v1512_v14 = vsel %vm1510_vm9, %v1504_v9, 0  ;;  %v2490_v27 = vld [vmem:[#allocation15 + $0x1] ss:$0 sm:$0xff] (%p1346_p13)  ;;  %2629 = vmatprep.subr.bf16.mxu0 (%p1346_p13), %v3312_v18  ;;  %1708 = vst.msk [vmem:[#allocation5] sm:$0xff] (%p1346_p13), %vm830_vm0, %v3312_v18  ;;  %1709 = vst.msk [vmem:[#allocation5 + $0x18] sm:$0xff] (%p1346_p13), %vm830_vm0, %v3312_v18  ;;  %v3328_v29 = vmov (%p1346_p13), 0  }
 0x662   : >> { %v2868_v62 = vld [vmem:[%s1448_s1] sm:$0xff]   ;;  %2877 = vset.pattern.permute.xlu0 (%p1346_p13), %v3328_v29  ;;  %2878 = vset.pattern.permute.xlu1 (%p1346_p13), %v3328_v29  ;;  %s4153_s1 = sld [smem:[#allocation43_spill]] (%p1346_p13)  ;;  %s2551_s0 = sshll.u32 (%p1346_p13), %s3464_s29, 7 }
 0x663   : >> { %2618 = vmatpush3.bf16.msra.mxu1 %v2868_v62  ;;  %s4154_s9 = sld [smem:[#allocation44_spill]] (%p1346_p13)  ;;  %s2202_s24 = sshll.u32 (%p1346_p13), %s3771_s16, 4  ;;  %s3987_s24 = int_to_ptr.vmem [resolvable:$true] %s2202_s24 }
 0x664   : >> { %2623 = vmatprep.subr.bf16.mxu1 %v3326_v40  ;;  %s4155_s30 = sld [smem:[#allocation45_spill]] (%p1346_p13)  ;;  %s3165_s3 = scalar_lea.vmem (%p1346_p13), %s3987_s24, 128 }
 0x665   : > { %s4156_s28 = sld [smem:[#allocation47_spill]] (%p1346_p13)  ;;  %p3166_p1 = scmp.ne.s32.totalorder (%p1346_p13), %s3987_s24, %s3165_s3 }
 0x666   : > { %p4157_p2 = scmp.ne.s32.totalorder (%p1346_p13), %s4135_s20, 0  ;;  %s3329_s15 = smov (%p1346_p13), [#allocation22]  }
 0x667   : >> { %2614 = vmatmul.mubr.msk.bf16.vlgmr.msra.gmra.mxu0 %vm1377_vm8, %v2867_v43  ;;  %s3169_s21 = sshll.u32 (%p1346_p13), %s3329_s15, 4  ;;  %s3170_s21 = int_to_ptr.vmem [resolvable:$false] %s3169_s21 }
 0x668   : > { %2633 = vmatprep.mubr.msk.bf16.mxu0 (%p1346_p13), %vm3313_vm1, %v3312_v18  ;;  %p3167_p5 = pnand (%p1346_p13), %p3166_p1, %p4157_p2  ;;  %p3172_p6 = scmp.lt.s32.totalorder (%p1346_p13), %s3987_s24, %s3170_s21 }
 0x66a   : > { %p3168_p7 = pneg (%p1346_p13), %p3167_p5 }
 0x66b   : > { %s3984_s23 = scalar_lea.hbm (%p1346_p13), %s4156_s28, %s2551_s0 }
 0x727   : >> { %v1418_v44 = vpop.f32.mrf.mxu0 }
 0x728   : >> { %v1419_v45 = vadd.f32 %v3648_v0, %v1418_v44 }
 0x729   : >> { %v2615_v46 = vpop.f32.mrf.mxu0 }
 0x72a   : >> { %v1425_v47 = vsel %vm1377_vm8, %v1419_v45, -inf }
 0x72b   : >> { %1426 = vmax.xlane.f32.xlu0 %v1425_v47  ;;  %v1421_v48 = vpop.f32.mrf.mxu0  ;;  %v2491_v47 = vld [vmem:[#allocation11 + $0x2] ss:$0 sm:$0xff] (%p1346_p13) }
 0x72c   : >> { %v1422_v49 = vadd.f32 %v3648_v0, %v1421_v48 }
 0x72d   : >> { %v2616_v50 = vpop.f32.mrf.mxu0 }
 0x72e   : >> { %v1428_v51 = vsel %vm1377_vm8, %v1422_v49, -inf }
 0x72f   : >> { %1429 = vmax.xlane.f32.xlu0 %v1428_v51  ;;  %v2492_v51 = vld [vmem:[#allocation12 + $0x2] ss:$0 sm:$0xff] (%p1346_p13) }
 0x7b4   : >> { %v1427_v52 = vpop.xlane.xlu0 %1426 }
 0x7b5   : >> { %v1431_v53 = vsub.f32 %v1419_v45, %v1427_v52 }
 0x7b7   : >> { %v1433_v54 = vmul.f32 1.442695, %v1431_v53 }
 0x7b8   : >> { %v1430_v55 = vpop.xlane.xlu0 %1429 }
 0x7b9   : >> { %2869 = vpow2.f32 %v1433_v54  ;;  %v1432_v56 = vsub.f32 %v1422_v49, %v1430_v55 }
 0x7bb   : >> { %v1435_v57 = vmul.f32 1.442695, %v1432_v56 }
 0x7bd   : >> { %2871 = vpow2.f32 %v1435_v57 }
 0x7c6   : >> { %v2870_v58 = vpop.eup %2869 }
 0x7c7   : >> { %v1437_v59 = vsel %vm1377_vm8, %v2870_v58, 0.0 }
 0x7c8   : >> { %1438 = vadd.xlane.f32.xlu1 %v1437_v59 }
 0x7ca   : >> { %v2872_v60 = vpop.eup %2871 }
 0x7cb   : >> { %v1440_v61 = vsel %vm1377_vm8, %v2872_v60, 0.0 }
 0x7cc   : >> { %1441 = vadd.xlane.f32.xlu1 %v1440_v61  ;;  %v2493_v61 = vld [vmem:[#allocation18] ss:$0 sm:$0xff] (%p1346_p13) }
 0x851   : >> { %v1439_v63 = vpop.xlane.xlu1 %1438 }
 0x852   : >> { %2873 = vrcp.f32 %v1439_v63 }
 0x855   : >> { %v1442_v4 = vpop.xlane.xlu1 %1441 }
 0x856   : >> { %2875 = vrcp.f32 %v1442_v4 }
 0x85f   : >> { %v2874_v6 = vpop.eup %2873 }
 0x860   : >> { %v1445_v10 = vmul.f32 %v2874_v6, %v2870_v58 }
 0x863   : >> { %v2876_v8 = vpop.eup %2875 }
 0x864   : >> { %v1446_v12 = vmul.f32 %v2876_v8, %v2872_v60 }
 0x866   : >> { %v1451_v13 = vpack.c.bf16 %v1446_v12, %v1445_v10 }
 0x868   : >> { %2620 = vmatmul.mubr.msk.bf16.vlgmr.msra.gmra.mxu1 %vm1377_vm8, %v1451_v13 }
 0x869   : >> { %2624 = vmatpush3.bf16.msra.mxu1 %v1512_v14  ;;  %2625 = vmatprep.mubr.msk.bf16.mxu1 %vm3327_vm7, %v3326_v40  ;;  %v2880_v40 = vld [vmem:[%s4083_s14] sm:$0xff] (%p1346_p13)  }
 0x86a   : > { %2637 = vmatprep.subr.bf16.mxu1 (%p1346_p13), %v3312_v18 }
 0x928   : >> { %v1495_v15 = vpop.f32.mrf.mxu1 }
 0x92a   : >> { %v2621_v16 = vpop.f32.mrf.mxu1 }
 0x92c   : >> { %v1498_v1 = vpop.f32.mrf.mxu1 }
 0x92d   : >> { %v1505_v17 = vpack.c.bf16 %v1498_v1, %v1495_v15 }
 0x92e   : >> { %v2622_v19 = vpop.f32.mrf.mxu1 }
 0x92f   : >> { %2626 = vmatmul.mubr.msk.bf16.vlgmr.msra.gmra.mxu1 %vm1506_vm10, %v1505_v17 }
 0x930   : > { %2641 = vmatprep.mubr.msk.bf16.mxu1 (%p1346_p13), %vm3313_vm1, %v3312_v18 }
 0x9ef   : >> { %v1548_v20 = vpop.f32.mrf.mxu1 }
 0x9f0   : >> { %v1555_v21 = vadd.f32 %v3295_v39, %v1548_v20  }
 0x9f1   : >> { %v2627_v5 = vpop.f32.mrf.mxu1 }
 0x9f2   : >> { %v4152_v39 = vmov %v1555_v21  ;;  %1348 = sbr.rel (!%p1346_p13) target bundleno = 1628 (0x65c), region = 220  ;;  %v1557_v26 = vadd.f32 (%p1346_p13), %v1555_v21, %v3701_v7 }
 0x9f3   : >> { %v1551_v22 = vpop.f32.mrf.mxu1 }
 0x9f4   : >> { %v1556_v23 = vadd.f32 %v3291_v38, %v1551_v22   ;;  %v3884_v0 = vadd.f32 (%p1346_p13), %v2490_v27, %v1557_v26  ;;  %v2500_v22 = vld [vmem:[#allocation20] ss:$0 sm:$0xff] (%p1346_p13) }
 0x9f5   : >> { %v2628_v24 = vpop.f32.mrf.mxu1 }
 0x9f6   : >> { %v4151_v38 = vmov %v1556_v23  ;;  %v1558_v28 = vadd.f32 (%p1346_p13), %v1556_v23, %v3706_v11  ;;  %v1568_v11 = vsel (%p1346_p13), %vm830_vm0, %v3884_v0, 0.0  ;;  %v2499_v23 = vld [vmem:[#allocation15 + $0x2] ss:$0 sm:$0xff] (%p1346_p13) }
 0x9f7   : > { %1569 = vadd.xlane.f32.xlu0 %v1568_v11 }
 0x9f8   : > { %v3886_v7 = vadd.f32 %v2490_v27, %v1558_v28  ;;  %v2501_v27 = vld [vmem:[#allocation20 + $0x1] ss:$0 sm:$0xff] }
 0x9fa   : > { %v1571_v25 = vsel %vm830_vm0, %v3886_v7, 0.0 }
 0x9fb   : > { %1572 = vadd.xlane.f32.xlu0 %v1571_v25  ;;  %v2502_v25 = vld [vmem:[#allocation20 + $0x2] ss:$0 sm:$0xff] }
 0xa11   : > { %1608 = vperm.xlu0 %2877, %v3652_v2   ;;  %v2879_v2 = vld [vmem:[%s4083_s14 + $0x8] sm:$0xff]  }
 0xa12   : > { %2630 = vmatpush3.bf16.msra.mxu0 %v2879_v2 }
 0xa13   : > { %2631 = vmatprep.subr.bf16.mxu0 %v3312_v18 }
 0xa16   : > { %2632 = vmatpush3.bf16.msra.mxu0 %v2880_v40 }
 0xa17   : > { %2645 = vmatprep.subr.bf16.mxu0 %v3312_v18 }
 0xa80   : > { %v1570_v30 = vpop.xlane.xlu0 %1569 }
 0xa81   : > { %v1574_v31 = vmul.f32 0.03125, %v1570_v30 }
 0xa83   : > { %v1576_v32 = vsub.f32 %v3884_v0, %v1574_v31 }
 0xa84   : > { %v1573_v33 = vpop.xlane.xlu0 %1572 }
 0xa85   : > { %v1575_v34 = vmul.f32 0.03125, %v1573_v33  ;;  %v1578_v35 = vmul.f32 %v1576_v32, %v1576_v32 }
 0xa87   : > { %v1577_v36 = vsub.f32 %v3886_v7, %v1575_v34  ;;  %v1580_v37 = vsel %vm830_vm0, %v1578_v35, 0.0 }
 0xa88   : > { %1581 = vadd.xlane.f32.xlu1 %v1580_v37 }
 0xa89   : > { %v1579_v38 = vmul.f32 %v1577_v36, %v1577_v36 }
 0xa8b   : > { %v1583_v39 = vsel %vm830_vm0, %v1579_v38, 0.0  ;;  %v2504_v38 = vld [vmem:[#allocation20 + $0x4] ss:$0 sm:$0xff] }
 0xa8c   : > { %1584 = vadd.xlane.f32.xlu1 %v1583_v39  ;;  %v3906_v55 = vpop.permute.xlu0 %1608 }
 0xa9d   : > { %1613 = vperm.xlu1 %2878, %v3654_v3  }
 0xb11   : > { %v1582_v41 = vpop.xlane.xlu1 %1581 }
 0xb12   : > { %v1586_v42 = vmul.f32 0.03125, %v1582_v41 }
 0xb14   : > { %v1588_v43 = vadd.f32 1e-05, %v1586_v42 }
 0xb15   : > { %v1585_v44 = vpop.xlane.xlu1 %1584 }
 0xb16   : > { %2889 = vrsqrt.f32 %v1588_v43  ;;  %v1587_v3 = vmul.f32 0.03125, %v1585_v44  ;;  %v2505_v43 = vld [vmem:[#allocation20 + $0x5] ss:$0 sm:$0xff] }
 0xb18   : > { %v1589_v45 = vadd.f32 1e-05, %v1587_v3 }
 0xb19   : > { %v3908_v56 = vpop.permute.xlu1 %1613 }
 0xb1a   : > { %2891 = vrsqrt.f32 %v1589_v45 }
 0xb23   : > { %v2890_v46 = vpop.eup %2889 }
 0xb24   : > { %v1592_v48 = vmul.f32 %v2890_v46, %v1576_v32  ;;  %v2503_v32 = vld [vmem:[#allocation20 + $0x3] ss:$0 sm:$0xff] }
 0xb26   : > { %v1598_v49 = vmul.f32 %v2491_v47, %v1592_v48 }
 0xb27   : > { %v2892_v50 = vpop.eup %2891 }
 0xb28   : > { %v1593_v52 = vmul.f32 %v2892_v50, %v1577_v36  ;;  %v1604_v53 = vadd.f32 %v2492_v51, %v1598_v49  ;;  %v2506_v49 = vld [vmem:[#allocation20 + $0x6] ss:$0 sm:$0xff] }
 0xb2a   : > { %v1599_v54 = vmul.f32 %v2491_v47, %v1593_v52  ;;  %v1616_v58 = vmul.f32 %v3906_v55, %v1604_v53 }
 0xb2c   : > { %v1605_v57 = vadd.f32 %v2492_v51, %v1599_v54 }
 0xb2e   : > { %v1617_v59 = vmul.f32 %v3908_v56, %v1605_v57 }
 0xb30   : > { %v1622_v60 = vpack.c.bf16 %v1617_v59, %v1616_v58 }
 0xb32   : > { %2634 = vmatmul.mubr.msk.bf16.vlgmr.msra.gmra.mxu0 %vm830_vm0, %v1622_v60 }
 0xb33   : > { %2649 = vmatprep.mubr.msk.bf16.mxu0 %vm3313_vm1, %v3312_v18 }
 0xbf2   : > { %v1679_v62 = vpop.f32.mrf.mxu0 }
 0xbf3   : > { %v1680_v63 = vadd.f32 %v2493_v61, %v1679_v62 }
 0xbf4   : > { %v2635_v4 = vpop.f32.mrf.mxu0 }
 0xbf5   : > { %v2497_v6 = vmul.f32 -1.442695, %v1680_v63 }
 0xbf6   : > { %v1682_v8 = vpop.f32.mrf.mxu0 }
 0xbf7   : > { %2893 = vpow2.f32 %v2497_v6  ;;  %v1683_v9 = vadd.f32 %v2493_v61, %v1682_v8 }
 0xbf8   : > { %v2636_v10 = vpop.f32.mrf.mxu0 }
 0xbf9   : > { %v2498_v12 = vmul.f32 -1.442695, %v1683_v9 }
 0xbfb   : > { %2895 = vpow2.f32 %v2498_v12 }
 0xc04   : > { %v2894_v13 = vpop.eup %2893 }
 0xc05   : > { %v1692_v14 = vadd.f32 1.0, %v2894_v13 }
 0xc07   : > { %2897 = vrcp.f32 %v1692_v14 }
 0xc08   : > { %v2896_v15 = vpop.eup %2895 }
 0xc09   : > { %v1693_v16 = vadd.f32 1.0, %v2896_v15 }
 0xc0b   : > { %2899 = vrcp.f32 %v1693_v16 }
 0xc14   : > { %v2898_v1 = vpop.eup %2897 }
 0xc15   : > { %1700 = vrot.lane.b32.xlu1 %v2898_v1, %s3318_s22 }
 0xc18   : > { %v2900_v17 = vpop.eup %2899 }
 0xc19   : > { %1702 = vrot.lane.b32.xlu1 %v2900_v17, %s3318_s22 }
 0xc87   : > { %v1701_v19 = vpop.permute.xlu1 %1700 }
 0xc88   : > { %v1706_v20 = vmul.f32 %v1701_v19, %v1680_v63 }
 0xc8a   : > { %1710 = vst.msk [vmem:[#allocation5 + $0x8] sm:$0xff] %vm830_vm0, %v1706_v20 }
 0xc8b   : > { %v1703_v21 = vpop.permute.xlu1 %1702 }
 0xc8c   : > { %v1707_v5 = vmul.f32 %v1703_v21, %v1683_v9 }
 0xc8e   : > { %1711 = vst.msk [vmem:[#allocation5 + $0x10] sm:$0xff] %vm830_vm0, %v1707_v5 }
 0xc91   : > { %v1718_v24 = vld [vmem:[#allocation5 + $0x5] sm:$0xff] }
 0xc92   : > { %v1729_v26 = vld [vmem:[#allocation5 + $0x6] sm:$0xff]  ;;  %v1725_v28 = vmul.f32 %v2500_v22, %v1718_v24 }
 0xc93   : > { %v1740_v11 = vld [vmem:[#allocation5 + $0x7] sm:$0xff]  ;;  %v1736_v30 = vmul.f32 %v2501_v27, %v1729_v26 }
 0xc94   : > { %v1727_v29 = vadd.f32 %v2499_v23, %v1725_v28  ;;  %v1751_v31 = vld [vmem:[#allocation5 + $0x8] sm:$0xff]  ;;  %v1747_v34 = vmul.f32 %v2502_v25, %v1740_v11 }
 0xc95   : > { %v1719_v35 = vld [vmem:[#allocation5 + $0xd] sm:$0xff]  ;;  %v1758_v40 = vmul.f32 %v2503_v32, %v1751_v31 }
 0xc96   : > { %v1738_v33 = vadd.f32 %v1736_v30, %v1727_v29  ;;  %v1730_v36 = vld [vmem:[#allocation5 + $0xe] sm:$0xff]  ;;  %v1726_v39 = vmul.f32 %v2500_v22, %v1719_v35  ;;  %v2508_v35 = vld [vmem:[#allocation12 + $0x5] ss:$0 sm:$0xff] }
 0xc97   : > { %v1762_v37 = vld [vmem:[#allocation5 + $0x9] sm:$0xff]  ;;  %v1737_v3 = vmul.f32 %v2501_v27, %v1730_v36  ;;  %v1763_v54 = vld [vmem:[#allocation5 + $0x11] sm:$0xff]  ;;  %v2882_v27 = vld [vmem:[%s4153_s1] sm:$0xff]  }
 0xc98   : > { %v1749_v2 = vadd.f32 %v1747_v34, %v1738_v33  ;;  %v1741_v41 = vld [vmem:[#allocation5 + $0xf] sm:$0xff]  ;;  %v1728_v44 = vadd.f32 %v2499_v23, %v1726_v39  ;;  %v1769_v46 = vmul.f32 %v2504_v38, %v1762_v37  ;;  %v1770_v63 = vmul.f32 %v2504_v38, %v1763_v54 }
 0xc99   : > { %v1773_v42 = vld [vmem:[#allocation5 + $0xa] sm:$0xff]  ;;  %v1748_v51 = vmul.f32 %v2502_v25, %v1741_v41  ;;  %v1774_v61 = vld [vmem:[#allocation5 + $0x12] sm:$0xff] }
 0xc9a   : > { %v1760_v45 = vadd.f32 %v1758_v40, %v1749_v2  ;;  %v1752_v47 = vld [vmem:[#allocation5 + $0x10] sm:$0xff]  ;;  %v1739_v50 = vadd.f32 %v1737_v3, %v1728_v44  ;;  %v1780_v53 = vmul.f32 %v2505_v43, %v1773_v42  ;;  %v1781_v9 = vmul.f32 %v2505_v43, %v1774_v61  ;;  %v2881_v26 = vld [vmem:[%s4153_s1 + $0x8] sm:$0xff]   ;;  %s3171_s1 = scalar_lea.vmem %s3170_s21, 256 }
 0xc9b   : > { %v1784_v48 = vld [vmem:[#allocation5 + $0xb] sm:$0xff]  ;;  %v1759_v58 = vmul.f32 %v2503_v32, %v1752_v47  ;;  %v1785_v6 = vld [vmem:[#allocation5 + $0x13] sm:$0xff]  ;;  %2638 = vmatpush3.bf16.msra.mxu1 %v2881_v26  ;;  %p3173_p3 = scmp.lt.s32.totalorder %s3171_s1, %s3165_s3 }
 0xc9c   : > { %v1771_v52 = vadd.f32 %v1769_v46, %v1760_v45  ;;  %v1750_v57 = vadd.f32 %v1748_v51, %v1739_v50  ;;  %v1791_v60 = vmul.f32 %v2506_v49, %v1784_v48  ;;  %v1792_v13 = vmul.f32 %v2506_v49, %v1785_v6  ;;  %2639 = vmatprep.subr.bf16.mxu1 %v3312_v18  ;;  %v2507_v33 = vld [vmem:[#allocation11 + $0x5] ss:$0 sm:$0xff]  ;;  %v2511_v51 = vld [vmem:[#allocation15 + $0x3] ss:$0 sm:$0xff] }
 0xc9d   : > { %p3174_p0 = por %p3173_p3, %p3172_p6 }
 0xc9e   : > { %v1782_v59 = vadd.f32 %v1780_v53, %v1771_v52  ;;  %v1761_v62 = vadd.f32 %v1759_v58, %v1750_v57 }
 0xc9f   : > { %2640 = vmatpush3.bf16.msra.mxu1 %v2882_v27  ;;  %p3175_p4 = pnand %p3174_p0, %p3168_p7 }
 0xca0   : > { %v1793_v4 = vadd.f32 %v1791_v60, %v1782_v59  ;;  %v1772_v8 = vadd.f32 %v1770_v63, %v1761_v62  ;;  %2653 = vmatprep.subr.bf16.mxu1 %v3312_v18 }
 0xca2   : > { %v1797_v10 = vsel %vm830_vm0, %v1793_v4, 0.0  ;;  %v1783_v12 = vadd.f32 %v1781_v9, %v1772_v8 }
 0xca3   : > { %1798 = vadd.xlane.f32.xlu1 %v1797_v10 }
 0xca4   : > { %v1794_v14 = vadd.f32 %v1792_v13, %v1783_v12 }
 0xca6   : > { %v1800_v15 = vsel %vm830_vm0, %v1794_v14, 0.0 }
 0xca7   : > { %1801 = vadd.xlane.f32.xlu0 %v1800_v15  ;;  %v2883_v15 = vld [vmem:[%s4154_s9 + $0x8] sm:$0xff]  }
 0xca8   : > { %2646 = vmatpush3.bf16.msra.mxu0 %v2883_v15 }
 0xca9   : > { %2647 = vmatprep.subr.bf16.mxu0 %v3312_v18 }
 0xd2c   : > { %v1799_v16 = vpop.xlane.xlu1 %1798 }
 0xd2d   : > { %v1803_v1 = vmul.f32 0.03125, %v1799_v16  ;;  %v2884_v16 = vld [vmem:[%s4154_s9] sm:$0xff]  }
 0xd2e   : > { %2648 = vmatpush3.bf16.msra.mxu0 %v2884_v16 }
 0xd2f   : > { %v1805_v17 = vsub.f32 %v1793_v4, %v1803_v1 }
 0xd30   : > { %v1802_v19 = vpop.xlane.xlu0 %1801 }
 0xd31   : > { %v1807_v20 = vmul.f32 %v1805_v17, %v1805_v17  ;;  %v1804_v21 = vmul.f32 0.03125, %v1802_v19 }
 0xd33   : > { %v1809_v5 = vsel %vm830_vm0, %v1807_v20, 0.0  ;;  %v1806_v22 = vsub.f32 %v1794_v14, %v1804_v21 }
 0xd34   : > { %1810 = vadd.xlane.f32.xlu1 %v1809_v5 }
 0xd35   : > { %v1808_v23 = vmul.f32 %v1806_v22, %v1806_v22 }
 0xd37   : > { %v1812_v24 = vsel %vm830_vm0, %v1808_v23, 0.0 }
 0xd38   : > { %1813 = vadd.xlane.f32.xlu1 %v1812_v24  ;;  %v2515_v24 = vld [vmem:[#allocation11 + $0x3] ss:$0 sm:$0xff] }
 0xdbd   : > { %v1811_v28 = vpop.xlane.xlu1 %1810 }
 0xdbe   : > { %v1815_v11 = vmul.f32 0.03125, %v1811_v28 }
 0xdc0   : > { %v1817_v25 = vadd.f32 1e-05, %v1815_v11  ;;  %v2516_v11 = vld [vmem:[#allocation12 + $0x3] ss:$0 sm:$0xff] }
 0xdc1   : > { %v1814_v29 = vpop.xlane.xlu1 %1813 }
 0xdc2   : > { %2901 = vrsqrt.f32 %v1817_v25  ;;  %v1816_v30 = vmul.f32 0.03125, %v1814_v29 }
 0xdc4   : > { %v1818_v31 = vadd.f32 1e-05, %v1816_v30 }
 0xdc6   : > { %2903 = vrsqrt.f32 %v1818_v31 }
 0xdcf   : > { %v2902_v32 = vpop.eup %2901 }
 0xdd0   : > { %v1821_v34 = vmul.f32 %v2902_v32, %v1805_v17  ;;  %v2885_v32 = vld [vmem:[%s4155_s30 + $0x18] sm:$0xff]  }
 0xdd2   : > { %v1827_v36 = vmul.f32 %v2507_v33, %v1821_v34  ;;  %v2887_v34 = vld [vmem:[%s4155_s30 + $0x8] sm:$0xff]  }
 0xdd3   : > { %v2904_v37 = vpop.eup %2903 }
 0xdd4   : > { %v1833_v38 = vadd.f32 %v2508_v35, %v1827_v36  ;;  %v1822_v39 = vmul.f32 %v2904_v37, %v1806_v22  ;;  %v2517_v36 = vld [vmem:[#allocation14 + $0x1] ss:$0 sm:$0xff] }
 0xdd6   : > { %v2509_v2 = vmul.f32 -1.442695, %v1833_v38  ;;  %v1828_v40 = vmul.f32 %v2507_v33, %v1822_v39  ;;  %v2886_v33 = vld [vmem:[%s4155_s30 + $0x10] sm:$0xff]  }
 0xdd8   : > { %2905 = vpow2.f32 %v2509_v2  ;;  %v1834_v41 = vadd.f32 %v2508_v35, %v1828_v40  ;;  %v2888_v35 = vld [vmem:[%s4155_s30] sm:$0xff]  }
 0xdda   : > { %v2510_v42 = vmul.f32 -1.442695, %v1834_v41 }
 0xddc   : > { %2907 = vpow2.f32 %v2510_v42 }
 0xde5   : > { %v2906_v43 = vpop.eup %2905 }
 0xde6   : > { %v1841_v44 = vadd.f32 1.0, %v2906_v43 }
 0xde8   : > { %2909 = vrcp.f32 %v1841_v44 }
 0xde9   : > { %v2908_v3 = vpop.eup %2907 }
 0xdea   : > { %v1842_v45 = vadd.f32 1.0, %v2908_v3 }
 0xdec   : > { %2911 = vrcp.f32 %v1842_v45 }
 0xdf5   : > { %v2910_v46 = vpop.eup %2909 }
 0xdf6   : > { %v1847_v48 = vmul.f32 %v2910_v46, %v1833_v38 }
 0xdf9   : > { %v2912_v47 = vpop.eup %2911 }
 0xdfa   : > { %v1848_v49 = vmul.f32 %v2912_v47, %v1834_v41 }
 0xdfc   : > { %v1853_v50 = vpack.c.bf16 %v1848_v49, %v1847_v48 }
 0xdfe   : > { %2642 = vmatmul.mubr.msk.bf16.vlgmr.msra.gmra.mxu1 %vm830_vm0, %v1853_v50 }
 0xdff   : > { %2661 = vmatprep.mubr.msk.bf16.mxu1 %vm3313_vm1, %v3312_v18  ;;  %2654 = vmatpush3.bf16.msra.mxu1 %v2885_v32 }
 0xe00   : > { %2655 = vmatprep.subr.bf16.mxu1 %v3312_v18 }
 0xe03   : > { %2656 = vmatpush3.bf16.msra.mxu1 %v2886_v33 }
 0xe04   : > { %2657 = vmatprep.subr.bf16.mxu1 %v3312_v18 }
 0xe07   : > { %2658 = vmatpush3.bf16.msra.mxu1 %v2887_v34 }
 0xe08   : > { %2659 = vmatprep.subr.bf16.mxu1 %v3312_v18 }
 0xe0b   : > { %2660 = vmatpush3.bf16.msra.mxu1 %v2888_v35 }
 0xebe   : > { %v1908_v52 = vpop.f32.mrf.mxu1 }
 0xebf   : > { %v1909_v53 = vadd.f32 %v2511_v51, %v1908_v52 }
 0xec0   : > { %v2643_v54 = vpop.f32.mrf.mxu1 }
 0xec1   : > { %v1915_v57 = vmul.f32 %v1909_v53, %v3906_v55 }
 0xec2   : > { %v1911_v58 = vpop.f32.mrf.mxu1 }
 0xec3   : > { %v3936_v59 = vadd.f32 %v1915_v57, %v3884_v0  ;;  %v1912_v60 = vadd.f32 %v2511_v51, %v1911_v58  ;;  %v2523_v51 = vld [vmem:[#allocation15 + $0x4] ss:$0 sm:$0xff] }
 0xec4   : > { %v2644_v61 = vpop.f32.mrf.mxu1 }
 0xec5   : > { %v1916_v62 = vmul.f32 %v1912_v60, %v3908_v56  ;;  %v1921_v63 = vsel %vm830_vm0, %v3936_v59, 0.0 }
 0xec6   : > { %1922 = vadd.xlane.f32.xlu1 %v1921_v63 }
 0xec7   : > { %v3942_v4 = vadd.f32 %v1916_v62, %v3886_v7 }
 0xec9   : > { %v1924_v6 = vsel %vm830_vm0, %v3942_v4, 0.0 }
 0xeca   : > { %1925 = vadd.xlane.f32.xlu1 %v1924_v6 }
 0xf4f   : > { %v1923_v55 = vpop.xlane.xlu1 %1922 }
 0xf50   : > { %v1927_v8 = vmul.f32 0.03125, %v1923_v55 }
 0xf52   : > { %v1929_v0 = vsub.f32 %v3936_v59, %v1927_v8 }
 0xf53   : > { %v1926_v9 = vpop.xlane.xlu1 %1925 }
 0xf54   : > { %v1928_v10 = vmul.f32 0.03125, %v1926_v9  ;;  %v1931_v12 = vmul.f32 %v1929_v0, %v1929_v0 }
 0xf56   : > { %v1930_v56 = vsub.f32 %v3942_v4, %v1928_v10  ;;  %v1933_v13 = vsel %vm830_vm0, %v1931_v12, 0.0 }
 0xf57   : > { %1934 = vadd.xlane.f32.xlu0 %v1933_v13 }
 0xf58   : > { %v1932_v14 = vmul.f32 %v1930_v56, %v1930_v56 }
 0xf5a   : > { %v1936_v7 = vsel %vm830_vm0, %v1932_v14, 0.0 }
 0xf5b   : > { %1937 = vadd.xlane.f32.xlu1 %v1936_v7 }
 0xfe0   : > { %v1935_v1 = vpop.xlane.xlu0 %1934 }
 0xfe1   : > { %v1939_v17 = vmul.f32 0.03125, %v1935_v1 }
 0xfe3   : > { %v1941_v19 = vadd.f32 1e-05, %v1939_v17 }
 0xfe4   : > { %v1938_v20 = vpop.xlane.xlu1 %1937 }
 0xfe5   : > { %2913 = vrsqrt.f32 %v1941_v19  ;;  %v1940_v21 = vmul.f32 0.03125, %v1938_v20 }
 0xfe7   : > { %v1942_v5 = vadd.f32 1e-05, %v1940_v21 }
 0xfe9   : > { %2915 = vrsqrt.f32 %v1942_v5 }
 0xff2   : > { %v2914_v22 = vpop.eup %2913 }
 0xff3   : > { %v1945_v23 = vmul.f32 %v2914_v22, %v1929_v0 }
 0xff5   : > { %v1951_v28 = vmul.f32 %v2515_v24, %v1945_v23 }
 0xff6   : > { %v2916_v26 = vpop.eup %2915 }
 0xff7   : > { %v1946_v27 = vmul.f32 %v2916_v26, %v1930_v56  ;;  %v1957_v29 = vadd.f32 %v2516_v11, %v1951_v28 }
 0xff9   : > { %v1952_v25 = vmul.f32 %v2515_v24, %v1946_v27 }
 0xffb   : > { %v1958_v30 = vadd.f32 %v2516_v11, %v1952_v25 }
 0xffd   : > { %v1963_v31 = vpack.c.bf16 %v1958_v30, %v1957_v29 }
 0xfff   : > { %2650 = vmatmul.mubr.msk.bf16.vlgmr.msra.gmra.mxu0 %vm830_vm0, %v1963_v31 }
0x10bf   : > { %v2018_v37 = vpop.f32.mrf.mxu0 }
0x10c0   : > { %v2019_v38 = vadd.f32 %v2517_v36, %v2018_v37 }
0x10c1   : > { %v2651_v39 = vpop.f32.mrf.mxu0 }
0x10c2   : > { %v2521_v2 = vmul.f32 -1.442695, %v2019_v38 }
0x10c3   : > { %v2021_v40 = vpop.f32.mrf.mxu0 }
0x10c4   : > { %2917 = vpow2.f32 %v2521_v2  ;;  %v2022_v41 = vadd.f32 %v2517_v36, %v2021_v40 }
0x10c5   : > { %v2652_v42 = vpop.f32.mrf.mxu0 }
0x10c6   : > { %v2522_v43 = vmul.f32 -1.442695, %v2022_v41 }
0x10c8   : > { %2919 = vpow2.f32 %v2522_v43 }
0x10d1   : > { %v2918_v44 = vpop.eup %2917 }
0x10d2   : > { %v2031_v3 = vadd.f32 1.0, %v2918_v44 }
0x10d4   : > { %2921 = vrcp.f32 %v2031_v3 }
0x10d5   : > { %v2920_v45 = vpop.eup %2919 }
0x10d6   : > { %v2032_v18 = vadd.f32 1.0, %v2920_v45 }
0x10d8   : > { %2923 = vrcp.f32 %v2032_v18 }
0x10e1   : > { %v2922_v46 = vpop.eup %2921 }
0x10e2   : > { %v2037_v48 = vmul.f32 %v2922_v46, %v2019_v38 }
0x10e5   : > { %v2924_v47 = vpop.eup %2923 }
0x10e6   : > { %v2038_v49 = vmul.f32 %v2924_v47, %v2022_v41 }
0x10e8   : > { %v2047_v50 = vpack.c.bf16 %v2038_v49, %v2037_v48 }
0x10ea   : > { %2662 = vmatmul.mubr.msk.bf16.vlgmr.msra.gmra.mxu1 %vm988_vm2, %v2047_v50 }
0x11aa   : > { %v2114_v52 = vpop.f32.mrf.mxu1 }
0x11ab   : > { %v2115_v53 = vadd.f32 %v2523_v51, %v2114_v52 }
0x11ac   : > { %v2663_v54 = vpop.f32.mrf.mxu1 }
0x11ad   : > { %v2121_v57 = vmul.f32 0.5, %v2115_v53 }
0x11ae   : > { %v2117_v58 = vpop.f32.mrf.mxu1 }
0x11af   : > { %v2118_v60 = vadd.f32 %v2523_v51, %v2117_v58  ;;  %v2123_v61 = vadd.f32 %v2121_v57, %v3936_v59 }
0x11b0   : > { %v2664_v62 = vpop.f32.mrf.mxu1 }
0x11b1   : > { %v2122_v63 = vmul.f32 0.5, %v2118_v60  ;;  %v2127_v6 = vsel %vm830_vm0, %v2123_v61, 0.0 }
0x11b2   : > { %2128 = vadd.xlane.f32.xlu0 %v2127_v6 }
0x11b3   : > { %v2124_v55 = vadd.f32 %v2122_v63, %v3942_v4 }
0x11b5   : > { %v2130_v8 = vsel %vm830_vm0, %v2124_v55, 0.0 }
0x11b6   : > { %2131 = vadd.xlane.f32.xlu1 %v2130_v8 }
0x123b   : > { %v2129_v0 = vpop.xlane.xlu0 %2128 }
0x123c   : > { %v2133_v9 = vmul.f32 0.03125, %v2129_v0 }
0x123e   : > { %v2135_v10 = vsub.f32 %v2123_v61, %v2133_v9 }
0x123f   : > { %v2132_v12 = vpop.xlane.xlu1 %2131 }
0x1240   : > { %v2134_v56 = vmul.f32 0.03125, %v2132_v12  ;;  %v2137_v59 = vmul.f32 %v2135_v10, %v2135_v10 }
0x1242   : > { %v2136_v13 = vsub.f32 %v2124_v55, %v2134_v56  ;;  %v2139_v14 = vsel %vm830_vm0, %v2137_v59, 0.0 }
0x1243   : > { %2140 = vadd.xlane.f32.xlu0 %v2139_v14 }
0x1244   : > { %v2138_v7 = vmul.f32 %v2136_v13, %v2136_v13 }
0x1246   : > { %v2142_v15 = vsel %vm830_vm0, %v2138_v7, 0.0 }
0x1247   : > { %2143 = vadd.xlane.f32.xlu1 %v2142_v15 }
0x1248   : > { %3178 = shalt.err (!%p3175_p4)
}
0x1249   : > { %s3179_s16 = scalar_lea.hbm %s3984_s23, 128  ;;  %s3183_s15 = scalar_lea.hbm %s4156_s28, 256 }
0x124a   : > { %p3180_p8 = scmp.ne.s32.totalorder %s3984_s23, %s3179_s16  ;;  %p3184_p10 = scmp.lt.s32.totalorder %s3984_s23, %s4156_s28 }
0x124b   : > { %p3185_p12 = scmp.lt.s32.totalorder %s3183_s15, %s3179_s16 }
0x124c   : > { %p3181_p9 = pnand %p3180_p8, %p4157_p2 }
0x124d   : > { %p3186_p13 = por %p3185_p12, %p3184_p10 }
0x124e   : > { %p3182_p11 = pneg %p3181_p9 }
0x1250   : > { %p3187_p1 = pnand %p3186_p13, %p3182_p11 }
0x1252   : > { %3190 = shalt.err (!%p3187_p1)
}
0x1253   : > { %s3330_s21 = smov 4   ;;  %s4158_s1 = smov 64   ;;  %v2529_v5 = vld [vmem:[#allocation11 + $0x4] ss:$0 sm:$0xff]  ;;  %v2530_v23 = vld [vmem:[#allocation12 + $0x4] ss:$0 sm:$0xff] }
0x1254   : > { %s4159_s3 = scalar_lea.sflag [#allocation23], %s3616_s12  ;;  %s4160_s0 = sld [smem:[#allocation46_spill]] }
0x1255   : > { %2700 = dma.vmem_to_hbm [thread:$0]  (%p4157_p2), %s3987_s24, 128, %s3984_s23, %s4159_s3, %s4158_s1, %s4158_s1, %s3330_s21  }
0x1256   : > { %s2550_s23 = sshll.u32 %s3464_s29, 8  ;;  %s2186_s24 = sshll.u32 %s3824_s17, 4  ;;  %s4023_s24 = int_to_ptr.vmem [resolvable:$true] %s2186_s24 }
0x1257   : > { %s2168_s15 = scalar_lea.sflag [#allocation8], %s3616_s12  ;;  %s3191_s19 = scalar_lea.vmem %s4023_s24, 256 }
0x1258   : > { %p3192_p5 = scmp.ne.s32.totalorder %s4023_s24, %s3191_s19  ;;  %s3331_s29 = smov [#allocation21]  }
0x1259   : > { %s3195_s21 = sshll.u32 %s3331_s29, 4  ;;  %s3196_s21 = int_to_ptr.vmem [resolvable:$false] %s3195_s21 }
0x125a   : > { %s4021_s22 = scalar_lea.hbm %s4160_s0, %s2550_s23  ;;  %p3193_p7 = pnand %p3192_p5, %p4157_p2 }
0x125b   : > { %s3197_s1 = scalar_lea.vmem %s3196_s21, 512  ;;  %p3198_p3 = scmp.lt.s32.totalorder %s4023_s24, %s3196_s21 }
0x125c   : > { %p3194_p6 = pneg %p3193_p7  ;;  %p3199_p0 = scmp.lt.s32.totalorder %s3197_s1, %s3191_s19 }
0x125e   : > { %p3200_p4 = por %p3199_p0, %p3198_p3 }
0x1260   : > { %p3201_p8 = pnand %p3200_p4, %p3194_p6 }
0x12cc   : > { %v2141_v4 = vpop.xlane.xlu0 %2140 }
0x12cd   : > { %v2145_v16 = vmul.f32 0.03125, %v2141_v4 }
0x12cf   : > { %v2147_v1 = vadd.f32 1e-05, %v2145_v16 }
0x12d0   : > { %v2144_v17 = vpop.xlane.xlu1 %2143 }
0x12d1   : > { %2925 = vrsqrt.f32 %v2147_v1  ;;  %v2146_v19 = vmul.f32 0.03125, %v2144_v17 }
0x12d3   : > { %v2148_v20 = vadd.f32 1e-05, %v2146_v19 }
0x12d5   : > { %2927 = vrsqrt.f32 %v2148_v20 }
0x12de   : > { %v2926_v21 = vpop.eup %2925 }
0x12df   : > { %v2151_v22 = vmul.f32 %v2926_v21, %v2135_v10 }
0x12e1   : > { %v2157_v24 = vmul.f32 %v2529_v5, %v2151_v22 }
0x12e2   : > { %v2928_v26 = vpop.eup %2927 }
0x12e3   : > { %v2152_v27 = vmul.f32 %v2928_v26, %v2136_v13  ;;  %v2163_v28 = vadd.f32 %v2530_v23, %v2157_v24 }
0x12e5   : > { %v2158_v11 = vmul.f32 %v2529_v5, %v2152_v27  ;;  %2165 = vst.msk [vmem:[%s3824_s17] sm:$0xff] %vm830_vm0, %v2163_v28 }
0x12e7   : > { %v2164_v25 = vadd.f32 %v2530_v23, %v2158_v11 }
0x12e9   : > { %2166 = vst.msk [vmem:[%s3824_s17 + $0x8] sm:$0xff] %vm830_vm0, %v2164_v25 }
0x12ea   : > { %3204 = shalt.err (!%p3201_p8)
}
0x12eb   : > { %s3205_s17 = scalar_lea.hbm %s4021_s22, 256  ;;  %s3209_s8 = scalar_lea.hbm %s4160_s0, 512 }
0x12ec   : > { %p3206_p9 = scmp.ne.s32.totalorder %s4021_s22, %s3205_s17  ;;  %p3210_p12 = scmp.lt.s32.totalorder %s4021_s22, %s4160_s0 }
0x12ed   : > { %p3211_p13 = scmp.lt.s32.totalorder %s3209_s8, %s3205_s17 }
0x12ee   : > { %p3207_p11 = pnand %p3206_p9, %p4157_p2 }
0x12ef   : > { %p3212_p1 = por %p3211_p13, %p3210_p12 }
0x12f0   : > { %p3208_p10 = pneg %p3207_p11 }
0x12f2   : > { %p3213_p5 = pnand %p3212_p1, %p3208_p10 }
0x12f4   : > { %3216 = shalt.err (!%p3213_p5)
}
0x12f5   : > { %s3332_s19 = smov 128   ;;  %s4161_s21 = smov 8  }
0x12f6   : > { %2699 = dma.vmem_to_hbm [thread:$0]  (%p4157_p2), %s4023_s24, 256, %s4021_s22, %s2168_s15, %s3332_s19, %s3332_s19, %s4161_s21  }
0x12f7 PF: > { %s2217_s1 = sand.u32 1, %s3275_s2   ;;  %p4162_p7 = scmp.ne.s32.totalorder %s4136_s18, 0 }
0x12f8   : > { %p4163_p6 = scmp.ge.s32.totalorder %s3287_s27, 2  ;;  %s2218_s17 = scalar_lea.sflag [#allocation8], %s2217_s1 }
0x12fa   : > { %p2733_p3 = pnand %p4163_p6, %p4162_p7 }
0x12fc   : > { %p2734_p0 = pneg %p2733_p3 }
0x12fe   : > { %3266 = dma.done.wait (%p2734_p0), %s2218_s17, 256  }
0x12ff   : > { %3268 = vsyncadd (%p2734_p0), %s2218_s17, 4294967040  ;;  %s2227_s3 = scalar_lea.sflag [#allocation23], %s2217_s1 }
0x1300   : > { %3270 = dma.done.wait (%p2734_p0), %s2227_s3, 128  }
0x1301   : > { %3272 = vsyncadd (%p2734_p0), %s2227_s3, 4294967168  ;;  %s4164_s20 = sld [smem:[#allocation31_spill]]  ;;  %p42_p2 = scmp.ge.s32.totalorder %s3553_s5, 4  }
0x1302   : > { %s4165_s2 = smov %s3279_s25  ;;  %s4166_s25 = smov %s3283_s26 }
0x1303   : > { %s4168_s27 = smov %s3553_s5  ;;  %44 = sbr.rel (!%p42_p2) target bundleno = 28 (0x1c), region = 231 }
0x1307   : > { %s4167_s26 = smov %s4164_s20 }
0x1308   :  { %2232 = vsyncpa [#allocation7], 1 }
0x1309   :  { %2234 = vsyncpa [#allocation7 + $0x1], 1 }
0x130a   :  { %2235 = vsyncpa [#allocation10], 1 }
0x130b   :  { %2236 = vsyncpa [#allocation13], 1 }
0x130c   :  { %2237 = vsyncpa [#allocation16], 1 }
0x130d   :  { %2238 = vsyncpa [#allocation19], 1 }
0x130e   :  { %2239 = vsyncpa [#allocation8], 1 }
0x130f   :  { %2241 = vsyncpa [#allocation8 + $0x1], 1 }
0x1310   :  { %2242 = vsyncpa [#allocation23], 1 }
0x1311   :  { %2244 = vsyncpa [#allocation23 + $0x1], 1 }

</bundles_post_ra>
